<compile_context>
chip_gen: v5e
topology: v5e:2x2
jax: 0.10.0
libtpu: 0.0.40
codegen_flags: <defaults>
</compile_context>

<pallas_src>
import functools
import math

import jax
import jax.numpy as jnp
from jax import lax
from jax.experimental import pallas as pl
from jax.experimental.pallas import tpu as pltpu

# ----- model hyper-parameters (defaults of the PyTorch module, small image) -----
IMG_W, IMG_H, IMG_C = 8, 8, 3          # obs_space["image"] = (W, H, C)
PATCH = 4
NUM_PATCHES = (IMG_H // PATCH) * (IMG_W // PATCH)     # 4
SEQ = NUM_PATCHES + 1                                 # CLS + patches = 5
SEQ_PAD = 8                                           # padded to the sublane tile
PATCH_FEAT = IMG_C * PATCH * PATCH                    # 48
EMBED = 64
NUM_HEADS = 2
HEAD_DIM = EMBED // NUM_HEADS                         # 32
NUM_LAYERS = 2
FFN = 2048            # nn.TransformerEncoderLayer default dim_feedforward
FFN_CHUNKS = 4
FFN_CHUNK = FFN // FFN_CHUNKS                         # 512
ACT_HID = 64
NUM_ACTIONS = 7       # e.g. MiniGrid action_space.n
LN_EPS = 1e-5
BATCH = 2
OUT_LANES = 128       # lane-dense output: [log-probs (7) | value (1) | zeros]
TB_MAX = 64           # samples per grid step (R = TB*SEQ_PAD <= 512 rows)

assert PATCH_FEAT <= EMBED
assert 2 * ACT_HID == OUT_LANES


# ------------------------------ kernel helpers ------------------------------
def _layer_norm(x, w, b):
    mu = jnp.mean(x, axis=-1, keepdims=True)
    var = jnp.mean((x - mu) ** 2, axis=-1, keepdims=True)
    return (x - mu) * lax.rsqrt(var + LN_EPS) * w + b


# ------------------------------ the Pallas kernel ---------------------------
def fused_forward_kernel(
    tok_ref,        # (R, D)            f32   patch features (padded), zero rows at CLS/pad slots
    add_ref,        # (SEQ_PAD, D)      f32   cls/pos/patch-bias additive table (pad rows zero)
    wqkv_ref,       # (L*H*3, D, Dh)    bf16  per-head Wq/Wk/Wv
    bqkv_ref,       # (L*H*3, 1, Dh)    f32   per-head bq/bk/bv
    wo_ref,         # (L*H, Dh, D)      bf16  per-head out-proj rows
    ln_ref,         # (L, 6, D)         f32   [ln1_w, ln1_b, bo, ff2_b, ln2_w, ln2_b]
    ff1_w_ref,      # (L*NC, D, FC)     bf16
    ff1_b_ref,      # (L*NC, 1, FC)     f32
    ff2_w_ref,      # (L*NC, FC, D)     bf16
    head_wA_ref,    # (3D, 128)         bf16  [patch_embed(pad) ; fusion_fc ; actor1|critic1]
    head_wB_ref,    # (128, 128)        bf16  block-diag [actor2 | critic2]
    head_vecs_ref,  # (3, 128)          f32   [fusion_b(pad), actor1_b|critic1_b, actor2_b|critic2_b]
    out_ref,        # (TB, 128)         f32
):
    f32, bf16 = jnp.float32, jnp.bfloat16
    D, Dh, H = EMBED, HEAD_DIM, NUM_HEADS
    R = tok_ref.shape[0]
    TB = R // SEQ_PAD
    scale = 1.0 / math.sqrt(Dh)

    # --- unpack small packed weights (all slices start at sublane/lane offset 0 or tile-aligned) ---
    hwA = head_wA_ref[...]                     # (3D, 128) bf16
    pe_w = hwA[0:D, 0:D]                       # patch embed (input rows padded with zeros)
    fus_w = hwA[D:2 * D, 0:D]                  # fusion_fc
    ac1_w = hwA[2 * D:3 * D, :]                # [actor.l1 | critic.l1]
    hv = head_vecs_ref[...]                    # (3, 128) f32
    fus_b = hv[0:1, 0:D]
    ac1_b = hv[1:2, :]
    ac2_b = hv[2:3, :]

    # key mask: only the first SEQ of SEQ_PAD key slots per sample are real tokens
    kmask = lax.broadcasted_iota(jnp.int32, (TB, SEQ_PAD, SEQ_PAD), 2) < SEQ

    # --- token embedding + positional add (broadcast the (8, D) table over samples) ---
    x = jnp.dot(tok_ref[...].astype(bf16), pe_w, preferred_element_type=f32)        # (R, D) f32
    x = (x.reshape(TB, SEQ_PAD, D) + add_ref[...][None, :, :]).reshape(R, D)

    # --- transformer encoder layers (post-norm, ReLU FFN, dropout = identity) ---
    for l in range(NUM_LAYERS):
        lv = ln_ref[l]                         # (6, D) f32
        x_bf = x.astype(bf16)

        attn = lv[2:3, :]                      # start from out-proj bias (1, D)
        for h in range(H):
            base = (l * H + h) * 3
            qh = jnp.dot(x_bf, wqkv_ref[base + 0], preferred_element_type=f32) + bqkv_ref[base + 0]
            kh = jnp.dot(x_bf, wqkv_ref[base + 1], preferred_element_type=f32) + bqkv_ref[base + 1]
            vh = jnp.dot(x_bf, wqkv_ref[base + 2], preferred_element_type=f32) + bqkv_ref[base + 2]
            qh3 = qh.reshape(TB, SEQ_PAD, Dh).astype(bf16)
            kh3 = kh.reshape(TB, SEQ_PAD, Dh).astype(bf16)
            vh3 = vh.reshape(TB, SEQ_PAD, Dh).astype(bf16)

            s = jnp.einsum('bqd,bkd->bqk', qh3, kh3,
                           preferred_element_type=f32) * scale                       # (TB, 8, 8)
            s = jnp.where(kmask, s, -1e30)
            s = s - jnp.max(s, axis=-1, keepdims=True)
            e = jnp.exp(s)
            p = e * pl.reciprocal(jnp.sum(e, axis=-1, keepdims=True), approx=True)
            oh = jnp.einsum('bqk,bkd->bqd', p.astype(bf16), vh3,
                            preferred_element_type=f32)                              # (TB, 8, Dh)
            attn = attn + jnp.dot(oh.reshape(R, Dh).astype(bf16), wo_ref[l * H + h],
                                  preferred_element_type=f32)                         # (R, D)

        x = _layer_norm(x + attn, lv[0:1, :], lv[1:2, :])

        # chunked FFN: keeps the live intermediate at (R, FFN_CHUNK) instead of (R, FFN)
        x_bf = x.astype(bf16)
        ff_out = lv[3:4, :]                    # start from ff2 bias (1, D)
        for c in range(FFN_CHUNKS):
            ci = l * FFN_CHUNKS + c
            hid = jnp.maximum(
                jnp.dot(x_bf, ff1_w_ref[ci], preferred_element_type=f32) + ff1_b_ref[ci], 0.0)
            ff_out = ff_out + jnp.dot(hid.astype(bf16), ff2_w_ref[ci],
                                      preferred_element_type=f32)
        x = _layer_norm(x + ff_out, lv[4:5, :], lv[5:6, :])

    # --- CLS rows: plain slice of the per-sample layout ---
    rep = x.reshape(TB, SEQ_PAD, D)[:, 0, :]                                          # (TB, D)

    # --- fusion fc + fused actor/critic heads ---
    fused = jnp.dot(rep.astype(bf16), fus_w, preferred_element_type=f32) + fus_b
    hac = jnp.tanh(jnp.dot(fused.astype(bf16), ac1_w, preferred_element_type=f32) + ac1_b)
    head_out = jnp.dot(hac.astype(bf16), head_wB_ref[...],
                       preferred_element_type=f32) + ac2_b                            # (TB, 128)

    # log-softmax over lanes 0..NUM_ACTIONS-1, keep value (lane NUM_ACTIONS) as-is
    col = lax.broadcasted_iota(jnp.int32, head_out.shape, 1)
    is_logit = col < NUM_ACTIONS
    masked = jnp.where(is_logit, head_out, -1e30)
    m = jnp.max(masked, axis=-1, keepdims=True)
    e2 = jnp.where(is_logit, jnp.exp(head_out - m), 0.0)
    lse = m + jnp.log(jnp.sum(e2, axis=-1, keepdims=True))
    out_ref[...] = jnp.where(is_logit, head_out - lse, head_out)


# ------------------------------ glue (plain JAX) -----------------------------
def extract_patches(img_bwhc):
    """(B, W, H, C) -> (B, num_patches, C*p*p), matching torch unfold ordering."""
    B = img_bwhc.shape[0]
    x = jnp.transpose(img_bwhc, (0, 3, 2, 1))                      # (B, C, H, W)
    x = x.reshape(B, IMG_C, IMG_H // PATCH, PATCH, IMG_W // PATCH, PATCH)
    x = jnp.transpose(x, (0, 1, 2, 4, 3, 5))                        # (B, C, H/p, W/p, p, p)
    x = x.reshape(B, IMG_C, NUM_PATCHES, PATCH, PATCH)
    x = jnp.transpose(x, (0, 2, 1, 3, 4))                           # (B, nP, C, p, p)
    return x.reshape(B, NUM_PATCHES, PATCH_FEAT)


def build_token_input(img):
    """(B, W, H, C) -> (B, SEQ_PAD, EMBED): zero CLS row, patch feats padded, zero pad rows."""
    B = img.shape[0]
    patches = extract_patches(img)                                   # (B, P, 48)
    patches = jnp.pad(patches, ((0, 0), (0, 0), (0, EMBED - PATCH_FEAT)))
    tok = jnp.zeros((B, SEQ_PAD, EMBED), jnp.float32)
    return tok.at[:, 1:1 + NUM_PATCHES, :].set(patches)


def init_params(key):
    """Synthetic parameters in (in_features, out_features) layout. Weight matrices are
    bf16 round-tripped so the Pallas kernel (bf16 weights) and the f32 reference use
    identical weight values."""
    ks = iter(jax.random.split(key, 32))
    nrm = lambda shape: 0.02 * jax.random.normal(next(ks), shape, dtype=jnp.float32)
    bfr = lambda a: a.astype(jnp.bfloat16).astype(jnp.float32)
    L, D = NUM_LAYERS, EMBED
    raw = {
        "pe_w": bfr(nrm((PATCH_FEAT, D))), "pe_b": nrm((D,)),
        "cls": nrm((D,)), "pos": nrm((SEQ, D)),
        "wq": bfr(nrm((L, D, D))), "bq": nrm((L, D)),
        "wk": bfr(nrm((L, D, D))), "bk": nrm((L, D)),
        "wv": bfr(nrm((L, D, D))), "bv": nrm((L, D)),
        "wo": bfr(nrm((L, D, D))), "bo": nrm((L, D)),
        "ln1_w": 1.0 + nrm((L, D)), "ln1_b": nrm((L, D)),
        "ff1_w": bfr(nrm((L, D, FFN))), "ff1_b": nrm((L, FFN)),
        "ff2_w": bfr(nrm((L, FFN, D))), "ff2_b": nrm((L, D)),
        "ln2_w": 1.0 + nrm((L, D)), "ln2_b": nrm((L, D)),
        "fus_w": bfr(nrm((D, D))), "fus_b": nrm((D,)),
        "a1_w": bfr(nrm((D, ACT_HID))), "a1_b": nrm((ACT_HID,)),
        "a2_w": bfr(nrm((ACT_HID, NUM_ACTIONS))), "a2_b": nrm((NUM_ACTIONS,)),
        "c1_w": bfr(nrm((D, ACT_HID))), "c1_b": nrm((ACT_HID,)),
        "c2_w": bfr(nrm((ACT_HID, 1))), "c2_b": nrm((1,)),
    }
    return raw


def pack_params(raw):
    """Pack ~30 small arrays into 11 kernel inputs; matmul weights -> bf16; q/k/v/Wo pre-split per
    head; FFN pre-split into lane-aligned chunks; out-proj & ff2 biases folded into the LN table."""
    bf16 = jnp.bfloat16
    L, D, H, Dh = NUM_LAYERS, EMBED, NUM_HEADS, HEAD_DIM

    def split_heads_w(w):   # (L, D, D) -> (L, H, D, Dh): head h = output cols [h*Dh:(h+1)*Dh]
        return w.reshape(L, D, H, Dh).transpose(0, 2, 1, 3)

    wqkv = jnp.stack([split_heads_w(raw["wq"]), split_heads_w(raw["wk"]),
                      split_heads_w(raw["wv"])], axis=2)                 # (L, H, 3, D, Dh)
    wqkv = wqkv.reshape(L * H * 3, D, Dh).astype(bf16)

    bqkv = jnp.stack([raw["bq"].reshape(L, H, Dh), raw["bk"].reshape(L, H, Dh),
                      raw["bv"].reshape(L, H, Dh)], axis=2)              # (L, H, 3, Dh)
    bqkv = bqkv.reshape(L * H * 3, 1, Dh).astype(jnp.float32)

    wo = raw["wo"].reshape(L, H, Dh, D).reshape(L * H, Dh, D).astype(bf16)

    ln = jnp.stack([raw["ln1_w"], raw["ln1_b"], raw["bo"], raw["ff2_b"],
                    raw["ln2_w"], raw["ln2_b"]], axis=1)                 # (L, 6, D)

    ff1_w = (raw["ff1_w"].reshape(L, D, FFN_CHUNKS, FFN_CHUNK)
             .transpose(0, 2, 1, 3).reshape(L * FFN_CHUNKS, D, FFN_CHUNK).astype(bf16))
    ff1_b = raw["ff1_b"].reshape(L * FFN_CHUNKS, 1, FFN_CHUNK)
    ff2_w = raw["ff2_w"].reshape(L * FFN_CHUNKS, FFN_CHUNK, D).astype(bf16)

    pe_w_pad = jnp.zeros((D, D), jnp.float32).at[:PATCH_FEAT, :].set(raw["pe_w"])
    head_wA = jnp.zeros((3 * D, 2 * ACT_HID), jnp.float32)
    head_wA = head_wA.at[0:D, 0:D].set(pe_w_pad)
    head_wA = head_wA.at[D:2 * D, 0:D].set(raw["fus_w"])
    head_wA = head_wA.at[2 * D:3 * D, :].set(
        jnp.concatenate([raw["a1_w"], raw["c1_w"]], axis=1))
    head_wA = head_wA.astype(bf16)

    head_wB = jnp.zeros((2 * ACT_HID, OUT_LANES), jnp.float32)
    head_wB = head_wB.at[0:ACT_HID, 0:NUM_ACTIONS].set(raw["a2_w"])
    head_wB = head_wB.at[ACT_HID:, NUM_ACTIONS:NUM_ACTIONS + 1].set(raw["c2_w"])
    head_wB = head_wB.astype(bf16)

    head_vecs = jnp.zeros((3, OUT_LANES), jnp.float32)
    head_vecs = head_vecs.at[0, 0:D].set(raw["fus_b"])
    head_vecs = head_vecs.at[1, :].set(jnp.concatenate([raw["a1_b"], raw["c1_b"]]))
    head_vecs = head_vecs.at[2, 0:NUM_ACTIONS].set(raw["a2_b"])
    head_vecs = head_vecs.at[2, NUM_ACTIONS].set(raw["c2_b"][0])

    pos_add = jnp.zeros((SEQ_PAD, D), jnp.float32)
    pos_add = pos_add.at[0].set(raw["cls"] + raw["pos"][0])
    pos_add = pos_add.at[1:SEQ].set(raw["pe_b"][None, :] + raw["pos"][1:])

    return dict(pos_add=pos_add, wqkv=wqkv, bqkv=bqkv, wo=wo, ln=ln,
                ff1_w=ff1_w, ff1_b=ff1_b, ff2_w=ff2_w,
                head_wA=head_wA, head_wB=head_wB, head_vecs=head_vecs)


def _zero_map(b, nd):
    return (0,) * nd


def late_fusion_forward(img, kp, tb_max=TB_MAX):
    B = img.shape[0]
    TB = min(tb_max, B)                 # samples per grid step; R = TB*8 rows of MXU work
    nblk = pl.cdiv(B, TB)
    B_pad = nblk * TB
    R_blk = TB * SEQ_PAD

    tok = build_token_input(img)                                      # (B, 8, D)
    if B_pad != B:
        tok = jnp.pad(tok, ((0, B_pad - B), (0, 0), (0, 0)))          # zero-sample tail padding
    tok = tok.reshape(B_pad * SEQ_PAD, EMBED)

    consts = [kp["pos_add"], kp["wqkv"], kp["bqkv"], kp["wo"], kp["ln"],
              kp["ff1_w"], kp["ff1_b"], kp["ff2_w"],
              kp["head_wA"], kp["head_wB"], kp["head_vecs"]]

    in_specs = [pl.BlockSpec((R_blk, EMBED), lambda b: (b, 0))] + \
               [pl.BlockSpec(c.shape, functools.partial(_zero_map, nd=c.ndim)) for c in consts]

    out = pl.pallas_call(
        fused_forward_kernel,
        out_shape=jax.ShapeDtypeStruct((B_pad, OUT_LANES), jnp.float32),
        grid=(nblk,),
        in_specs=in_specs,
        out_specs=pl.BlockSpec((TB, OUT_LANES), lambda b: (b, 0)),
        compiler_params=pltpu.CompilerParams(
            dimension_semantics=("parallel",),
            vmem_limit_bytes=40 * 1024 * 1024,     # fits v7x 64 MiB with headroom
        ),
    )(tok, *consts)

    out = out[:B]
    # dist = Categorical(logits=log_softmax(logits)) -> return its normalized log-probs.
    # value = critic(fused).squeeze(1)
    return out[:, :NUM_ACTIONS], out[:, NUM_ACTIONS]


# ------------------------------ pure-JAX reference ---------------------------
def reference_forward(img, raw):
    B = img.shape[0]
    patches = extract_patches(img)
    tok = patches @ raw["pe_w"] + raw["pe_b"]
    x = jnp.concatenate(
        [jnp.broadcast_to(raw["cls"][None, None, :], (B, 1, EMBED)), tok], axis=1)
    x = x + raw["pos"][None]

    def ln(v, w, b):
        mu = v.mean(-1, keepdims=True)
        var = ((v - mu) ** 2).mean(-1, keepdims=True)
        return (v - mu) / jnp.sqrt(var + LN_EPS) * w + b

    for l in range(NUM_LAYERS):
        q = x @ raw["wq"][l] + raw["bq"][l]
        k = x @ raw["wk"][l] + raw["bk"][l]
        v = x @ raw["wv"][l] + raw["bv"][l]
        qh = q.reshape(B, SEQ, NUM_HEADS, HEAD_DIM).transpose(0, 2, 1, 3)
        kh = k.reshape(B, SEQ, NUM_HEADS, HEAD_DIM).transpose(0, 2, 1, 3)
        vh = v.reshape(B, SEQ, NUM_HEADS, HEAD_DIM).transpose(0, 2, 1, 3)
        s = jnp.einsum("bhqd,bhkd->bhqk", qh, kh) / math.sqrt(HEAD_DIM)
        p = jax.nn.softmax(s, axis=-1)
        o = jnp.einsum("bhqk,bhkd->bhqd", p, vh).transpose(0, 2, 1, 3).reshape(B, SEQ, EMBED)
        attn = o @ raw["wo"][l] + raw["bo"][l]
        x = ln(x + attn, raw["ln1_w"][l], raw["ln1_b"][l])
        h = jax.nn.relu(x @ raw["ff1_w"][l] + raw["ff1_b"][l]) @ raw["ff2_w"][l] + raw["ff2_b"][l]
        x = ln(x + h, raw["ln2_w"][l], raw["ln2_b"][l])

    rep = x[:, 0, :]
    fused = rep @ raw["fus_w"] + raw["fus_b"]
    logits = jnp.tanh(fused @ raw["a1_w"] + raw["a1_b"]) @ raw["a2_w"] + raw["a2_b"]
    logp = jax.nn.log_softmax(logits, axis=-1)
    value = (jnp.tanh(fused @ raw["c1_w"] + raw["c1_b"]) @ raw["c2_w"] + raw["c2_b"])[:, 0]
    return logp, value


if __name__ == "__main__":
    key = jax.random.PRNGKey(0)
    k_img, k_par = jax.random.split(key)
    img = jax.random.uniform(k_img, (BATCH, IMG_W, IMG_H, IMG_C), jnp.float32, 0.0, 10.0)
    raw = init_params(k_par)
    kp = pack_params(raw)

    logp, value = late_fusion_forward(img, kp)
    logp = jax.block_until_ready(logp)
    value = jax.block_until_ready(value)

    ref_logp, ref_value = reference_forward(img, raw)
    assert logp.shape == (BATCH, NUM_ACTIONS) and value.shape == (BATCH,)
    assert bool(jnp.all(jnp.isfinite(logp))) and bool(jnp.all(jnp.isfinite(value)))
    assert bool(jnp.allclose(jnp.sum(jnp.exp(logp), axis=-1), 1.0, atol=1e-3))
    assert bool(jnp.allclose(logp, ref_logp, atol=1e-2, rtol=1e-2))
    assert bool(jnp.allclose(value, ref_value, atol=1e-2, rtol=1e-2))
    print("KERNEL_OK")
</pallas_src>

<mosaic_0001>
module attributes {stable_mosaic.version = 11 : i64} {
  func.func @fused_forward_kernel(%arg0: i32, %arg1: memref<16x64xf32, #tpu.memory_space<vmem>>, %arg2: memref<8x64xf32, #tpu.memory_space<vmem>>, %arg3: memref<12x64x32xbf16, #tpu.memory_space<vmem>>, %arg4: memref<12x1x32xf32, #tpu.memory_space<vmem>>, %arg5: memref<4x32x64xbf16, #tpu.memory_space<vmem>>, %arg6: memref<2x6x64xf32, #tpu.memory_space<vmem>>, %arg7: memref<8x64x512xbf16, #tpu.memory_space<vmem>>, %arg8: memref<8x1x512xf32, #tpu.memory_space<vmem>>, %arg9: memref<8x512x64xbf16, #tpu.memory_space<vmem>>, %arg10: memref<192x128xbf16, #tpu.memory_space<vmem>>, %arg11: memref<128x128xbf16, #tpu.memory_space<vmem>>, %arg12: memref<3x128xf32, #tpu.memory_space<vmem>>, %arg13: memref<2x128xf32, #tpu.memory_space<vmem>>) attributes {dimension_semantics = [#tpu.dimension_semantics<parallel>], iteration_bounds = array<i64: 1>, scalar_prefetch = 0 : i64, scratch_operands = 0 : i64, tpu.core_type = #tpu.core_type<tc>, window_params = [{transform_indices = @transform_0, window_bounds = array<i64: 16, 64>}, {pipeline_mode = #tpu.pipeline_mode<synchronous>, transform_indices = @transform_1, window_bounds = array<i64: 8, 64>}, {pipeline_mode = #tpu.pipeline_mode<synchronous>, transform_indices = @transform_2, window_bounds = array<i64: 12, 64, 32>}, {pipeline_mode = #tpu.pipeline_mode<synchronous>, transform_indices = @transform_3, window_bounds = array<i64: 12, 1, 32>}, {pipeline_mode = #tpu.pipeline_mode<synchronous>, transform_indices = @transform_4, window_bounds = array<i64: 4, 32, 64>}, {pipeline_mode = #tpu.pipeline_mode<synchronous>, transform_indices = @transform_5, window_bounds = array<i64: 2, 6, 64>}, {pipeline_mode = #tpu.pipeline_mode<synchronous>, transform_indices = @transform_6, window_bounds = array<i64: 8, 64, 512>}, {pipeline_mode = #tpu.pipeline_mode<synchronous>, transform_indices = @transform_7, window_bounds = array<i64: 8, 1, 512>}, {pipeline_mode = #tpu.pipeline_mode<synchronous>, transform_indices = @transform_8, window_bounds = array<i64: 8, 512, 64>}, {pipeline_mode = #tpu.pipeline_mode<synchronous>, transform_indices = @transform_9, window_bounds = array<i64: 192, 128>}, {pipeline_mode = #tpu.pipeline_mode<synchronous>, transform_indices = @transform_10, window_bounds = array<i64: 128, 128>}, {pipeline_mode = #tpu.pipeline_mode<synchronous>, transform_indices = @transform_11, window_bounds = array<i64: 3, 128>}, {transform_indices = @transform_12, window_bounds = array<i64: 2, 128>}]} {
    %c0 = arith.constant 0 : index
    %c0_0 = arith.constant 0 : index
    %0 = vector.load %arg10[%c0, %c0_0] : memref<192x128xbf16, #tpu.memory_space<vmem>>, vector<192x128xbf16>
    %1 = vector.extract_strided_slice %0 {offsets = [0, 0], sizes = [64, 64], strides = [1, 1]} : vector<192x128xbf16> to vector<64x64xbf16>
    %2 = vector.extract_strided_slice %0 {offsets = [64, 0], sizes = [64, 64], strides = [1, 1]} : vector<192x128xbf16> to vector<64x64xbf16>
    %3 = vector.extract_strided_slice %0 {offsets = [128, 0], sizes = [64, 128], strides = [1, 1]} : vector<192x128xbf16> to vector<64x128xbf16>
    %c0_1 = arith.constant 0 : index
    %c0_2 = arith.constant 0 : index
    %4 = vector.load %arg12[%c0_1, %c0_2] : memref<3x128xf32, #tpu.memory_space<vmem>>, vector<3x128xf32>
    %5 = vector.extract_strided_slice %4 {offsets = [0, 0], sizes = [1, 64], strides = [1, 1]} : vector<3x128xf32> to vector<1x64xf32>
    %6 = vector.extract_strided_slice %4 {offsets = [1, 0], sizes = [1, 128], strides = [1, 1]} : vector<3x128xf32> to vector<1x128xf32>
    %7 = vector.extract_strided_slice %4 {offsets = [2, 0], sizes = [1, 128], strides = [1, 1]} : vector<3x128xf32> to vector<1x128xf32>
    %8 = tpu.iota {dimensions = array<i32: 2>} : vector<2x8x8xi32>
    %c5_i32 = arith.constant 5 : i32
    %9 = vector.broadcast %c5_i32 : i32 to vector<2x8x8xi32>
    %10 = arith.cmpi slt, %8, %9 : vector<2x8x8xi32>
    %c0_3 = arith.constant 0 : index
    %c0_4 = arith.constant 0 : index
    %11 = vector.load %arg1[%c0_3, %c0_4] : memref<16x64xf32, #tpu.memory_space<vmem>>, vector<16x64xf32>
    %12 = arith.truncf %11 : vector<16x64xf32> to vector<16x64xbf16>
    %cst = arith.constant dense<0.000000e+00> : vector<16x64xf32>
    %13 = tpu.matmul %12, %1, %cst {dimension_numbers = #tpu.dot_dimension_numbers<[1], [0], [0], [1], [0, 0, 1, 1], [], []>} : vector<16x64xbf16>, vector<64x64xbf16>, vector<16x64xf32> -> vector<16x64xf32>
    %14 = vector.shape_cast %13 : vector<16x64xf32> to vector<2x8x64xf32>
    %c0_5 = arith.constant 0 : index
    %c0_6 = arith.constant 0 : index
    %15 = vector.load %arg2[%c0_5, %c0_6] : memref<8x64xf32, #tpu.memory_space<vmem>>, vector<8x64xf32>
    %16 = vector.shape_cast %15 : vector<8x64xf32> to vector<1x8x64xf32>
    %17 = vector.broadcast %16 : vector<1x8x64xf32> to vector<2x8x64xf32>
    %18 = arith.addf %14, %17 : vector<2x8x64xf32>
    %19 = vector.shape_cast %18 : vector<2x8x64xf32> to vector<16x64xf32>
    %c0_7 = arith.constant 0 : index
    %c0_8 = arith.constant 0 : index
    %c0_9 = arith.constant 0 : index
    %20 = vector.load %arg6[%c0_7, %c0_8, %c0_9] : memref<2x6x64xf32, #tpu.memory_space<vmem>>, vector<1x6x64xf32>
    %21 = vector.shape_cast %20 : vector<1x6x64xf32> to vector<6x64xf32>
    %22 = arith.truncf %19 : vector<16x64xf32> to vector<16x64xbf16>
    %23 = vector.extract_strided_slice %21 {offsets = [2, 0], sizes = [1, 64], strides = [1, 1]} : vector<6x64xf32> to vector<1x64xf32>
    %c0_10 = arith.constant 0 : index
    %c0_11 = arith.constant 0 : index
    %c0_12 = arith.constant 0 : index
    %24 = vector.load %arg3[%c0_10, %c0_11, %c0_12] : memref<12x64x32xbf16, #tpu.memory_space<vmem>>, vector<1x64x32xbf16>
    %25 = vector.shape_cast %24 : vector<1x64x32xbf16> to vector<64x32xbf16>
    %cst_13 = arith.constant dense<0.000000e+00> : vector<16x32xf32>
    %26 = tpu.matmul %22, %25, %cst_13 {dimension_numbers = #tpu.dot_dimension_numbers<[1], [0], [0], [1], [0, 0, 1, 1], [], []>} : vector<16x64xbf16>, vector<64x32xbf16>, vector<16x32xf32> -> vector<16x32xf32>
    %c0_14 = arith.constant 0 : index
    %c0_15 = arith.constant 0 : index
    %c0_16 = arith.constant 0 : index
    %27 = vector.load %arg4[%c0_14, %c0_15, %c0_16] : memref<12x1x32xf32, #tpu.memory_space<vmem>>, vector<1x1x32xf32>
    %28 = vector.shape_cast %27 : vector<1x1x32xf32> to vector<1x32xf32>
    %29 = vector.broadcast %28 : vector<1x32xf32> to vector<16x32xf32>
    %30 = arith.addf %26, %29 : vector<16x32xf32>
    %c1 = arith.constant 1 : index
    %c0_17 = arith.constant 0 : index
    %c0_18 = arith.constant 0 : index
    %31 = vector.load %arg3[%c1, %c0_17, %c0_18] : memref<12x64x32xbf16, #tpu.memory_space<vmem>>, vector<1x64x32xbf16>
    %32 = vector.shape_cast %31 : vector<1x64x32xbf16> to vector<64x32xbf16>
    %cst_19 = arith.constant dense<0.000000e+00> : vector<16x32xf32>
    %33 = tpu.matmul %22, %32, %cst_19 {dimension_numbers = #tpu.dot_dimension_numbers<[1], [0], [0], [1], [0, 0, 1, 1], [], []>} : vector<16x64xbf16>, vector<64x32xbf16>, vector<16x32xf32> -> vector<16x32xf32>
    %c1_20 = arith.constant 1 : index
    %c0_21 = arith.constant 0 : index
    %c0_22 = arith.constant 0 : index
    %34 = vector.load %arg4[%c1_20, %c0_21, %c0_22] : memref<12x1x32xf32, #tpu.memory_space<vmem>>, vector<1x1x32xf32>
    %35 = vector.shape_cast %34 : vector<1x1x32xf32> to vector<1x32xf32>
    %36 = vector.broadcast %35 : vector<1x32xf32> to vector<16x32xf32>
    %37 = arith.addf %33, %36 : vector<16x32xf32>
    %c2 = arith.constant 2 : index
    %c0_23 = arith.constant 0 : index
    %c0_24 = arith.constant 0 : index
    %38 = vector.load %arg3[%c2, %c0_23, %c0_24] : memref<12x64x32xbf16, #tpu.memory_space<vmem>>, vector<1x64x32xbf16>
    %39 = vector.shape_cast %38 : vector<1x64x32xbf16> to vector<64x32xbf16>
    %cst_25 = arith.constant dense<0.000000e+00> : vector<16x32xf32>
    %40 = tpu.matmul %22, %39, %cst_25 {dimension_numbers = #tpu.dot_dimension_numbers<[1], [0], [0], [1], [0, 0, 1, 1], [], []>} : vector<16x64xbf16>, vector<64x32xbf16>, vector<16x32xf32> -> vector<16x32xf32>
    %c2_26 = arith.constant 2 : index
    %c0_27 = arith.constant 0 : index
    %c0_28 = arith.constant 0 : index
    %41 = vector.load %arg4[%c2_26, %c0_27, %c0_28] : memref<12x1x32xf32, #tpu.memory_space<vmem>>, vector<1x1x32xf32>
    %42 = vector.shape_cast %41 : vector<1x1x32xf32> to vector<1x32xf32>
    %43 = vector.broadcast %42 : vector<1x32xf32> to vector<16x32xf32>
    %44 = arith.addf %40, %43 : vector<16x32xf32>
    %45 = vector.shape_cast %30 : vector<16x32xf32> to vector<2x8x32xf32>
    %46 = arith.truncf %45 : vector<2x8x32xf32> to vector<2x8x32xbf16>
    %47 = vector.shape_cast %37 : vector<16x32xf32> to vector<2x8x32xf32>
    %48 = arith.truncf %47 : vector<2x8x32xf32> to vector<2x8x32xbf16>
    %49 = vector.shape_cast %44 : vector<16x32xf32> to vector<2x8x32xf32>
    %50 = arith.truncf %49 : vector<2x8x32xf32> to vector<2x8x32xbf16>
    "tpu.trace_start"() <{level = 10 : i32, message = "bqd,bkd->bqk"}> : () -> ()
    %cst_29 = arith.constant dense<0.000000e+00> : vector<2x8x8xf32>
    %51 = tpu.matmul %46, %48, %cst_29 {dimension_numbers = #tpu.dot_dimension_numbers<[2], [2], [1], [1], [0, 0, 0, 1, 1, 1], [0], [0]>} : vector<2x8x32xbf16>, vector<2x8x32xbf16>, vector<2x8x8xf32> -> vector<2x8x8xf32>
    "tpu.trace_stop"() : () -> ()
    %cst_30 = arith.constant 0.176776692 : f32
    %52 = vector.broadcast %cst_30 : f32 to vector<2x8x8xf32>
    %53 = arith.mulf %51, %52 : vector<2x8x8xf32>
    %cst_31 = arith.constant -1.000000e+30 : f32
    %54 = vector.broadcast %cst_31 : f32 to vector<2x8x8xf32>
    %55 = arith.select %10, %53, %54 : vector<2x8x8xi1>, vector<2x8x8xf32>
    %cst_32 = arith.constant dense<0xFF800000> : vector<2x8xf32>
    %56 = vector.multi_reduction <maximumf>, %55, %cst_32 [2] : vector<2x8x8xf32> to vector<2x8xf32>
    %57 = vector.shape_cast %56 : vector<2x8xf32> to vector<2x8x1xf32>
    %58 = vector.broadcast %57 : vector<2x8x1xf32> to vector<2x8x8xf32>
    %59 = arith.subf %55, %58 : vector<2x8x8xf32>
    %60 = math.exp %59 : vector<2x8x8xf32>
    %cst_33 = arith.constant dense<0.000000e+00> : vector<2x8xf32>
    %61 = vector.multi_reduction <add>, %60, %cst_33 [2] : vector<2x8x8xf32> to vector<2x8xf32>
    %62 = vector.shape_cast %61 : vector<2x8xf32> to vector<2x8x1xf32>
    %63 = tpu.reciprocal %62 {approx = true} : vector<2x8x1xf32> -> vector<2x8x1xf32>
    %64 = vector.broadcast %63 : vector<2x8x1xf32> to vector<2x8x8xf32>
    %65 = arith.mulf %60, %64 : vector<2x8x8xf32>
    %66 = arith.truncf %65 : vector<2x8x8xf32> to vector<2x8x8xbf16>
    "tpu.trace_start"() <{level = 10 : i32, message = "bqk,bkd->bqd"}> : () -> ()
    %cst_34 = arith.constant dense<0.000000e+00> : vector<2x8x32xf32>
    %67 = tpu.matmul %66, %50, %cst_34 {dimension_numbers = #tpu.dot_dimension_numbers<[2], [1], [1], [2], [0, 0, 0, 1, 1, 2], [0], [0]>} : vector<2x8x8xbf16>, vector<2x8x32xbf16>, vector<2x8x32xf32> -> vector<2x8x32xf32>
    "tpu.trace_stop"() : () -> ()
    %68 = vector.shape_cast %67 : vector<2x8x32xf32> to vector<16x32xf32>
    %69 = arith.truncf %68 : vector<16x32xf32> to vector<16x32xbf16>
    %c0_35 = arith.constant 0 : index
    %c0_36 = arith.constant 0 : index
    %c0_37 = arith.constant 0 : index
    %70 = vector.load %arg5[%c0_35, %c0_36, %c0_37] : memref<4x32x64xbf16, #tpu.memory_space<vmem>>, vector<1x32x64xbf16>
    %71 = vector.shape_cast %70 : vector<1x32x64xbf16> to vector<32x64xbf16>
    %cst_38 = arith.constant dense<0.000000e+00> : vector<16x64xf32>
    %72 = tpu.matmul %69, %71, %cst_38 {dimension_numbers = #tpu.dot_dimension_numbers<[1], [0], [0], [1], [0, 0, 1, 1], [], []>} : vector<16x32xbf16>, vector<32x64xbf16>, vector<16x64xf32> -> vector<16x64xf32>
    %73 = vector.broadcast %23 : vector<1x64xf32> to vector<16x64xf32>
    %74 = arith.addf %73, %72 : vector<16x64xf32>
    %c3 = arith.constant 3 : index
    %c0_39 = arith.constant 0 : index
    %c0_40 = arith.constant 0 : index
    %75 = vector.load %arg3[%c3, %c0_39, %c0_40] : memref<12x64x32xbf16, #tpu.memory_space<vmem>>, vector<1x64x32xbf16>
    %76 = vector.shape_cast %75 : vector<1x64x32xbf16> to vector<64x32xbf16>
    %cst_41 = arith.constant dense<0.000000e+00> : vector<16x32xf32>
    %77 = tpu.matmul %22, %76, %cst_41 {dimension_numbers = #tpu.dot_dimension_numbers<[1], [0], [0], [1], [0, 0, 1, 1], [], []>} : vector<16x64xbf16>, vector<64x32xbf16>, vector<16x32xf32> -> vector<16x32xf32>
    %c3_42 = arith.constant 3 : index
    %c0_43 = arith.constant 0 : index
    %c0_44 = arith.constant 0 : index
    %78 = vector.load %arg4[%c3_42, %c0_43, %c0_44] : memref<12x1x32xf32, #tpu.memory_space<vmem>>, vector<1x1x32xf32>
    %79 = vector.shape_cast %78 : vector<1x1x32xf32> to vector<1x32xf32>
    %80 = vector.broadcast %79 : vector<1x32xf32> to vector<16x32xf32>
    %81 = arith.addf %77, %80 : vector<16x32xf32>
    %c4 = arith.constant 4 : index
    %c0_45 = arith.constant 0 : index
    %c0_46 = arith.constant 0 : index
    %82 = vector.load %arg3[%c4, %c0_45, %c0_46] : memref<12x64x32xbf16, #tpu.memory_space<vmem>>, vector<1x64x32xbf16>
    %83 = vector.shape_cast %82 : vector<1x64x32xbf16> to vector<64x32xbf16>
    %cst_47 = arith.constant dense<0.000000e+00> : vector<16x32xf32>
    %84 = tpu.matmul %22, %83, %cst_47 {dimension_numbers = #tpu.dot_dimension_numbers<[1], [0], [0], [1], [0, 0, 1, 1], [], []>} : vector<16x64xbf16>, vector<64x32xbf16>, vector<16x32xf32> -> vector<16x32xf32>
    %c4_48 = arith.constant 4 : index
    %c0_49 = arith.constant 0 : index
    %c0_50 = arith.constant 0 : index
    %85 = vector.load %arg4[%c4_48, %c0_49, %c0_50] : memref<12x1x32xf32, #tpu.memory_space<vmem>>, vector<1x1x32xf32>
    %86 = vector.shape_cast %85 : vector<1x1x32xf32> to vector<1x32xf32>
    %87 = vector.broadcast %86 : vector<1x32xf32> to vector<16x32xf32>
    %88 = arith.addf %84, %87 : vector<16x32xf32>
    %c5 = arith.constant 5 : index
    %c0_51 = arith.constant 0 : index
    %c0_52 = arith.constant 0 : index
    %89 = vector.load %arg3[%c5, %c0_51, %c0_52] : memref<12x64x32xbf16, #tpu.memory_space<vmem>>, vector<1x64x32xbf16>
    %90 = vector.shape_cast %89 : vector<1x64x32xbf16> to vector<64x32xbf16>
    %cst_53 = arith.constant dense<0.000000e+00> : vector<16x32xf32>
    %91 = tpu.matmul %22, %90, %cst_53 {dimension_numbers = #tpu.dot_dimension_numbers<[1], [0], [0], [1], [0, 0, 1, 1], [], []>} : vector<16x64xbf16>, vector<64x32xbf16>, vector<16x32xf32> -> vector<16x32xf32>
    %c5_54 = arith.constant 5 : index
    %c0_55 = arith.constant 0 : index
    %c0_56 = arith.constant 0 : index
    %92 = vector.load %arg4[%c5_54, %c0_55, %c0_56] : memref<12x1x32xf32, #tpu.memory_space<vmem>>, vector<1x1x32xf32>
    %93 = vector.shape_cast %92 : vector<1x1x32xf32> to vector<1x32xf32>
    %94 = vector.broadcast %93 : vector<1x32xf32> to vector<16x32xf32>
    %95 = arith.addf %91, %94 : vector<16x32xf32>
    %96 = vector.shape_cast %81 : vector<16x32xf32> to vector<2x8x32xf32>
    %97 = arith.truncf %96 : vector<2x8x32xf32> to vector<2x8x32xbf16>
    %98 = vector.shape_cast %88 : vector<16x32xf32> to vector<2x8x32xf32>
    %99 = arith.truncf %98 : vector<2x8x32xf32> to vector<2x8x32xbf16>
    %100 = vector.shape_cast %95 : vector<16x32xf32> to vector<2x8x32xf32>
    %101 = arith.truncf %100 : vector<2x8x32xf32> to vector<2x8x32xbf16>
    "tpu.trace_start"() <{level = 10 : i32, message = "bqd,bkd->bqk"}> : () -> ()
    %cst_57 = arith.constant dense<0.000000e+00> : vector<2x8x8xf32>
    %102 = tpu.matmul %97, %99, %cst_57 {dimension_numbers = #tpu.dot_dimension_numbers<[2], [2], [1], [1], [0, 0, 0, 1, 1, 1], [0], [0]>} : vector<2x8x32xbf16>, vector<2x8x32xbf16>, vector<2x8x8xf32> -> vector<2x8x8xf32>
    "tpu.trace_stop"() : () -> ()
    %cst_58 = arith.constant 0.176776692 : f32
    %103 = vector.broadcast %cst_58 : f32 to vector<2x8x8xf32>
    %104 = arith.mulf %102, %103 : vector<2x8x8xf32>
    %cst_59 = arith.constant -1.000000e+30 : f32
    %105 = vector.broadcast %cst_59 : f32 to vector<2x8x8xf32>
    %106 = arith.select %10, %104, %105 : vector<2x8x8xi1>, vector<2x8x8xf32>
    %cst_60 = arith.constant dense<0xFF800000> : vector<2x8xf32>
    %107 = vector.multi_reduction <maximumf>, %106, %cst_60 [2] : vector<2x8x8xf32> to vector<2x8xf32>
    %108 = vector.shape_cast %107 : vector<2x8xf32> to vector<2x8x1xf32>
    %109 = vector.broadcast %108 : vector<2x8x1xf32> to vector<2x8x8xf32>
    %110 = arith.subf %106, %109 : vector<2x8x8xf32>
    %111 = math.exp %110 : vector<2x8x8xf32>
    %cst_61 = arith.constant dense<0.000000e+00> : vector<2x8xf32>
    %112 = vector.multi_reduction <add>, %111, %cst_61 [2] : vector<2x8x8xf32> to vector<2x8xf32>
    %113 = vector.shape_cast %112 : vector<2x8xf32> to vector<2x8x1xf32>
    %114 = tpu.reciprocal %113 {approx = true} : vector<2x8x1xf32> -> vector<2x8x1xf32>
    %115 = vector.broadcast %114 : vector<2x8x1xf32> to vector<2x8x8xf32>
    %116 = arith.mulf %111, %115 : vector<2x8x8xf32>
    %117 = arith.truncf %116 : vector<2x8x8xf32> to vector<2x8x8xbf16>
    "tpu.trace_start"() <{level = 10 : i32, message = "bqk,bkd->bqd"}> : () -> ()
    %cst_62 = arith.constant dense<0.000000e+00> : vector<2x8x32xf32>
    %118 = tpu.matmul %117, %101, %cst_62 {dimension_numbers = #tpu.dot_dimension_numbers<[2], [1], [1], [2], [0, 0, 0, 1, 1, 2], [0], [0]>} : vector<2x8x8xbf16>, vector<2x8x32xbf16>, vector<2x8x32xf32> -> vector<2x8x32xf32>
    "tpu.trace_stop"() : () -> ()
    %119 = vector.shape_cast %118 : vector<2x8x32xf32> to vector<16x32xf32>
    %120 = arith.truncf %119 : vector<16x32xf32> to vector<16x32xbf16>
    %c1_63 = arith.constant 1 : index
    %c0_64 = arith.constant 0 : index
    %c0_65 = arith.constant 0 : index
    %121 = vector.load %arg5[%c1_63, %c0_64, %c0_65] : memref<4x32x64xbf16, #tpu.memory_space<vmem>>, vector<1x32x64xbf16>
    %122 = vector.shape_cast %121 : vector<1x32x64xbf16> to vector<32x64xbf16>
    %cst_66 = arith.constant dense<0.000000e+00> : vector<16x64xf32>
    %123 = tpu.matmul %120, %122, %cst_66 {dimension_numbers = #tpu.dot_dimension_numbers<[1], [0], [0], [1], [0, 0, 1, 1], [], []>} : vector<16x32xbf16>, vector<32x64xbf16>, vector<16x64xf32> -> vector<16x64xf32>
    %124 = arith.addf %74, %123 : vector<16x64xf32>
    %125 = arith.addf %19, %124 : vector<16x64xf32>
    %126 = vector.extract_strided_slice %21 {offsets = [0, 0], sizes = [1, 64], strides = [1, 1]} : vector<6x64xf32> to vector<1x64xf32>
    %127 = vector.extract_strided_slice %21 {offsets = [1, 0], sizes = [1, 64], strides = [1, 1]} : vector<6x64xf32> to vector<1x64xf32>
    %cst_67 = arith.constant dense<0.000000e+00> : vector<16xf32>
    %128 = vector.multi_reduction <add>, %125, %cst_67 [1] : vector<16x64xf32> to vector<16xf32>
    %129 = vector.shape_cast %128 : vector<16xf32> to vector<16x1xf32>
    %cst_68 = arith.constant 6.400000e+01 : f32
    %130 = vector.broadcast %cst_68 : f32 to vector<16x1xf32>
    %131 = arith.divf %129, %130 : vector<16x1xf32>
    %132 = vector.broadcast %131 : vector<16x1xf32> to vector<16x64xf32>
    %133 = arith.subf %125, %132 : vector<16x64xf32>
    %134 = arith.mulf %133, %133 : vector<16x64xf32>
    %cst_69 = arith.constant dense<0.000000e+00> : vector<16xf32>
    %135 = vector.multi_reduction <add>, %134, %cst_69 [1] : vector<16x64xf32> to vector<16xf32>
    %136 = vector.shape_cast %135 : vector<16xf32> to vector<16x1xf32>
    %cst_70 = arith.constant 6.400000e+01 : f32
    %137 = vector.broadcast %cst_70 : f32 to vector<16x1xf32>
    %138 = arith.divf %136, %137 : vector<16x1xf32>
    %139 = vector.broadcast %131 : vector<16x1xf32> to vector<16x64xf32>
    %140 = arith.subf %125, %139 : vector<16x64xf32>
    %cst_71 = arith.constant 9.99999974E-6 : f32
    %141 = vector.broadcast %cst_71 : f32 to vector<16x1xf32>
    %142 = arith.addf %138, %141 : vector<16x1xf32>
    %143 = math.rsqrt %142 : vector<16x1xf32>
    %144 = vector.broadcast %143 : vector<16x1xf32> to vector<16x64xf32>
    %145 = arith.mulf %140, %144 : vector<16x64xf32>
    %146 = vector.broadcast %126 : vector<1x64xf32> to vector<16x64xf32>
    %147 = arith.mulf %145, %146 : vector<16x64xf32>
    %148 = vector.broadcast %127 : vector<1x64xf32> to vector<16x64xf32>
    %149 = arith.addf %147, %148 : vector<16x64xf32>
    %150 = arith.truncf %149 : vector<16x64xf32> to vector<16x64xbf16>
    %151 = vector.extract_strided_slice %21 {offsets = [3, 0], sizes = [1, 64], strides = [1, 1]} : vector<6x64xf32> to vector<1x64xf32>
    %c0_72 = arith.constant 0 : index
    %c0_73 = arith.constant 0 : index
    %c0_74 = arith.constant 0 : index
    %152 = vector.load %arg7[%c0_72, %c0_73, %c0_74] : memref<8x64x512xbf16, #tpu.memory_space<vmem>>, vector<1x64x512xbf16>
    %153 = vector.shape_cast %152 : vector<1x64x512xbf16> to vector<64x512xbf16>
    %cst_75 = arith.constant dense<0.000000e+00> : vector<16x512xf32>
    %154 = tpu.matmul %150, %153, %cst_75 {dimension_numbers = #tpu.dot_dimension_numbers<[1], [0], [0], [1], [0, 0, 1, 1], [], []>} : vector<16x64xbf16>, vector<64x512xbf16>, vector<16x512xf32> -> vector<16x512xf32>
    %c0_76 = arith.constant 0 : index
    %c0_77 = arith.constant 0 : index
    %c0_78 = arith.constant 0 : index
    %155 = vector.load %arg8[%c0_76, %c0_77, %c0_78] : memref<8x1x512xf32, #tpu.memory_space<vmem>>, vector<1x1x512xf32>
    %156 = vector.shape_cast %155 : vector<1x1x512xf32> to vector<1x512xf32>
    %157 = vector.broadcast %156 : vector<1x512xf32> to vector<16x512xf32>
    %158 = arith.addf %154, %157 : vector<16x512xf32>
    %cst_79 = arith.constant 0.000000e+00 : f32
    %159 = vector.broadcast %cst_79 : f32 to vector<16x512xf32>
    %160 = arith.maximumf %158, %159 : vector<16x512xf32>
    %161 = arith.truncf %160 : vector<16x512xf32> to vector<16x512xbf16>
    %c0_80 = arith.constant 0 : index
    %c0_81 = arith.constant 0 : index
    %c0_82 = arith.constant 0 : index
    %162 = vector.load %arg9[%c0_80, %c0_81, %c0_82] : memref<8x512x64xbf16, #tpu.memory_space<vmem>>, vector<1x512x64xbf16>
    %163 = vector.shape_cast %162 : vector<1x512x64xbf16> to vector<512x64xbf16>
    %cst_83 = arith.constant dense<0.000000e+00> : vector<16x64xf32>
    %164 = tpu.matmul %161, %163, %cst_83 {dimension_numbers = #tpu.dot_dimension_numbers<[1], [0], [0], [1], [0, 0, 1, 1], [], []>} : vector<16x512xbf16>, vector<512x64xbf16>, vector<16x64xf32> -> vector<16x64xf32>
    %165 = vector.broadcast %151 : vector<1x64xf32> to vector<16x64xf32>
    %166 = arith.addf %165, %164 : vector<16x64xf32>
    %c1_84 = arith.constant 1 : index
    %c0_85 = arith.constant 0 : index
    %c0_86 = arith.constant 0 : index
    %167 = vector.load %arg7[%c1_84, %c0_85, %c0_86] : memref<8x64x512xbf16, #tpu.memory_space<vmem>>, vector<1x64x512xbf16>
    %168 = vector.shape_cast %167 : vector<1x64x512xbf16> to vector<64x512xbf16>
    %cst_87 = arith.constant dense<0.000000e+00> : vector<16x512xf32>
    %169 = tpu.matmul %150, %168, %cst_87 {dimension_numbers = #tpu.dot_dimension_numbers<[1], [0], [0], [1], [0, 0, 1, 1], [], []>} : vector<16x64xbf16>, vector<64x512xbf16>, vector<16x512xf32> -> vector<16x512xf32>
    %c1_88 = arith.constant 1 : index
    %c0_89 = arith.constant 0 : index
    %c0_90 = arith.constant 0 : index
    %170 = vector.load %arg8[%c1_88, %c0_89, %c0_90] : memref<8x1x512xf32, #tpu.memory_space<vmem>>, vector<1x1x512xf32>
    %171 = vector.shape_cast %170 : vector<1x1x512xf32> to vector<1x512xf32>
    %172 = vector.broadcast %171 : vector<1x512xf32> to vector<16x512xf32>
    %173 = arith.addf %169, %172 : vector<16x512xf32>
    %cst_91 = arith.constant 0.000000e+00 : f32
    %174 = vector.broadcast %cst_91 : f32 to vector<16x512xf32>
    %175 = arith.maximumf %173, %174 : vector<16x512xf32>
    %176 = arith.truncf %175 : vector<16x512xf32> to vector<16x512xbf16>
    %c1_92 = arith.constant 1 : index
    %c0_93 = arith.constant 0 : index
    %c0_94 = arith.constant 0 : index
    %177 = vector.load %arg9[%c1_92, %c0_93, %c0_94] : memref<8x512x64xbf16, #tpu.memory_space<vmem>>, vector<1x512x64xbf16>
    %178 = vector.shape_cast %177 : vector<1x512x64xbf16> to vector<512x64xbf16>
    %cst_95 = arith.constant dense<0.000000e+00> : vector<16x64xf32>
    %179 = tpu.matmul %176, %178, %cst_95 {dimension_numbers = #tpu.dot_dimension_numbers<[1], [0], [0], [1], [0, 0, 1, 1], [], []>} : vector<16x512xbf16>, vector<512x64xbf16>, vector<16x64xf32> -> vector<16x64xf32>
    %180 = arith.addf %166, %179 : vector<16x64xf32>
    %c2_96 = arith.constant 2 : index
    %c0_97 = arith.constant 0 : index
    %c0_98 = arith.constant 0 : index
    %181 = vector.load %arg7[%c2_96, %c0_97, %c0_98] : memref<8x64x512xbf16, #tpu.memory_space<vmem>>, vector<1x64x512xbf16>
    %182 = vector.shape_cast %181 : vector<1x64x512xbf16> to vector<64x512xbf16>
    %cst_99 = arith.constant dense<0.000000e+00> : vector<16x512xf32>
    %183 = tpu.matmul %150, %182, %cst_99 {dimension_numbers = #tpu.dot_dimension_numbers<[1], [0], [0], [1], [0, 0, 1, 1], [], []>} : vector<16x64xbf16>, vector<64x512xbf16>, vector<16x512xf32> -> vector<16x512xf32>
    %c2_100 = arith.constant 2 : index
    %c0_101 = arith.constant 0 : index
    %c0_102 = arith.constant 0 : index
    %184 = vector.load %arg8[%c2_100, %c0_101, %c0_102] : memref<8x1x512xf32, #tpu.memory_space<vmem>>, vector<1x1x512xf32>
    %185 = vector.shape_cast %184 : vector<1x1x512xf32> to vector<1x512xf32>
    %186 = vector.broadcast %185 : vector<1x512xf32> to vector<16x512xf32>
    %187 = arith.addf %183, %186 : vector<16x512xf32>
    %cst_103 = arith.constant 0.000000e+00 : f32
    %188 = vector.broadcast %cst_103 : f32 to vector<16x512xf32>
    %189 = arith.maximumf %187, %188 : vector<16x512xf32>
    %190 = arith.truncf %189 : vector<16x512xf32> to vector<16x512xbf16>
    %c2_104 = arith.constant 2 : index
    %c0_105 = arith.constant 0 : index
    %c0_106 = arith.constant 0 : index
    %191 = vector.load %arg9[%c2_104, %c0_105, %c0_106] : memref<8x512x64xbf16, #tpu.memory_space<vmem>>, vector<1x512x64xbf16>
    %192 = vector.shape_cast %191 : vector<1x512x64xbf16> to vector<512x64xbf16>
    %cst_107 = arith.constant dense<0.000000e+00> : vector<16x64xf32>
    %193 = tpu.matmul %190, %192, %cst_107 {dimension_numbers = #tpu.dot_dimension_numbers<[1], [0], [0], [1], [0, 0, 1, 1], [], []>} : vector<16x512xbf16>, vector<512x64xbf16>, vector<16x64xf32> -> vector<16x64xf32>
    %194 = arith.addf %180, %193 : vector<16x64xf32>
    %c3_108 = arith.constant 3 : index
    %c0_109 = arith.constant 0 : index
    %c0_110 = arith.constant 0 : index
    %195 = vector.load %arg7[%c3_108, %c0_109, %c0_110] : memref<8x64x512xbf16, #tpu.memory_space<vmem>>, vector<1x64x512xbf16>
    %196 = vector.shape_cast %195 : vector<1x64x512xbf16> to vector<64x512xbf16>
    %cst_111 = arith.constant dense<0.000000e+00> : vector<16x512xf32>
    %197 = tpu.matmul %150, %196, %cst_111 {dimension_numbers = #tpu.dot_dimension_numbers<[1], [0], [0], [1], [0, 0, 1, 1], [], []>} : vector<16x64xbf16>, vector<64x512xbf16>, vector<16x512xf32> -> vector<16x512xf32>
    %c3_112 = arith.constant 3 : index
    %c0_113 = arith.constant 0 : index
    %c0_114 = arith.constant 0 : index
    %198 = vector.load %arg8[%c3_112, %c0_113, %c0_114] : memref<8x1x512xf32, #tpu.memory_space<vmem>>, vector<1x1x512xf32>
    %199 = vector.shape_cast %198 : vector<1x1x512xf32> to vector<1x512xf32>
    %200 = vector.broadcast %199 : vector<1x512xf32> to vector<16x512xf32>
    %201 = arith.addf %197, %200 : vector<16x512xf32>
    %cst_115 = arith.constant 0.000000e+00 : f32
    %202 = vector.broadcast %cst_115 : f32 to vector<16x512xf32>
    %203 = arith.maximumf %201, %202 : vector<16x512xf32>
    %204 = arith.truncf %203 : vector<16x512xf32> to vector<16x512xbf16>
    %c3_116 = arith.constant 3 : index
    %c0_117 = arith.constant 0 : index
    %c0_118 = arith.constant 0 : index
    %205 = vector.load %arg9[%c3_116, %c0_117, %c0_118] : memref<8x512x64xbf16, #tpu.memory_space<vmem>>, vector<1x512x64xbf16>
    %206 = vector.shape_cast %205 : vector<1x512x64xbf16> to vector<512x64xbf16>
    %cst_119 = arith.constant dense<0.000000e+00> : vector<16x64xf32>
    %207 = tpu.matmul %204, %206, %cst_119 {dimension_numbers = #tpu.dot_dimension_numbers<[1], [0], [0], [1], [0, 0, 1, 1], [], []>} : vector<16x512xbf16>, vector<512x64xbf16>, vector<16x64xf32> -> vector<16x64xf32>
    %208 = arith.addf %194, %207 : vector<16x64xf32>
    %209 = arith.addf %149, %208 : vector<16x64xf32>
    %210 = vector.extract_strided_slice %21 {offsets = [4, 0], sizes = [1, 64], strides = [1, 1]} : vector<6x64xf32> to vector<1x64xf32>
    %211 = vector.extract_strided_slice %21 {offsets = [5, 0], sizes = [1, 64], strides = [1, 1]} : vector<6x64xf32> to vector<1x64xf32>
    %cst_120 = arith.constant dense<0.000000e+00> : vector<16xf32>
    %212 = vector.multi_reduction <add>, %209, %cst_120 [1] : vector<16x64xf32> to vector<16xf32>
    %213 = vector.shape_cast %212 : vector<16xf32> to vector<16x1xf32>
    %cst_121 = arith.constant 6.400000e+01 : f32
    %214 = vector.broadcast %cst_121 : f32 to vector<16x1xf32>
    %215 = arith.divf %213, %214 : vector<16x1xf32>
    %216 = vector.broadcast %215 : vector<16x1xf32> to vector<16x64xf32>
    %217 = arith.subf %209, %216 : vector<16x64xf32>
    %218 = arith.mulf %217, %217 : vector<16x64xf32>
    %cst_122 = arith.constant dense<0.000000e+00> : vector<16xf32>
    %219 = vector.multi_reduction <add>, %218, %cst_122 [1] : vector<16x64xf32> to vector<16xf32>
    %220 = vector.shape_cast %219 : vector<16xf32> to vector<16x1xf32>
    %cst_123 = arith.constant 6.400000e+01 : f32
    %221 = vector.broadcast %cst_123 : f32 to vector<16x1xf32>
    %222 = arith.divf %220, %221 : vector<16x1xf32>
    %223 = vector.broadcast %215 : vector<16x1xf32> to vector<16x64xf32>
    %224 = arith.subf %209, %223 : vector<16x64xf32>
    %cst_124 = arith.constant 9.99999974E-6 : f32
    %225 = vector.broadcast %cst_124 : f32 to vector<16x1xf32>
    %226 = arith.addf %222, %225 : vector<16x1xf32>
    %227 = math.rsqrt %226 : vector<16x1xf32>
    %228 = vector.broadcast %227 : vector<16x1xf32> to vector<16x64xf32>
    %229 = arith.mulf %224, %228 : vector<16x64xf32>
    %230 = vector.broadcast %210 : vector<1x64xf32> to vector<16x64xf32>
    %231 = arith.mulf %229, %230 : vector<16x64xf32>
    %232 = vector.broadcast %211 : vector<1x64xf32> to vector<16x64xf32>
    %233 = arith.addf %231, %232 : vector<16x64xf32>
    %c1_125 = arith.constant 1 : index
    %c0_126 = arith.constant 0 : index
    %c0_127 = arith.constant 0 : index
    %234 = vector.load %arg6[%c1_125, %c0_126, %c0_127] : memref<2x6x64xf32, #tpu.memory_space<vmem>>, vector<1x6x64xf32>
    %235 = vector.shape_cast %234 : vector<1x6x64xf32> to vector<6x64xf32>
    %236 = arith.truncf %233 : vector<16x64xf32> to vector<16x64xbf16>
    %237 = vector.extract_strided_slice %235 {offsets = [2, 0], sizes = [1, 64], strides = [1, 1]} : vector<6x64xf32> to vector<1x64xf32>
    %c6 = arith.constant 6 : index
    %c0_128 = arith.constant 0 : index
    %c0_129 = arith.constant 0 : index
    %238 = vector.load %arg3[%c6, %c0_128, %c0_129] : memref<12x64x32xbf16, #tpu.memory_space<vmem>>, vector<1x64x32xbf16>
    %239 = vector.shape_cast %238 : vector<1x64x32xbf16> to vector<64x32xbf16>
    %cst_130 = arith.constant dense<0.000000e+00> : vector<16x32xf32>
    %240 = tpu.matmul %236, %239, %cst_130 {dimension_numbers = #tpu.dot_dimension_numbers<[1], [0], [0], [1], [0, 0, 1, 1], [], []>} : vector<16x64xbf16>, vector<64x32xbf16>, vector<16x32xf32> -> vector<16x32xf32>
    %c6_131 = arith.constant 6 : index
    %c0_132 = arith.constant 0 : index
    %c0_133 = arith.constant 0 : index
    %241 = vector.load %arg4[%c6_131, %c0_132, %c0_133] : memref<12x1x32xf32, #tpu.memory_space<vmem>>, vector<1x1x32xf32>
    %242 = vector.shape_cast %241 : vector<1x1x32xf32> to vector<1x32xf32>
    %243 = vector.broadcast %242 : vector<1x32xf32> to vector<16x32xf32>
    %244 = arith.addf %240, %243 : vector<16x32xf32>
    %c7 = arith.constant 7 : index
    %c0_134 = arith.constant 0 : index
    %c0_135 = arith.constant 0 : index
    %245 = vector.load %arg3[%c7, %c0_134, %c0_135] : memref<12x64x32xbf16, #tpu.memory_space<vmem>>, vector<1x64x32xbf16>
    %246 = vector.shape_cast %245 : vector<1x64x32xbf16> to vector<64x32xbf16>
    %cst_136 = arith.constant dense<0.000000e+00> : vector<16x32xf32>
    %247 = tpu.matmul %236, %246, %cst_136 {dimension_numbers = #tpu.dot_dimension_numbers<[1], [0], [0], [1], [0, 0, 1, 1], [], []>} : vector<16x64xbf16>, vector<64x32xbf16>, vector<16x32xf32> -> vector<16x32xf32>
    %c7_137 = arith.constant 7 : index
    %c0_138 = arith.constant 0 : index
    %c0_139 = arith.constant 0 : index
    %248 = vector.load %arg4[%c7_137, %c0_138, %c0_139] : memref<12x1x32xf32, #tpu.memory_space<vmem>>, vector<1x1x32xf32>
    %249 = vector.shape_cast %248 : vector<1x1x32xf32> to vector<1x32xf32>
    %250 = vector.broadcast %249 : vector<1x32xf32> to vector<16x32xf32>
    %251 = arith.addf %247, %250 : vector<16x32xf32>
    %c8 = arith.constant 8 : index
    %c0_140 = arith.constant 0 : index
    %c0_141 = arith.constant 0 : index
    %252 = vector.load %arg3[%c8, %c0_140, %c0_141] : memref<12x64x32xbf16, #tpu.memory_space<vmem>>, vector<1x64x32xbf16>
    %253 = vector.shape_cast %252 : vector<1x64x32xbf16> to vector<64x32xbf16>
    %cst_142 = arith.constant dense<0.000000e+00> : vector<16x32xf32>
    %254 = tpu.matmul %236, %253, %cst_142 {dimension_numbers = #tpu.dot_dimension_numbers<[1], [0], [0], [1], [0, 0, 1, 1], [], []>} : vector<16x64xbf16>, vector<64x32xbf16>, vector<16x32xf32> -> vector<16x32xf32>
    %c8_143 = arith.constant 8 : index
    %c0_144 = arith.constant 0 : index
    %c0_145 = arith.constant 0 : index
    %255 = vector.load %arg4[%c8_143, %c0_144, %c0_145] : memref<12x1x32xf32, #tpu.memory_space<vmem>>, vector<1x1x32xf32>
    %256 = vector.shape_cast %255 : vector<1x1x32xf32> to vector<1x32xf32>
    %257 = vector.broadcast %256 : vector<1x32xf32> to vector<16x32xf32>
    %258 = arith.addf %254, %257 : vector<16x32xf32>
    %259 = vector.shape_cast %244 : vector<16x32xf32> to vector<2x8x32xf32>
    %260 = arith.truncf %259 : vector<2x8x32xf32> to vector<2x8x32xbf16>
    %261 = vector.shape_cast %251 : vector<16x32xf32> to vector<2x8x32xf32>
    %262 = arith.truncf %261 : vector<2x8x32xf32> to vector<2x8x32xbf16>
    %263 = vector.shape_cast %258 : vector<16x32xf32> to vector<2x8x32xf32>
    %264 = arith.truncf %263 : vector<2x8x32xf32> to vector<2x8x32xbf16>
    "tpu.trace_start"() <{level = 10 : i32, message = "bqd,bkd->bqk"}> : () -> ()
    %cst_146 = arith.constant dense<0.000000e+00> : vector<2x8x8xf32>
    %265 = tpu.matmul %260, %262, %cst_146 {dimension_numbers = #tpu.dot_dimension_numbers<[2], [2], [1], [1], [0, 0, 0, 1, 1, 1], [0], [0]>} : vector<2x8x32xbf16>, vector<2x8x32xbf16>, vector<2x8x8xf32> -> vector<2x8x8xf32>
    "tpu.trace_stop"() : () -> ()
    %cst_147 = arith.constant 0.176776692 : f32
    %266 = vector.broadcast %cst_147 : f32 to vector<2x8x8xf32>
    %267 = arith.mulf %265, %266 : vector<2x8x8xf32>
    %cst_148 = arith.constant -1.000000e+30 : f32
    %268 = vector.broadcast %cst_148 : f32 to vector<2x8x8xf32>
    %269 = arith.select %10, %267, %268 : vector<2x8x8xi1>, vector<2x8x8xf32>
    %cst_149 = arith.constant dense<0xFF800000> : vector<2x8xf32>
    %270 = vector.multi_reduction <maximumf>, %269, %cst_149 [2] : vector<2x8x8xf32> to vector<2x8xf32>
    %271 = vector.shape_cast %270 : vector<2x8xf32> to vector<2x8x1xf32>
    %272 = vector.broadcast %271 : vector<2x8x1xf32> to vector<2x8x8xf32>
    %273 = arith.subf %269, %272 : vector<2x8x8xf32>
    %274 = math.exp %273 : vector<2x8x8xf32>
    %cst_150 = arith.constant dense<0.000000e+00> : vector<2x8xf32>
    %275 = vector.multi_reduction <add>, %274, %cst_150 [2] : vector<2x8x8xf32> to vector<2x8xf32>
    %276 = vector.shape_cast %275 : vector<2x8xf32> to vector<2x8x1xf32>
    %277 = tpu.reciprocal %276 {approx = true} : vector<2x8x1xf32> -> vector<2x8x1xf32>
    %278 = vector.broadcast %277 : vector<2x8x1xf32> to vector<2x8x8xf32>
    %279 = arith.mulf %274, %278 : vector<2x8x8xf32>
    %280 = arith.truncf %279 : vector<2x8x8xf32> to vector<2x8x8xbf16>
    "tpu.trace_start"() <{level = 10 : i32, message = "bqk,bkd->bqd"}> : () -> ()
    %cst_151 = arith.constant dense<0.000000e+00> : vector<2x8x32xf32>
    %281 = tpu.matmul %280, %264, %cst_151 {dimension_numbers = #tpu.dot_dimension_numbers<[2], [1], [1], [2], [0, 0, 0, 1, 1, 2], [0], [0]>} : vector<2x8x8xbf16>, vector<2x8x32xbf16>, vector<2x8x32xf32> -> vector<2x8x32xf32>
    "tpu.trace_stop"() : () -> ()
    %282 = vector.shape_cast %281 : vector<2x8x32xf32> to vector<16x32xf32>
    %283 = arith.truncf %282 : vector<16x32xf32> to vector<16x32xbf16>
    %c2_152 = arith.constant 2 : index
    %c0_153 = arith.constant 0 : index
    %c0_154 = arith.constant 0 : index
    %284 = vector.load %arg5[%c2_152, %c0_153, %c0_154] : memref<4x32x64xbf16, #tpu.memory_space<vmem>>, vector<1x32x64xbf16>
    %285 = vector.shape_cast %284 : vector<1x32x64xbf16> to vector<32x64xbf16>
    %cst_155 = arith.constant dense<0.000000e+00> : vector<16x64xf32>
    %286 = tpu.matmul %283, %285, %cst_155 {dimension_numbers = #tpu.dot_dimension_numbers<[1], [0], [0], [1], [0, 0, 1, 1], [], []>} : vector<16x32xbf16>, vector<32x64xbf16>, vector<16x64xf32> -> vector<16x64xf32>
    %287 = vector.broadcast %237 : vector<1x64xf32> to vector<16x64xf32>
    %288 = arith.addf %287, %286 : vector<16x64xf32>
    %c9 = arith.constant 9 : index
    %c0_156 = arith.constant 0 : index
    %c0_157 = arith.constant 0 : index
    %289 = vector.load %arg3[%c9, %c0_156, %c0_157] : memref<12x64x32xbf16, #tpu.memory_space<vmem>>, vector<1x64x32xbf16>
    %290 = vector.shape_cast %289 : vector<1x64x32xbf16> to vector<64x32xbf16>
    %cst_158 = arith.constant dense<0.000000e+00> : vector<16x32xf32>
    %291 = tpu.matmul %236, %290, %cst_158 {dimension_numbers = #tpu.dot_dimension_numbers<[1], [0], [0], [1], [0, 0, 1, 1], [], []>} : vector<16x64xbf16>, vector<64x32xbf16>, vector<16x32xf32> -> vector<16x32xf32>
    %c9_159 = arith.constant 9 : index
    %c0_160 = arith.constant 0 : index
    %c0_161 = arith.constant 0 : index
    %292 = vector.load %arg4[%c9_159, %c0_160, %c0_161] : memref<12x1x32xf32, #tpu.memory_space<vmem>>, vector<1x1x32xf32>
    %293 = vector.shape_cast %292 : vector<1x1x32xf32> to vector<1x32xf32>
    %294 = vector.broadcast %293 : vector<1x32xf32> to vector<16x32xf32>
    %295 = arith.addf %291, %294 : vector<16x32xf32>
    %c10 = arith.constant 10 : index
    %c0_162 = arith.constant 0 : index
    %c0_163 = arith.constant 0 : index
    %296 = vector.load %arg3[%c10, %c0_162, %c0_163] : memref<12x64x32xbf16, #tpu.memory_space<vmem>>, vector<1x64x32xbf16>
    %297 = vector.shape_cast %296 : vector<1x64x32xbf16> to vector<64x32xbf16>
    %cst_164 = arith.constant dense<0.000000e+00> : vector<16x32xf32>
    %298 = tpu.matmul %236, %297, %cst_164 {dimension_numbers = #tpu.dot_dimension_numbers<[1], [0], [0], [1], [0, 0, 1, 1], [], []>} : vector<16x64xbf16>, vector<64x32xbf16>, vector<16x32xf32> -> vector<16x32xf32>
    %c10_165 = arith.constant 10 : index
    %c0_166 = arith.constant 0 : index
    %c0_167 = arith.constant 0 : index
    %299 = vector.load %arg4[%c10_165, %c0_166, %c0_167] : memref<12x1x32xf32, #tpu.memory_space<vmem>>, vector<1x1x32xf32>
    %300 = vector.shape_cast %299 : vector<1x1x32xf32> to vector<1x32xf32>
    %301 = vector.broadcast %300 : vector<1x32xf32> to vector<16x32xf32>
    %302 = arith.addf %298, %301 : vector<16x32xf32>
    %c11 = arith.constant 11 : index
    %c0_168 = arith.constant 0 : index
    %c0_169 = arith.constant 0 : index
    %303 = vector.load %arg3[%c11, %c0_168, %c0_169] : memref<12x64x32xbf16, #tpu.memory_space<vmem>>, vector<1x64x32xbf16>
    %304 = vector.shape_cast %303 : vector<1x64x32xbf16> to vector<64x32xbf16>
    %cst_170 = arith.constant dense<0.000000e+00> : vector<16x32xf32>
    %305 = tpu.matmul %236, %304, %cst_170 {dimension_numbers = #tpu.dot_dimension_numbers<[1], [0], [0], [1], [0, 0, 1, 1], [], []>} : vector<16x64xbf16>, vector<64x32xbf16>, vector<16x32xf32> -> vector<16x32xf32>
    %c11_171 = arith.constant 11 : index
    %c0_172 = arith.constant 0 : index
    %c0_173 = arith.constant 0 : index
    %306 = vector.load %arg4[%c11_171, %c0_172, %c0_173] : memref<12x1x32xf32, #tpu.memory_space<vmem>>, vector<1x1x32xf32>
    %307 = vector.shape_cast %306 : vector<1x1x32xf32> to vector<1x32xf32>
    %308 = vector.broadcast %307 : vector<1x32xf32> to vector<16x32xf32>
    %309 = arith.addf %305, %308 : vector<16x32xf32>
    %310 = vector.shape_cast %295 : vector<16x32xf32> to vector<2x8x32xf32>
    %311 = arith.truncf %310 : vector<2x8x32xf32> to vector<2x8x32xbf16>
    %312 = vector.shape_cast %302 : vector<16x32xf32> to vector<2x8x32xf32>
    %313 = arith.truncf %312 : vector<2x8x32xf32> to vector<2x8x32xbf16>
    %314 = vector.shape_cast %309 : vector<16x32xf32> to vector<2x8x32xf32>
    %315 = arith.truncf %314 : vector<2x8x32xf32> to vector<2x8x32xbf16>
    "tpu.trace_start"() <{level = 10 : i32, message = "bqd,bkd->bqk"}> : () -> ()
    %cst_174 = arith.constant dense<0.000000e+00> : vector<2x8x8xf32>
    %316 = tpu.matmul %311, %313, %cst_174 {dimension_numbers = #tpu.dot_dimension_numbers<[2], [2], [1], [1], [0, 0, 0, 1, 1, 1], [0], [0]>} : vector<2x8x32xbf16>, vector<2x8x32xbf16>, vector<2x8x8xf32> -> vector<2x8x8xf32>
    "tpu.trace_stop"() : () -> ()
    %cst_175 = arith.constant 0.176776692 : f32
    %317 = vector.broadcast %cst_175 : f32 to vector<2x8x8xf32>
    %318 = arith.mulf %316, %317 : vector<2x8x8xf32>
    %cst_176 = arith.constant -1.000000e+30 : f32
    %319 = vector.broadcast %cst_176 : f32 to vector<2x8x8xf32>
    %320 = arith.select %10, %318, %319 : vector<2x8x8xi1>, vector<2x8x8xf32>
    %cst_177 = arith.constant dense<0xFF800000> : vector<2x8xf32>
    %321 = vector.multi_reduction <maximumf>, %320, %cst_177 [2] : vector<2x8x8xf32> to vector<2x8xf32>
    %322 = vector.shape_cast %321 : vector<2x8xf32> to vector<2x8x1xf32>
    %323 = vector.broadcast %322 : vector<2x8x1xf32> to vector<2x8x8xf32>
    %324 = arith.subf %320, %323 : vector<2x8x8xf32>
    %325 = math.exp %324 : vector<2x8x8xf32>
    %cst_178 = arith.constant dense<0.000000e+00> : vector<2x8xf32>
    %326 = vector.multi_reduction <add>, %325, %cst_178 [2] : vector<2x8x8xf32> to vector<2x8xf32>
    %327 = vector.shape_cast %326 : vector<2x8xf32> to vector<2x8x1xf32>
    %328 = tpu.reciprocal %327 {approx = true} : vector<2x8x1xf32> -> vector<2x8x1xf32>
    %329 = vector.broadcast %328 : vector<2x8x1xf32> to vector<2x8x8xf32>
    %330 = arith.mulf %325, %329 : vector<2x8x8xf32>
    %331 = arith.truncf %330 : vector<2x8x8xf32> to vector<2x8x8xbf16>
    "tpu.trace_start"() <{level = 10 : i32, message = "bqk,bkd->bqd"}> : () -> ()
    %cst_179 = arith.constant dense<0.000000e+00> : vector<2x8x32xf32>
    %332 = tpu.matmul %331, %315, %cst_179 {dimension_numbers = #tpu.dot_dimension_numbers<[2], [1], [1], [2], [0, 0, 0, 1, 1, 2], [0], [0]>} : vector<2x8x8xbf16>, vector<2x8x32xbf16>, vector<2x8x32xf32> -> vector<2x8x32xf32>
    "tpu.trace_stop"() : () -> ()
    %333 = vector.shape_cast %332 : vector<2x8x32xf32> to vector<16x32xf32>
    %334 = arith.truncf %333 : vector<16x32xf32> to vector<16x32xbf16>
    %c3_180 = arith.constant 3 : index
    %c0_181 = arith.constant 0 : index
    %c0_182 = arith.constant 0 : index
    %335 = vector.load %arg5[%c3_180, %c0_181, %c0_182] : memref<4x32x64xbf16, #tpu.memory_space<vmem>>, vector<1x32x64xbf16>
    %336 = vector.shape_cast %335 : vector<1x32x64xbf16> to vector<32x64xbf16>
    %cst_183 = arith.constant dense<0.000000e+00> : vector<16x64xf32>
    %337 = tpu.matmul %334, %336, %cst_183 {dimension_numbers = #tpu.dot_dimension_numbers<[1], [0], [0], [1], [0, 0, 1, 1], [], []>} : vector<16x32xbf16>, vector<32x64xbf16>, vector<16x64xf32> -> vector<16x64xf32>
    %338 = arith.addf %288, %337 : vector<16x64xf32>
    %339 = arith.addf %233, %338 : vector<16x64xf32>
    %340 = vector.extract_strided_slice %235 {offsets = [0, 0], sizes = [1, 64], strides = [1, 1]} : vector<6x64xf32> to vector<1x64xf32>
    %341 = vector.extract_strided_slice %235 {offsets = [1, 0], sizes = [1, 64], strides = [1, 1]} : vector<6x64xf32> to vector<1x64xf32>
    %cst_184 = arith.constant dense<0.000000e+00> : vector<16xf32>
    %342 = vector.multi_reduction <add>, %339, %cst_184 [1] : vector<16x64xf32> to vector<16xf32>
    %343 = vector.shape_cast %342 : vector<16xf32> to vector<16x1xf32>
    %cst_185 = arith.constant 6.400000e+01 : f32
    %344 = vector.broadcast %cst_185 : f32 to vector<16x1xf32>
    %345 = arith.divf %343, %344 : vector<16x1xf32>
    %346 = vector.broadcast %345 : vector<16x1xf32> to vector<16x64xf32>
    %347 = arith.subf %339, %346 : vector<16x64xf32>
    %348 = arith.mulf %347, %347 : vector<16x64xf32>
    %cst_186 = arith.constant dense<0.000000e+00> : vector<16xf32>
    %349 = vector.multi_reduction <add>, %348, %cst_186 [1] : vector<16x64xf32> to vector<16xf32>
    %350 = vector.shape_cast %349 : vector<16xf32> to vector<16x1xf32>
    %cst_187 = arith.constant 6.400000e+01 : f32
    %351 = vector.broadcast %cst_187 : f32 to vector<16x1xf32>
    %352 = arith.divf %350, %351 : vector<16x1xf32>
    %353 = vector.broadcast %345 : vector<16x1xf32> to vector<16x64xf32>
    %354 = arith.subf %339, %353 : vector<16x64xf32>
    %cst_188 = arith.constant 9.99999974E-6 : f32
    %355 = vector.broadcast %cst_188 : f32 to vector<16x1xf32>
    %356 = arith.addf %352, %355 : vector<16x1xf32>
    %357 = math.rsqrt %356 : vector<16x1xf32>
    %358 = vector.broadcast %357 : vector<16x1xf32> to vector<16x64xf32>
    %359 = arith.mulf %354, %358 : vector<16x64xf32>
    %360 = vector.broadcast %340 : vector<1x64xf32> to vector<16x64xf32>
    %361 = arith.mulf %359, %360 : vector<16x64xf32>
    %362 = vector.broadcast %341 : vector<1x64xf32> to vector<16x64xf32>
    %363 = arith.addf %361, %362 : vector<16x64xf32>
    %364 = arith.truncf %363 : vector<16x64xf32> to vector<16x64xbf16>
    %365 = vector.extract_strided_slice %235 {offsets = [3, 0], sizes = [1, 64], strides = [1, 1]} : vector<6x64xf32> to vector<1x64xf32>
    %c4_189 = arith.constant 4 : index
    %c0_190 = arith.constant 0 : index
    %c0_191 = arith.constant 0 : index
    %366 = vector.load %arg7[%c4_189, %c0_190, %c0_191] : memref<8x64x512xbf16, #tpu.memory_space<vmem>>, vector<1x64x512xbf16>
    %367 = vector.shape_cast %366 : vector<1x64x512xbf16> to vector<64x512xbf16>
    %cst_192 = arith.constant dense<0.000000e+00> : vector<16x512xf32>
    %368 = tpu.matmul %364, %367, %cst_192 {dimension_numbers = #tpu.dot_dimension_numbers<[1], [0], [0], [1], [0, 0, 1, 1], [], []>} : vector<16x64xbf16>, vector<64x512xbf16>, vector<16x512xf32> -> vector<16x512xf32>
    %c4_193 = arith.constant 4 : index
    %c0_194 = arith.constant 0 : index
    %c0_195 = arith.constant 0 : index
    %369 = vector.load %arg8[%c4_193, %c0_194, %c0_195] : memref<8x1x512xf32, #tpu.memory_space<vmem>>, vector<1x1x512xf32>
    %370 = vector.shape_cast %369 : vector<1x1x512xf32> to vector<1x512xf32>
    %371 = vector.broadcast %370 : vector<1x512xf32> to vector<16x512xf32>
    %372 = arith.addf %368, %371 : vector<16x512xf32>
    %cst_196 = arith.constant 0.000000e+00 : f32
    %373 = vector.broadcast %cst_196 : f32 to vector<16x512xf32>
    %374 = arith.maximumf %372, %373 : vector<16x512xf32>
    %375 = arith.truncf %374 : vector<16x512xf32> to vector<16x512xbf16>
    %c4_197 = arith.constant 4 : index
    %c0_198 = arith.constant 0 : index
    %c0_199 = arith.constant 0 : index
    %376 = vector.load %arg9[%c4_197, %c0_198, %c0_199] : memref<8x512x64xbf16, #tpu.memory_space<vmem>>, vector<1x512x64xbf16>
    %377 = vector.shape_cast %376 : vector<1x512x64xbf16> to vector<512x64xbf16>
    %cst_200 = arith.constant dense<0.000000e+00> : vector<16x64xf32>
    %378 = tpu.matmul %375, %377, %cst_200 {dimension_numbers = #tpu.dot_dimension_numbers<[1], [0], [0], [1], [0, 0, 1, 1], [], []>} : vector<16x512xbf16>, vector<512x64xbf16>, vector<16x64xf32> -> vector<16x64xf32>
    %379 = vector.broadcast %365 : vector<1x64xf32> to vector<16x64xf32>
    %380 = arith.addf %379, %378 : vector<16x64xf32>
    %c5_201 = arith.constant 5 : index
    %c0_202 = arith.constant 0 : index
    %c0_203 = arith.constant 0 : index
    %381 = vector.load %arg7[%c5_201, %c0_202, %c0_203] : memref<8x64x512xbf16, #tpu.memory_space<vmem>>, vector<1x64x512xbf16>
    %382 = vector.shape_cast %381 : vector<1x64x512xbf16> to vector<64x512xbf16>
    %cst_204 = arith.constant dense<0.000000e+00> : vector<16x512xf32>
    %383 = tpu.matmul %364, %382, %cst_204 {dimension_numbers = #tpu.dot_dimension_numbers<[1], [0], [0], [1], [0, 0, 1, 1], [], []>} : vector<16x64xbf16>, vector<64x512xbf16>, vector<16x512xf32> -> vector<16x512xf32>
    %c5_205 = arith.constant 5 : index
    %c0_206 = arith.constant 0 : index
    %c0_207 = arith.constant 0 : index
    %384 = vector.load %arg8[%c5_205, %c0_206, %c0_207] : memref<8x1x512xf32, #tpu.memory_space<vmem>>, vector<1x1x512xf32>
    %385 = vector.shape_cast %384 : vector<1x1x512xf32> to vector<1x512xf32>
    %386 = vector.broadcast %385 : vector<1x512xf32> to vector<16x512xf32>
    %387 = arith.addf %383, %386 : vector<16x512xf32>
    %cst_208 = arith.constant 0.000000e+00 : f32
    %388 = vector.broadcast %cst_208 : f32 to vector<16x512xf32>
    %389 = arith.maximumf %387, %388 : vector<16x512xf32>
    %390 = arith.truncf %389 : vector<16x512xf32> to vector<16x512xbf16>
    %c5_209 = arith.constant 5 : index
    %c0_210 = arith.constant 0 : index
    %c0_211 = arith.constant 0 : index
    %391 = vector.load %arg9[%c5_209, %c0_210, %c0_211] : memref<8x512x64xbf16, #tpu.memory_space<vmem>>, vector<1x512x64xbf16>
    %392 = vector.shape_cast %391 : vector<1x512x64xbf16> to vector<512x64xbf16>
    %cst_212 = arith.constant dense<0.000000e+00> : vector<16x64xf32>
    %393 = tpu.matmul %390, %392, %cst_212 {dimension_numbers = #tpu.dot_dimension_numbers<[1], [0], [0], [1], [0, 0, 1, 1], [], []>} : vector<16x512xbf16>, vector<512x64xbf16>, vector<16x64xf32> -> vector<16x64xf32>
    %394 = arith.addf %380, %393 : vector<16x64xf32>
    %c6_213 = arith.constant 6 : index
    %c0_214 = arith.constant 0 : index
    %c0_215 = arith.constant 0 : index
    %395 = vector.load %arg7[%c6_213, %c0_214, %c0_215] : memref<8x64x512xbf16, #tpu.memory_space<vmem>>, vector<1x64x512xbf16>
    %396 = vector.shape_cast %395 : vector<1x64x512xbf16> to vector<64x512xbf16>
    %cst_216 = arith.constant dense<0.000000e+00> : vector<16x512xf32>
    %397 = tpu.matmul %364, %396, %cst_216 {dimension_numbers = #tpu.dot_dimension_numbers<[1], [0], [0], [1], [0, 0, 1, 1], [], []>} : vector<16x64xbf16>, vector<64x512xbf16>, vector<16x512xf32> -> vector<16x512xf32>
    %c6_217 = arith.constant 6 : index
    %c0_218 = arith.constant 0 : index
    %c0_219 = arith.constant 0 : index
    %398 = vector.load %arg8[%c6_217, %c0_218, %c0_219] : memref<8x1x512xf32, #tpu.memory_space<vmem>>, vector<1x1x512xf32>
    %399 = vector.shape_cast %398 : vector<1x1x512xf32> to vector<1x512xf32>
    %400 = vector.broadcast %399 : vector<1x512xf32> to vector<16x512xf32>
    %401 = arith.addf %397, %400 : vector<16x512xf32>
    %cst_220 = arith.constant 0.000000e+00 : f32
    %402 = vector.broadcast %cst_220 : f32 to vector<16x512xf32>
    %403 = arith.maximumf %401, %402 : vector<16x512xf32>
    %404 = arith.truncf %403 : vector<16x512xf32> to vector<16x512xbf16>
    %c6_221 = arith.constant 6 : index
    %c0_222 = arith.constant 0 : index
    %c0_223 = arith.constant 0 : index
    %405 = vector.load %arg9[%c6_221, %c0_222, %c0_223] : memref<8x512x64xbf16, #tpu.memory_space<vmem>>, vector<1x512x64xbf16>
    %406 = vector.shape_cast %405 : vector<1x512x64xbf16> to vector<512x64xbf16>
    %cst_224 = arith.constant dense<0.000000e+00> : vector<16x64xf32>
    %407 = tpu.matmul %404, %406, %cst_224 {dimension_numbers = #tpu.dot_dimension_numbers<[1], [0], [0], [1], [0, 0, 1, 1], [], []>} : vector<16x512xbf16>, vector<512x64xbf16>, vector<16x64xf32> -> vector<16x64xf32>
    %408 = arith.addf %394, %407 : vector<16x64xf32>
    %c7_225 = arith.constant 7 : index
    %c0_226 = arith.constant 0 : index
    %c0_227 = arith.constant 0 : index
    %409 = vector.load %arg7[%c7_225, %c0_226, %c0_227] : memref<8x64x512xbf16, #tpu.memory_space<vmem>>, vector<1x64x512xbf16>
    %410 = vector.shape_cast %409 : vector<1x64x512xbf16> to vector<64x512xbf16>
    %cst_228 = arith.constant dense<0.000000e+00> : vector<16x512xf32>
    %411 = tpu.matmul %364, %410, %cst_228 {dimension_numbers = #tpu.dot_dimension_numbers<[1], [0], [0], [1], [0, 0, 1, 1], [], []>} : vector<16x64xbf16>, vector<64x512xbf16>, vector<16x512xf32> -> vector<16x512xf32>
    %c7_229 = arith.constant 7 : index
    %c0_230 = arith.constant 0 : index
    %c0_231 = arith.constant 0 : index
    %412 = vector.load %arg8[%c7_229, %c0_230, %c0_231] : memref<8x1x512xf32, #tpu.memory_space<vmem>>, vector<1x1x512xf32>
    %413 = vector.shape_cast %412 : vector<1x1x512xf32> to vector<1x512xf32>
    %414 = vector.broadcast %413 : vector<1x512xf32> to vector<16x512xf32>
    %415 = arith.addf %411, %414 : vector<16x512xf32>
    %cst_232 = arith.constant 0.000000e+00 : f32
    %416 = vector.broadcast %cst_232 : f32 to vector<16x512xf32>
    %417 = arith.maximumf %415, %416 : vector<16x512xf32>
    %418 = arith.truncf %417 : vector<16x512xf32> to vector<16x512xbf16>
    %c7_233 = arith.constant 7 : index
    %c0_234 = arith.constant 0 : index
    %c0_235 = arith.constant 0 : index
    %419 = vector.load %arg9[%c7_233, %c0_234, %c0_235] : memref<8x512x64xbf16, #tpu.memory_space<vmem>>, vector<1x512x64xbf16>
    %420 = vector.shape_cast %419 : vector<1x512x64xbf16> to vector<512x64xbf16>
    %cst_236 = arith.constant dense<0.000000e+00> : vector<16x64xf32>
    %421 = tpu.matmul %418, %420, %cst_236 {dimension_numbers = #tpu.dot_dimension_numbers<[1], [0], [0], [1], [0, 0, 1, 1], [], []>} : vector<16x512xbf16>, vector<512x64xbf16>, vector<16x64xf32> -> vector<16x64xf32>
    %422 = arith.addf %408, %421 : vector<16x64xf32>
    %423 = arith.addf %363, %422 : vector<16x64xf32>
    %424 = vector.extract_strided_slice %235 {offsets = [4, 0], sizes = [1, 64], strides = [1, 1]} : vector<6x64xf32> to vector<1x64xf32>
    %425 = vector.extract_strided_slice %235 {offsets = [5, 0], sizes = [1, 64], strides = [1, 1]} : vector<6x64xf32> to vector<1x64xf32>
    %cst_237 = arith.constant dense<0.000000e+00> : vector<16xf32>
    %426 = vector.multi_reduction <add>, %423, %cst_237 [1] : vector<16x64xf32> to vector<16xf32>
    %427 = vector.shape_cast %426 : vector<16xf32> to vector<16x1xf32>
    %cst_238 = arith.constant 6.400000e+01 : f32
    %428 = vector.broadcast %cst_238 : f32 to vector<16x1xf32>
    %429 = arith.divf %427, %428 : vector<16x1xf32>
    %430 = vector.broadcast %429 : vector<16x1xf32> to vector<16x64xf32>
    %431 = arith.subf %423, %430 : vector<16x64xf32>
    %432 = arith.mulf %431, %431 : vector<16x64xf32>
    %cst_239 = arith.constant dense<0.000000e+00> : vector<16xf32>
    %433 = vector.multi_reduction <add>, %432, %cst_239 [1] : vector<16x64xf32> to vector<16xf32>
    %434 = vector.shape_cast %433 : vector<16xf32> to vector<16x1xf32>
    %cst_240 = arith.constant 6.400000e+01 : f32
    %435 = vector.broadcast %cst_240 : f32 to vector<16x1xf32>
    %436 = arith.divf %434, %435 : vector<16x1xf32>
    %437 = vector.broadcast %429 : vector<16x1xf32> to vector<16x64xf32>
    %438 = arith.subf %423, %437 : vector<16x64xf32>
    %cst_241 = arith.constant 9.99999974E-6 : f32
    %439 = vector.broadcast %cst_241 : f32 to vector<16x1xf32>
    %440 = arith.addf %436, %439 : vector<16x1xf32>
    %441 = math.rsqrt %440 : vector<16x1xf32>
    %442 = vector.broadcast %441 : vector<16x1xf32> to vector<16x64xf32>
    %443 = arith.mulf %438, %442 : vector<16x64xf32>
    %444 = vector.broadcast %424 : vector<1x64xf32> to vector<16x64xf32>
    %445 = arith.mulf %443, %444 : vector<16x64xf32>
    %446 = vector.broadcast %425 : vector<1x64xf32> to vector<16x64xf32>
    %447 = arith.addf %445, %446 : vector<16x64xf32>
    %448 = vector.shape_cast %447 : vector<16x64xf32> to vector<2x8x64xf32>
    %449 = vector.extract_strided_slice %448 {offsets = [0, 0, 0], sizes = [2, 1, 64], strides = [1, 1, 1]} : vector<2x8x64xf32> to vector<2x1x64xf32>
    %450 = vector.shape_cast %449 : vector<2x1x64xf32> to vector<2x64xf32>
    %451 = arith.truncf %450 : vector<2x64xf32> to vector<2x64xbf16>
    %cst_242 = arith.constant dense<0.000000e+00> : vector<2x64xf32>
    %452 = tpu.matmul %451, %2, %cst_242 {dimension_numbers = #tpu.dot_dimension_numbers<[1], [0], [0], [1], [0, 0, 1, 1], [], []>} : vector<2x64xbf16>, vector<64x64xbf16>, vector<2x64xf32> -> vector<2x64xf32>
    %453 = vector.broadcast %5 : vector<1x64xf32> to vector<2x64xf32>
    %454 = arith.addf %452, %453 : vector<2x64xf32>
    %455 = arith.truncf %454 : vector<2x64xf32> to vector<2x64xbf16>
    %cst_243 = arith.constant dense<0.000000e+00> : vector<2x128xf32>
    %456 = tpu.matmul %455, %3, %cst_243 {dimension_numbers = #tpu.dot_dimension_numbers<[1], [0], [0], [1], [0, 0, 1, 1], [], []>} : vector<2x64xbf16>, vector<64x128xbf16>, vector<2x128xf32> -> vector<2x128xf32>
    %457 = vector.broadcast %6 : vector<1x128xf32> to vector<2x128xf32>
    %458 = arith.addf %456, %457 : vector<2x128xf32>
    %459 = math.tanh %458 : vector<2x128xf32>
    %460 = arith.truncf %459 : vector<2x128xf32> to vector<2x128xbf16>
    %c0_244 = arith.constant 0 : index
    %c0_245 = arith.constant 0 : index
    %461 = vector.load %arg11[%c0_244, %c0_245] : memref<128x128xbf16, #tpu.memory_space<vmem>>, vector<128x128xbf16>
    %cst_246 = arith.constant dense<0.000000e+00> : vector<2x128xf32>
    %462 = tpu.matmul %460, %461, %cst_246 {dimension_numbers = #tpu.dot_dimension_numbers<[1], [0], [0], [1], [0, 0, 1, 1], [], []>} : vector<2x128xbf16>, vector<128x128xbf16>, vector<2x128xf32> -> vector<2x128xf32>
    %463 = vector.broadcast %7 : vector<1x128xf32> to vector<2x128xf32>
    %464 = arith.addf %462, %463 : vector<2x128xf32>
    %465 = tpu.iota {dimensions = array<i32: 1>} : vector<2x128xi32>
    %c7_i32 = arith.constant 7 : i32
    %466 = vector.broadcast %c7_i32 : i32 to vector<2x128xi32>
    %467 = arith.cmpi slt, %465, %466 : vector<2x128xi32>
    %cst_247 = arith.constant -1.000000e+30 : f32
    %468 = vector.broadcast %cst_247 : f32 to vector<2x128xf32>
    %469 = arith.select %467, %464, %468 : vector<2x128xi1>, vector<2x128xf32>
    %cst_248 = arith.constant dense<0xFF800000> : vector<2xf32>
    %470 = vector.multi_reduction <maximumf>, %469, %cst_248 [1] : vector<2x128xf32> to vector<2xf32>
    %471 = vector.shape_cast %470 : vector<2xf32> to vector<2x1xf32>
    %472 = vector.broadcast %471 : vector<2x1xf32> to vector<2x128xf32>
    %473 = arith.subf %464, %472 : vector<2x128xf32>
    %474 = math.exp %473 : vector<2x128xf32>
    %cst_249 = arith.constant 0.000000e+00 : f32
    %475 = vector.broadcast %cst_249 : f32 to vector<2x128xf32>
    %476 = arith.select %467, %474, %475 : vector<2x128xi1>, vector<2x128xf32>
    %cst_250 = arith.constant dense<0.000000e+00> : vector<2xf32>
    %477 = vector.multi_reduction <add>, %476, %cst_250 [1] : vector<2x128xf32> to vector<2xf32>
    %478 = vector.shape_cast %477 : vector<2xf32> to vector<2x1xf32>
    %479 = math.log %478 : vector<2x1xf32>
    %480 = arith.addf %471, %479 : vector<2x1xf32>
    %481 = vector.broadcast %480 : vector<2x1xf32> to vector<2x128xf32>
    %482 = arith.subf %464, %481 : vector<2x128xf32>
    %483 = arith.select %467, %482, %464 : vector<2x128xi1>, vector<2x128xf32>
    %c0_251 = arith.constant 0 : index
    %c0_252 = arith.constant 0 : index
    %484 = vector.load %arg13[%c0_251, %c0_252] : memref<2x128xf32, #tpu.memory_space<vmem>>, vector<2x128xf32>
    tpu.vector_store %arg13[%c0_251, %c0_252], %483 {strides = array<i32>} : memref<2x128xf32, #tpu.memory_space<vmem>>, vector<2x128xf32>,
    return
  }
  func.func @transform_0(%arg0: i32) -> (i32, i32) {
    %c0_i32 = arith.constant 0 : i32
    %c0_i32_0 = arith.constant 0 : i32
    return %arg0, %c0_i32 : i32, i32
  }
  func.func @transform_1(%arg0: i32) -> (i32, i32) {
    %c0_i32 = arith.constant 0 : i32
    %c0_i32_0 = arith.constant 0 : i32
    %c0_i32_1 = arith.constant 0 : i32
    return %c0_i32, %c0_i32_0 : i32, i32
  }
  func.func @transform_2(%arg0: i32) -> (i32, i32, i32) {
    %c0_i32 = arith.constant 0 : i32
    %c0_i32_0 = arith.constant 0 : i32
    %c0_i32_1 = arith.constant 0 : i32
    %c0_i32_2 = arith.constant 0 : i32
    return %c0_i32, %c0_i32_0, %c0_i32_1 : i32, i32, i32
  }
  func.func @transform_3(%arg0: i32) -> (i32, i32, i32) {
    %c0_i32 = arith.constant 0 : i32
    %c0_i32_0 = arith.constant 0 : i32
    %c0_i32_1 = arith.constant 0 : i32
    %c0_i32_2 = arith.constant 0 : i32
    return %c0_i32, %c0_i32_0, %c0_i32_1 : i32, i32, i32
  }
  func.func @transform_4(%arg0: i32) -> (i32, i32, i32) {
    %c0_i32 = arith.constant 0 : i32
    %c0_i32_0 = arith.constant 0 : i32
    %c0_i32_1 = arith.constant 0 : i32
    %c0_i32_2 = arith.constant 0 : i32
    return %c0_i32, %c0_i32_0, %c0_i32_1 : i32, i32, i32
  }
  func.func @transform_5(%arg0: i32) -> (i32, i32, i32) {
    %c0_i32 = arith.constant 0 : i32
    %c0_i32_0 = arith.constant 0 : i32
    %c0_i32_1 = arith.constant 0 : i32
    %c0_i32_2 = arith.constant 0 : i32
    return %c0_i32, %c0_i32_0, %c0_i32_1 : i32, i32, i32
  }
  func.func @transform_6(%arg0: i32) -> (i32, i32, i32) {
    %c0_i32 = arith.constant 0 : i32
    %c0_i32_0 = arith.constant 0 : i32
    %c0_i32_1 = arith.constant 0 : i32
    %c0_i32_2 = arith.constant 0 : i32
    return %c0_i32, %c0_i32_0, %c0_i32_1 : i32, i32, i32
  }
  func.func @transform_7(%arg0: i32) -> (i32, i32, i32) {
    %c0_i32 = arith.constant 0 : i32
    %c0_i32_0 = arith.constant 0 : i32
    %c0_i32_1 = arith.constant 0 : i32
    %c0_i32_2 = arith.constant 0 : i32
    return %c0_i32, %c0_i32_0, %c0_i32_1 : i32, i32, i32
  }
  func.func @transform_8(%arg0: i32) -> (i32, i32, i32) {
    %c0_i32 = arith.constant 0 : i32
    %c0_i32_0 = arith.constant 0 : i32
    %c0_i32_1 = arith.constant 0 : i32
    %c0_i32_2 = arith.constant 0 : i32
    return %c0_i32, %c0_i32_0, %c0_i32_1 : i32, i32, i32
  }
  func.func @transform_9(%arg0: i32) -> (i32, i32) {
    %c0_i32 = arith.constant 0 : i32
    %c0_i32_0 = arith.constant 0 : i32
    %c0_i32_1 = arith.constant 0 : i32
    return %c0_i32, %c0_i32_0 : i32, i32
  }
  func.func @transform_10(%arg0: i32) -> (i32, i32) {
    %c0_i32 = arith.constant 0 : i32
    %c0_i32_0 = arith.constant 0 : i32
    %c0_i32_1 = arith.constant 0 : i32
    return %c0_i32, %c0_i32_0 : i32, i32
  }
  func.func @transform_11(%arg0: i32) -> (i32, i32) {
    %c0_i32 = arith.constant 0 : i32
    %c0_i32_0 = arith.constant 0 : i32
    %c0_i32_1 = arith.constant 0 : i32
    return %c0_i32, %c0_i32_0 : i32, i32
  }
  func.func @transform_12(%arg0: i32) -> (i32, i32) {
    %c0_i32 = arith.constant 0 : i32
    %c0_i32_0 = arith.constant 0 : i32
    return %arg0, %c0_i32 : i32, i32
  }
}

</mosaic_0001>

<bundles_post_ra>
// kernel: tpu_custom_call.1
= control target key start
LH: loop header
LB: loop body
LE: loop exit
PB: predicated region body
PF: predicated region fallthrough
CT: control target
= control target key end

     0   :  { %s11129_s0 = inlined_call_operand.vmem [shape: f32[16,64], index: 0, kind: input, shape index: {}]   ;;  %s11130_s1 = inlined_call_operand.vmem [shape: f32[8,64], index: 1, kind: input, shape index: {}]   ;;  %s11131_s2 = inlined_call_operand.vmem [shape: bf16[12,64,32], index: 2, kind: input, shape index: {}]   ;;  %s11132_s3 = inlined_call_operand.vmem [shape: f32[12,1,32], index: 3, kind: input, shape index: {}]   ;;  %s11133_s4 = inlined_call_operand.vmem [shape: bf16[4,32,64], index: 4, kind: input, shape index: {}]   ;;  %s11134_s5 = inlined_call_operand.vmem [shape: f32[2,6,64], index: 5, kind: input, shape index: {}]   ;;  %s11135_s6 = inlined_call_operand.vmem [shape: bf16[8,64,512], index: 6, kind: input, shape index: {}]   ;;  %s11136_s7 = inlined_call_operand.vmem [shape: f32[8,1,512], index: 7, kind: input, shape index: {}]   ;;  %s11137_s8 = inlined_call_operand.vmem [shape: bf16[8,512,64], index: 8, kind: input, shape index: {}]   ;;  %s11138_s9 = inlined_call_operand.vmem [shape: bf16[192,128], index: 9, kind: input, shape index: {}]   ;;  %s11139_s10 = inlined_call_operand.vmem [shape: bf16[128,128], index: 10, kind: input, shape index: {}]   ;;  %s11140_s11 = inlined_call_operand.vmem [shape: f32[3,128], index: 11, kind: input, shape index: {}]   ;;  %s11141_s12 = inlined_call_operand.hbm [shape: f32[2,128], index: 12, kind: output, shape index: {}]  }
   0x1   :  { %v8291_v0 = vld [vmem:[%s11138_s9 + $0x18] sm:$0xff]  ;;  %v8290_v1 = vld [vmem:[%s11138_s9 + $0x10] sm:$0xff]  ;;  %v8289_v5 = vld [vmem:[%s11138_s9 + $0x8] sm:$0xff] }
   0x2   :  { %106 = vmatpush.bf16.msra.mxu0 %v8291_v0  ;;  %v8303_v2 = vld [vmem:[%s11131_s2 + $0x18] sm:$0xff] }
   0x3   :  { %v8307_v3 = vld [vmem:[%s11131_s2 + $0x38] sm:$0xff]  ;;  %164 = vmatpush.bf16.msra.mxu1 %v8303_v2 }
   0x4   :  { %v8311_v4 = vld [vmem:[%s11131_s2 + $0x58] sm:$0xff]  ;;  %216 = vmatpush.bf16.msra.mxu2 %v8307_v3 }
   0x5   :  { %268 = vmatpush.bf16.msra.mxu3 %v8311_v4 }
   0x6   :  { %107 = vmatpush.bf16.msra.mxu0 %v8290_v1 }
   0x7   :  { %17 = vsyncpa [#allocation3], 0  ;;  %v8288_v6 = vld [vmem:[%s11138_s9] sm:$0xff]  ;;  %v72_v8 = vld [vmem:[%s11129_s0 + $0x8] sm:$0xff]  ;;  %vm98_vm0 = vcmask 523264   ;;  %vm284_vm1 = vcmask 261120   ;;  %v68_v54 = vlaneseq }
   0x8   :  { %v71_v7 = vld [vmem:[%s11129_s0] sm:$0xff]  ;;  %v8302_v10 = vld [vmem:[%s11131_s2 + $0x10] sm:$0xff]  ;;  %v8301_v13 = vld [vmem:[%s11131_s2 + $0x8] sm:$0xff]  ;;  %vm355_vm2 = vcmask 1043456   ;;  %vm327_vm4 = vcmask 64512   ;;  %s5693_s29 = sshll.u32 %s11141_s12, 4  ;;  %s5694_s29 = int_to_ptr.hbm [resolvable:$true] %s5693_s29 }
   0x9   :  { %v73_v9 = vpack.c.bf16 %v72_v8, %v71_v7  ;;  %v8306_v11 = vld [vmem:[%s11131_s2 + $0x30] sm:$0xff]  ;;  %165 = vmatpush.bf16.msra.mxu1 %v8302_v10  ;;  %v8305_v14 = vld [vmem:[%s11131_s2 + $0x28] sm:$0xff]  ;;  %v8300_v16 = vld [vmem:[%s11131_s2] sm:$0xff]  ;;  %v9014_v55 = vand.u32 127, %v68_v54 }
   0xa   :  { %108 = vmatpush.bf16.msra.mxu0 %v8289_v5  ;;  %v8310_v12 = vld [vmem:[%s11131_s2 + $0x50] sm:$0xff]  ;;  %217 = vmatpush.bf16.msra.mxu2 %v8306_v11  ;;  %v8309_v15 = vld [vmem:[%s11131_s2 + $0x48] sm:$0xff]  ;;  %v8304_v17 = vld [vmem:[%s11131_s2 + $0x20] sm:$0xff] }
   0xb   :  { %269 = vmatpush.bf16.msra.mxu3 %v8310_v12  ;;  %v8308_v18 = vld [vmem:[%s11131_s2 + $0x40] sm:$0xff]  ;;  %v8317_v44 = vld [vmem:[%s11131_s2 + $0x78] sm:$0xff]  ;;  %v8316_v50 = vld [vmem:[%s11131_s2 + $0x70] sm:$0xff]  ;;  %vm70_vm3 = vcmp.lt.s32.totalorder %v9014_v55, 5 }
   0xc   :  { %v116_v20 = vld [vmem:[%s11130_s1] sm:$0xff]  ;;  %v8315_v52 = vld [vmem:[%s11131_s2 + $0x68] sm:$0xff]  ;;  %v8321_v12 = vld [vmem:[%s11131_s2 + $0x98] sm:$0xff] }
   0xd   :  { %166 = vmatpush.bf16.msra.mxu1 %v8301_v13  ;;  %v8751_v25 = vld [vmem:[%s11132_s3 + $0x1] ss:$0 sm:$0xff]  ;;  %v8752_v26 = vld [vmem:[%s11132_s3 + $0x2] ss:$0 sm:$0xff]  ;;  %v8750_v32 = vld [vmem:[%s11132_s3] ss:$0 sm:$0xff] }
   0xe   :  { %109 = vmatpush.bf16.msra.mxu0 %v8288_v6  ;;  %218 = vmatpush.bf16.msra.mxu2 %v8305_v14  ;;  %v8314_v53 = vld [vmem:[%s11131_s2 + $0x60] sm:$0xff]  ;;  %v8320_v13 = vld [vmem:[%s11131_s2 + $0x90] sm:$0xff]  ;;  %v8319_v14 = vld [vmem:[%s11131_s2 + $0x88] sm:$0xff] }
   0xf   :  { %270 = vmatpush.bf16.msra.mxu3 %v8309_v15  ;;  %v8325_v15 = vld [vmem:[%s11131_s2 + $0xb8] sm:$0xff] }
  0x11   :  { %5718 = vmatmul.msk.bf16.vlgmr.msra.gmra.mxu0 %vm98_vm0, %v73_v9  ;;  %167 = vmatpush.bf16.msra.mxu1 %v8300_v16  ;;  %v8318_v16 = vld [vmem:[%s11131_s2 + $0x80] sm:$0xff] }
  0x12   :  { %219 = vmatpush.bf16.msra.mxu2 %v8304_v17  ;;  %v8324_v17 = vld [vmem:[%s11131_s2 + $0xb0] sm:$0xff] }
  0x13   :  { %271 = vmatpush.bf16.msra.mxu3 %v8308_v18  ;;  %v8323_v18 = vld [vmem:[%s11131_s2 + $0xa8] sm:$0xff] }
  0x8e   :  { %v111_v19 = vpop.f32.mrf.mxu0 }
  0x8f   :  { %v8971_v22 = vadd.f32 %v116_v20, %v111_v19  ;;  %v8322_v19 = vld [vmem:[%s11131_s2 + $0xa0] sm:$0xff] }
  0x96   :  { %v113_v21 = vpop.f32.mrf.mxu0 }
  0x97   :  { %v8973_v23 = vadd.f32 %v116_v20, %v113_v21 }
  0x99   :  { %v8977_v24 = vpack.c.bf16 %v8973_v23, %v8971_v22 }
  0x9b   :  { %5735 = vmatmul.msk.bf16.vlgmr.msra.gmra.mxu1 %vm98_vm0, %v8977_v24  ;;  %5761 = vmatmul.msk.bf16.vlgmr.msra.gmra.mxu2 %vm98_vm0, %v8977_v24 }
  0x9c   :  { %5787 = vmatmul.msk.bf16.vlgmr.msra.gmra.mxu3 %vm98_vm0, %v8977_v24 }
 0x118   :  { %v169_v30 = vpop.f32.mrf.mxu1 }
 0x119   :  { %v170_v37 = vadd.f32 %v8750_v32, %v169_v30 }
 0x11b   :  { %v278_v42 = vpack.c.bf16 %v170_v37, %v170_v37 }
 0x11e   :  { %v221_v27 = vpop.f32.mrf.mxu2 }
 0x11f   :  { %v222_v28 = vadd.f32 %v8751_v25, %v221_v27  ;;  %v273_v29 = vpop.f32.mrf.mxu3 }
 0x120   :  { %v274_v31 = vadd.f32 %v8752_v26, %v273_v29  ;;  %v171_v45 = vpop.f32.mrf.mxu1 }
 0x121   :  { %v280_v33 = vpack.c.bf16 %v222_v28, %v222_v28  ;;  %v172_v49 = vadd.f32 %v8750_v32, %v171_v45  ;;  %v8312_v32 = vld [vmem:[%s11133_s4] sm:$0xff] }
 0x122   :  { %v282_v34 = vpack.c.bf16 %v274_v31, %v274_v31  ;;  %v8313_v31 = vld [vmem:[%s11133_s4 + $0x8] sm:$0xff] }
 0x123   :  { %v289_v35 = vsel %vm284_vm1, %v280_v33, 0  ;;  %v279_v51 = vpack.c.bf16 %v172_v49, %v172_v49 }
 0x124   :  { %298 = vmatpush.bf16.xpose.msrb.mxu0 %v289_v35  ;;  %v357_v36 = vsel %vm355_vm2, %v282_v34, 0 }
 0x125   :  { %366 = vmatpush.bf16.msrb.mxu2 %v357_v36 }
 0x126   :  { %v223_v38 = vpop.f32.mrf.mxu2 }
 0x127   :  { %v224_v39 = vadd.f32 %v8751_v25, %v223_v38  ;;  %v275_v40 = vpop.f32.mrf.mxu3 }
 0x128   :  { %v276_v41 = vadd.f32 %v8752_v26, %v275_v40 }
 0x129   :  { %v281_v43 = vpack.c.bf16 %v224_v39, %v224_v39  ;;  %522 = vmatpush.bf16.msra.mxu2 %v8321_v12 }
 0x12a   :  { %v283_v46 = vpack.c.bf16 %v276_v41, %v276_v41  ;;  %v8753_v41 = vld [vmem:[%s11132_s3 + $0x3] ss:$0 sm:$0xff] }
 0x12b   :  { %5788 = vmatmul.msk.bf16.vlgmr.msrb.gmra.mxu0 %vm284_vm1, %v278_v42  ;;  %v308_v47 = vsel %vm284_vm1, %v281_v43, 0 }
 0x12c   :  { %317 = vmatpush.bf16.xpose.msrb.mxu1 %v308_v47  ;;  %v376_v48 = vsel %vm355_vm2, %v283_v46, 0  ;;  %417 = vmatpush.bf16.msra.mxu0 %v8313_v31 }
 0x12d   :  { %385 = vmatpush.bf16.msrb.mxu3 %v376_v48  ;;  %523 = vmatpush.bf16.msra.mxu2 %v8320_v13 }
 0x130   :  { %418 = vmatpush.bf16.msra.mxu0 %v8312_v32  ;;  %v8327_v32 = vld [vmem:[%s11133_s4 + $0x18] sm:$0xff] }
 0x131   :  { %524 = vmatpush.bf16.msra.mxu2 %v8319_v14  ;;  %574 = vmatpush.bf16.msra.mxu3 %v8325_v15 }
 0x133   :  { %5789 = vmatmul.msk.bf16.vlgmr.msrb.gmra.mxu1 %vm284_vm1, %v279_v51 }
 0x134   :  { %470 = vmatpush.bf16.msra.mxu1 %v8317_v44  ;;  %v8755_v44 = vld [vmem:[%s11132_s3 + $0x5] ss:$0 sm:$0xff] }
 0x135   :  { %525 = vmatpush.bf16.msra.mxu2 %v8318_v16  ;;  %575 = vmatpush.bf16.msra.mxu3 %v8324_v17 }
 0x138   :  { %471 = vmatpush.bf16.msra.mxu1 %v8316_v50 }
 0x139   :  { %576 = vmatpush.bf16.msra.mxu3 %v8323_v18 }
 0x13c   :  { %472 = vmatpush.bf16.msra.mxu1 %v8315_v52 }
 0x13d   :  { %577 = vmatpush.bf16.msra.mxu3 %v8322_v19 }
 0x140   :  { %473 = vmatpush.bf16.msra.mxu1 %v8314_v53 }
 0x143   :  { %5826 = vmatmul.msk.bf16.vlgmr.msra.gmra.mxu1 %vm98_vm0, %v8977_v24 }
 0x1a8   :  { %v300_v56 = vpop.f32.mrf.mxu0 }
 0x1a9   :  { %v323_v57 = vmul.f32 0.17677669, %v300_v56 }
 0x1ab   :  { %v325_v58 = vsel %vm70_vm3, %v323_v57, -1e+30 }
 0x1ac   :  { %v328_v59 = vsel %vm327_vm4, %v325_v58, -inf }
 0x1ad   :  { %329 = vmax.xlane.f32.xlu0 %v328_v59 }
 0x1b0   :  { %v302_v60 = vpop.f32.mrf.mxu0  ;;  %v319_v61 = vpop.f32.mrf.mxu1 }
 0x1b1   :  { %v324_v62 = vmul.f32 0.17677669, %v319_v61 }
 0x1b3   :  { %v326_v63 = vsel %vm70_vm3, %v324_v62, -1e+30 }
 0x1b4   :  { %v331_v0 = vsel %vm327_vm4, %v326_v63, -inf }
 0x1b5   :  { %332 = vmax.xlane.f32.xlu0 %v331_v0 }
 0x1b8   :  { %v321_v1 = vpop.f32.mrf.mxu1 }
 0x1c0   :  { %v475_v40 = vpop.f32.mrf.mxu1 }
 0x1c1   :  { %v476_v45 = vadd.f32 %v8753_v41, %v475_v40 }
 0x1c3   :  { %v584_v50 = vpack.c.bf16 %v476_v45, %v476_v45 }
 0x1c8   :  { %v477_v53 = vpop.f32.mrf.mxu1 }
 0x1c9   :  { %v478_v57 = vadd.f32 %v8753_v41, %v477_v53 }
 0x1cb   :  { %v585_v60 = vpack.c.bf16 %v478_v57, %v478_v57 }
 0x220   :  { %v330_v2 = vpop.xlane.xlu0 %329 }
 0x221   :  { %v334_v3 = vsub.f32 %v325_v58, %v330_v2 }
 0x223   :  { %v336_v4 = vmul.f32 1.442695, %v334_v3 }
 0x225   :  { %8762 = vpow2.f32 %v336_v4 }
 0x228   :  { %v333_v5 = vpop.xlane.xlu0 %332 }
 0x229   :  { %v335_v6 = vsub.f32 %v326_v63, %v333_v5 }
 0x22b   :  { %v8763_v7 = vpop.eup %8762  ;;  %v338_v8 = vmul.f32 1.442695, %v335_v6 }
 0x22c   :  { %v340_v9 = vsel %vm327_vm4, %v8763_v7, 0.0 }
 0x22d   :  { %8764 = vpow2.f32 %v338_v8  ;;  %341 = vadd.xlane.f32.xlu1 %v340_v9 }
 0x233   :  { %v8765_v10 = vpop.eup %8764 }
 0x234   :  { %v343_v11 = vsel %vm327_vm4, %v8765_v10, 0.0 }
 0x235   :  { %344 = vadd.xlane.f32.xlu1 %v343_v11 }
 0x2a0   :  { %v342_v20 = vpop.xlane.xlu1 %341 }
 0x2a1   :  { %8766 = vrcp.f32 %v342_v20 }
 0x2a7   :  { %v8767_v21 = vpop.eup %8766 }
 0x2a8   :  { %v348_v25 = vmul.f32 %v8767_v21, %v8763_v7  ;;  %v345_v26 = vpop.xlane.xlu1 %344 }
 0x2a9   :  { %8768 = vrcp.f32 %v345_v26 }
 0x2aa   :  { %v350_v27 = vpack.c.bf16 %v348_v25, %v348_v25 }
 0x2ac   :  { %5790 = vmatmul.msk.bf16.vlgmr.msrb.gmra.mxu2 %vm327_vm4, %v350_v27 }
 0x2af   :  { %v8769_v28 = vpop.eup %8768 }
 0x2b0   :  { %v349_v29 = vmul.f32 %v8769_v28, %v8765_v10 }
 0x2b2   :  { %v351_v30 = vpack.c.bf16 %v349_v29, %v349_v29 }
 0x2b4   :  { %5791 = vmatmul.msk.bf16.vlgmr.msrb.gmra.mxu3 %vm327_vm4, %v351_v30 }
 0x2bc   :  { %5852 = vmatmul.msk.bf16.vlgmr.msra.gmra.mxu2 %vm98_vm0, %v8977_v24 }
 0x2c4   :  { %5878 = vmatmul.msk.bf16.vlgmr.msra.gmra.mxu3 %vm98_vm0, %v8977_v24  ;;  %v8754_v24 = vld [vmem:[%s11132_s3 + $0x4] ss:$0 sm:$0xff] }
 0x32f   :  { %v368_v33 = vpop.f32.mrf.mxu2 }
 0x337   :  { %v370_v34 = vpop.f32.mrf.mxu2  ;;  %v387_v35 = vpop.f32.mrf.mxu3 }
 0x338   :  { %v391_v36 = vpack.c.bf16 %v387_v35, %v368_v33  ;;  %v8326_v33 = vld [vmem:[%s11133_s4 + $0x10] sm:$0xff] }
 0x33a   :  { %5800 = vmatmul.msk.bf16.vlgmr.msra.gmra.mxu0 %vm284_vm1, %v391_v36 }
 0x33f   :  { %v389_v37 = vpop.f32.mrf.mxu3  ;;  %v527_v38 = vpop.f32.mrf.mxu2 }
 0x340   :  { %v528_v39 = vadd.f32 %v8754_v24, %v527_v38  ;;  %v9097_v38 = vld [vmem:[%s11134_s5] sm:$0x3f] }
 0x342   :  { %v586_v42 = vpack.c.bf16 %v528_v39, %v528_v39  ;;  %v425_v39 = vperm.slane %v9097_v38, 2 }
 0x344   :  { %v594_v43 = vsel %vm284_vm1, %v586_v42, 0 }
 0x345   :  { %603 = vmatpush.bf16.xpose.msrb.mxu0 %v594_v43 }
 0x347   :  { %v529_v46 = vpop.f32.mrf.mxu2  ;;  %v579_v47 = vpop.f32.mrf.mxu3 }
 0x348   :  { %v530_v48 = vadd.f32 %v8754_v24, %v529_v46  ;;  %v580_v49 = vadd.f32 %v8755_v44, %v579_v47 }
 0x34a   :  { %v587_v51 = vpack.c.bf16 %v530_v48, %v530_v48  ;;  %v588_v52 = vpack.c.bf16 %v580_v49, %v580_v49 }
 0x34c   :  { %v660_v54 = vsel %vm355_vm2, %v588_v52, 0  ;;  %5879 = vmatmul.msk.bf16.vlgmr.msrb.gmra.mxu0 %vm284_vm1, %v584_v50  ;;  %v613_v56 = vsel %vm284_vm1, %v587_v51, 0  ;;  %v8846_v50 = vmov 64.0  }
 0x34d   :  { %622 = vmatpush.bf16.xpose.msrb.mxu1 %v613_v56  ;;  %669 = vmatpush.bf16.msrb.mxu2 %v660_v54 }
 0x34e   :  { %721 = vmatpush.bf16.msra.mxu0 %v8327_v32 }
 0x34f   :  { %v581_v58 = vpop.f32.mrf.mxu3 }
 0x350   :  { %v582_v59 = vadd.f32 %v8755_v44, %v581_v58 }
 0x352   :  { %v589_v61 = vpack.c.bf16 %v582_v59, %v582_v59  ;;  %722 = vmatpush.bf16.msra.mxu0 %v8326_v33  ;;  %v5916_v33 = vld [vmem:[%s11135_s6 + $0x30] sm:$0xf0] }
 0x354   :  { %5880 = vmatmul.msk.bf16.vlgmr.msrb.gmra.mxu1 %vm284_vm1, %v585_v60  ;;  %v679_v62 = vsel %vm355_vm2, %v589_v61, 0 }
 0x355   :  { %688 = vmatpush.bf16.msrb.mxu3 %v679_v62 }
 0x3b7   :  { %v420_v63 = vpop.f32.mrf.mxu0 }
 0x3b8   :  { %v426_v40 = vadd.f32 %v425_v39, %v420_v63 }
 0x3bf   :  { %v422_v0 = vpop.f32.mrf.mxu0 }
 0x3c0   :  { %v427_v45 = vadd.f32 %v425_v39, %v422_v0  ;;  %v8333_v39 = vld [vmem:[%s11135_s6 + $0x2c] sm:$0xf] }
 0x3c9   :  { %v605_v1 = vpop.f32.mrf.mxu0 }
 0x3ca   :  { %v628_v2 = vmul.f32 0.17677669, %v605_v1 }
 0x3cc   :  { %v630_v3 = vsel %vm70_vm3, %v628_v2, -1e+30  ;;  %v5946_v2 = vld [vmem:[%s11135_s6 + $0x60] sm:$0xf] }
 0x3cd   :  { %v632_v4 = vsel %vm327_vm4, %v630_v3, -inf }
 0x3ce   :  { %633 = vmax.xlane.f32.xlu2 %v632_v4  ;;  %v8340_v4 = vld [vmem:[%s11135_s6 + $0x64] sm:$0xf] }
 0x3d1   :  { %v607_v5 = vpop.f32.mrf.mxu0  ;;  %v624_v6 = vpop.f32.mrf.mxu1 }
 0x3d2   :  { %v629_v7 = vmul.f32 0.17677669, %v624_v6  ;;  %v5948_v6 = vld [vmem:[%s11135_s6 + $0x70] sm:$0xf0] }
 0x3d4   :  { %v631_v8 = vsel %vm70_vm3, %v629_v7, -1e+30  ;;  %v5954_v7 = vld [vmem:[%s11135_s6 + $0x68] sm:$0xf] }
 0x3d5   :  { %v635_v9 = vsel %vm327_vm4, %v631_v8, -inf }
 0x3d6   :  { %636 = vmax.xlane.f32.xlu2 %v635_v9  ;;  %v5951_v9 = vor.u32 %v8340_v4, %v5948_v6  ;;  %v8358_v4 = vld [vmem:[%s11137_s8 + $0x70] sm:$0xff] }
 0x3d8   :  { %918 = vmatpush.bf16.msra.mxu2 %v5951_v9  ;;  %v8373_v9 = vld [vmem:[%s11137_s8 + $0xe8] sm:$0xff] }
 0x3d9   :  { %v626_v10 = vpop.f32.mrf.mxu1 }
 0x441   :  { %v634_v11 = vpop.xlane.xlu2 %633 }
 0x442   :  { %v638_v12 = vsub.f32 %v630_v3, %v634_v11  ;;  %v8342_v3 = vld [vmem:[%s11135_s6 + $0x6c] sm:$0xf0]  ;;  %v8341_v11 = vld [vmem:[%s11135_s6 + $0x6c] sm:$0xf] }
 0x443   :  { %v5947_v5 = vor.u32 %v8342_v3, %v5946_v2 }
 0x444   :  { %v640_v13 = vmul.f32 1.442695, %v638_v12  ;;  %v5956_v12 = vld [vmem:[%s11135_s6 + $0x78] sm:$0xf0] }
 0x445   :  { %904 = vmatpush.bf16.msra.mxu1 %v5947_v5  ;;  %v8366_v5 = vld [vmem:[%s11137_s8 + $0xb0] sm:$0xff] }
 0x446   :  { %8770 = vpow2.f32 %v640_v13  ;;  %v5959_v13 = vor.u32 %v8341_v11, %v5956_v12  ;;  %v8365_v11 = vld [vmem:[%s11137_s8 + $0xa8] sm:$0xff] }
 0x448   :  { %946 = vmatpush.bf16.msrb.mxu0 %v5959_v13 }
 0x449   :  { %v637_v14 = vpop.xlane.xlu2 %636 }
 0x44a   :  { %v639_v15 = vsub.f32 %v631_v8, %v637_v14  ;;  %v8343_v8 = vld [vmem:[%s11135_s6 + $0x74] sm:$0xf0]  ;;  %v5930_v14 = vld [vmem:[%s11135_s6 + $0x40] sm:$0xf] }
 0x44b   :  { %v5955_v10 = vor.u32 %v8343_v8, %v5954_v7  ;;  %v8349_v8 = vld [vmem:[%s11137_s8 + $0x28] sm:$0xff] }
 0x44c   :  { %v8771_v16 = vpop.eup %8770  ;;  %v642_v17 = vmul.f32 1.442695, %v639_v15  ;;  %v8338_v15 = vld [vmem:[%s11135_s6 + $0x4c] sm:$0xf0] }
 0x44d   :  { %v644_v18 = vsel %vm327_vm4, %v8771_v16, 0.0  ;;  %932 = vmatpush.bf16.msra.mxu3 %v5955_v10  ;;  %v8357_v10 = vld [vmem:[%s11137_s8 + $0x68] sm:$0xff] }
 0x44e   :  { %8772 = vpow2.f32 %v642_v17  ;;  %645 = vadd.xlane.f32.xlu0 %v644_v18  ;;  %v5931_v17 = vor.u32 %v8338_v15, %v5930_v14  ;;  %v5932_v18 = vld [vmem:[%s11135_s6 + $0x50] sm:$0xf0]  ;;  %v8348_v14 = vld [vmem:[%s11137_s8 + $0x20] sm:$0xff] }
 0x44f   :  { %v8372_v15 = vld [vmem:[%s11137_s8 + $0xe0] sm:$0xff] }
 0x450   :  { %905 = vmatpush.bf16.msra.mxu1 %v5931_v17 }
 0x454   :  { %v8773_v19 = vpop.eup %8772 }
 0x455   :  { %v647_v20 = vsel %vm327_vm4, %v8773_v19, 0.0 }
 0x456   :  { %648 = vadd.xlane.f32.xlu1 %v647_v20  ;;  %v8339_v20 = vld [vmem:[%s11135_s6 + $0x54] sm:$0xf0] }
 0x4c1   :  { %v646_v21 = vpop.xlane.xlu0 %645 }
 0x4c2   :  { %8774 = vrcp.f32 %v646_v21 }
 0x4c8   :  { %v8775_v25 = vpop.eup %8774 }
 0x4c9   :  { %v652_v26 = vmul.f32 %v8775_v25, %v8771_v16  ;;  %v649_v27 = vpop.xlane.xlu1 %648  ;;  %v8336_v16 = vld [vmem:[%s11135_s6 + $0x44] sm:$0xf] }
 0x4ca   :  { %8776 = vrcp.f32 %v649_v27  ;;  %v5935_v21 = vor.u32 %v8336_v16, %v5932_v18  ;;  %v5940_v27 = vld [vmem:[%s11135_s6 + $0x58] sm:$0xf0] }
 0x4cb   :  { %v654_v28 = vpack.c.bf16 %v652_v26, %v652_v26  ;;  %8778 = vrcp.f32 %v8846_v50  ;;  %v8337_v26 = vld [vmem:[%s11135_s6 + $0x4c] sm:$0xf] }
 0x4cc   :  { %919 = vmatpush.bf16.msra.mxu2 %v5935_v21 }
 0x4cd   :  { %5881 = vmatmul.msk.bf16.vlgmr.msrb.gmra.mxu2 %vm327_vm4, %v654_v28  ;;  %v5943_v28 = vor.u32 %v8337_v26, %v5940_v27  ;;  %v784_v26 = vperm.slane %v9097_v38, 0 }
 0x4cf   :  { %947 = vmatpush.bf16.msrb.mxu0 %v5943_v28 }
 0x4d0   :  { %v8777_v29 = vpop.eup %8776 }
 0x4d1   :  { %v653_v30 = vmul.f32 %v8777_v29, %v8773_v19  ;;  %v8779_v51 = vpop.eup %8778  ;;  %v5938_v19 = vld [vmem:[%s11135_s6 + $0x48] sm:$0xf]  ;;  %v5914_v29 = vld [vmem:[%s11135_s6 + $0x20] sm:$0xf] }
 0x4d2   :  { %v740_v52 = vmul.f32 64.0, %v8779_v51  ;;  %vm744_vm5 = vweird.f32 %v8779_v51  ;;  %v5939_v25 = vor.u32 %v8339_v20, %v5938_v19 }
 0x4d3   :  { %v655_v31 = vpack.c.bf16 %v653_v30, %v653_v30  ;;  %v8334_v30 = vld [vmem:[%s11135_s6 + $0x2c] sm:$0xf0] }
 0x4d4   :  { %v741_v53 = vsub.f32 1.0, %v740_v52  ;;  %933 = vmatpush.bf16.msra.mxu3 %v5939_v25  ;;  %v5915_v32 = vor.u32 %v8334_v30, %v5914_v29  ;;  %v8329_v52 = vld [vmem:[%s11135_s6 + $0xc] sm:$0xf]  ;;  %v787_v30 = vperm.slane %v9097_v38, 1  ;;  %v8347_v38 = vld [vmem:[%s11137_s8 + $0x18] sm:$0xff] }
 0x4d5   :  { %5882 = vmatmul.msk.bf16.vlgmr.msrb.gmra.mxu3 %vm327_vm4, %v655_v31  ;;  %v8332_v31 = vld [vmem:[%s11135_s6 + $0x24] sm:$0xf] }
 0x4d6   :  { %v742_v54 = vmul.f32 %v8779_v51, %v741_v53  ;;  %906 = vmatpush.bf16.msra.mxu1 %v5915_v32  ;;  %v5908_v53 = vld [vmem:[%s11135_s6 + $0x18] sm:$0xf0] }
 0x4d8   :  { %v743_v56 = vadd.f32 %v8779_v51, %v742_v54 }
 0x550   :  { %v671_v34 = vpop.f32.mrf.mxu2 }
 0x558   :  { %v673_v35 = vpop.f32.mrf.mxu2  ;;  %v690_v36 = vpop.f32.mrf.mxu3 }
 0x559   :  { %v694_v24 = vpack.c.bf16 %v690_v36, %v671_v34  ;;  %v5922_v34 = vld [vmem:[%s11135_s6 + $0x28] sm:$0xf]  ;;  %v8335_v35 = vld [vmem:[%s11135_s6 + $0x34] sm:$0xf0] }
 0x55b   :  { %5895 = vmatmul.msk.bf16.vlgmr.msra.gmra.mxu0 %vm284_vm1, %v694_v24  ;;  %v5919_v24 = vor.u32 %v8332_v31, %v5916_v33 }
 0x55d   :  { %920 = vmatpush.bf16.msra.mxu2 %v5919_v24  ;;  %v8364_v24 = vld [vmem:[%s11137_s8 + $0xa0] sm:$0xff] }
 0x560   :  { %v692_v37 = vpop.f32.mrf.mxu3 }
 0x561   :  { %v5923_v37 = vor.u32 %v8335_v35, %v5922_v34 }
 0x563   :  { %934 = vmatpush.bf16.msra.mxu3 %v5923_v37  ;;  %v8346_v37 = vld [vmem:[%s11137_s8 + $0x10] sm:$0xff] }
 0x5d8   :  { %v724_v41 = vpop.f32.mrf.mxu0 }
 0x5d9   :  { %v729_v42 = vadd.f32 %v724_v41, %v426_v40  ;;  %v5924_v40 = vld [vmem:[%s11135_s6 + $0x38] sm:$0xf0] }
 0x5db   :  { %v731_v43 = vadd.f32 %v729_v42, %v8971_v22  ;;  %v9104_v22 = vsel %vm744_vm5, %v8779_v51, %v743_v56  ;;  %v5927_v42 = vor.u32 %v8333_v39, %v5924_v40  ;;  %v8331_v51 = vld [vmem:[%s11135_s6 + $0x14] sm:$0xf0]  ;;  %v5911_v56 = vor.u32 %v8329_v52, %v5908_v53  ;;  %v8370_v39 = vld [vmem:[%s11137_s8 + $0xd0] sm:$0xff]  ;;  %v8389_v52 = vld [vmem:[%s11135_s6 + $0xec] sm:$0xf] }
 0x5dc   :  { %v8355_v40 = vld [vmem:[%s11137_s8 + $0x58] sm:$0xff] }
 0x5dd   :  { %v733_v44 = vsel %vm98_vm0, %v731_v43, 0.0  ;;  %948 = vmatpush.bf16.msrb.mxu0 %v5927_v42  ;;  %v8345_v42 = vld [vmem:[%s11137_s8 + $0x8] sm:$0xff] }
 0x5de   :  { %734 = vadd.xlane.f32.xlu2 %v733_v44  ;;  %v8330_v44 = vld [vmem:[%s11135_s6 + $0xc] sm:$0xf0] }
 0x5e0   :  { %v726_v46 = vpop.f32.mrf.mxu0 }
 0x5e1   :  { %v730_v47 = vadd.f32 %v726_v46, %v427_v45  ;;  %v8328_v45 = vld [vmem:[%s11135_s6 + $0x4] sm:$0xf]  ;;  %949 = vmatpush.bf16.msrb.mxu0 %v5911_v56 }
 0x5e3   :  { %v732_v48 = vadd.f32 %v730_v47, %v8973_v23 }
 0x5e5   :  { %v736_v49 = vsel %vm98_vm0, %v732_v48, 0.0 }
 0x5e6   :  { %737 = vadd.xlane.f32.xlu0 %v736_v49  ;;  %v5906_v49 = vld [vmem:[%s11135_s6 + $0x8] sm:$0xf] }
 0x5e7   :  { %v5907_v54 = vor.u32 %v8331_v51, %v5906_v49  ;;  %v8361_v49 = vld [vmem:[%s11137_s8 + $0x88] sm:$0xff]  ;;  %v8390_v51 = vld [vmem:[%s11135_s6 + $0xec] sm:$0xf0] }
 0x5e9   :  { %935 = vmatpush.bf16.msra.mxu3 %v5907_v54  ;;  %v6169_v54 = vld [vmem:[%s11135_s6 + $0xf8] sm:$0xf0] }
 0x5ea   :  { %v6172_v56 = vor.u32 %v8389_v52, %v6169_v54 }
 0x651   :  { %v735_v57 = vpop.xlane.xlu2 %734 }
 0x652   :  { %v746_v58 = vmul.f32 %v9104_v22, %v735_v57 }
 0x654   :  { %v9107_v59 = vsub.f32 %v731_v43, %v746_v58  ;;  %v5898_v43 = vld [vmem:[%s11135_s6] sm:$0xf]  ;;  %v8351_v58 = vld [vmem:[%s11137_s8 + $0x38] sm:$0xff] }
 0x655   :  { %v5899_v47 = vor.u32 %v8330_v44, %v5898_v43  ;;  %v8369_v43 = vld [vmem:[%s11137_s8 + $0xc8] sm:$0xff]  ;;  %v8354_v44 = vld [vmem:[%s11137_s8 + $0x50] sm:$0xff] }
 0x656   :  { %v750_v23 = vmul.f32 %v9107_v59, %v9107_v59 }
 0x657   :  { %907 = vmatpush.bf16.msra.mxu1 %v5899_v47  ;;  %v8368_v47 = vld [vmem:[%s11137_s8 + $0xc0] sm:$0xff] }
 0x658   :  { %v752_v60 = vsel %vm98_vm0, %v750_v23, 0.0  ;;  %v8375_v23 = vld [vmem:[%s11137_s8 + $0xf8] sm:$0xff] }
 0x659   :  { %753 = vadd.xlane.f32.xlu1 %v752_v60  ;;  %v738_v61 = vpop.xlane.xlu0 %737  ;;  %1266 = vmatpush.bf16.msra.mxu0 %v8375_v23  ;;  %v6143_v23 = vld [vmem:[%s11135_s6 + $0xc0] sm:$0xf] }
 0x65a   :  { %v747_v62 = vmul.f32 %v9104_v22, %v738_v61  ;;  %v8359_v61 = vld [vmem:[%s11137_s8 + $0x78] sm:$0xff] }
 0x65b   :  { %1224 = vmatpush.bf16.msrb.mxu1 %v8351_v58  ;;  %v8360_v58 = vld [vmem:[%s11137_s8 + $0x80] sm:$0xff] }
 0x65c   :  { %v9113_v63 = vsub.f32 %v732_v48, %v747_v62  ;;  %v5900_v48 = vld [vmem:[%s11135_s6 + $0x10] sm:$0xf0]  ;;  %v8367_v62 = vld [vmem:[%s11137_s8 + $0xb8] sm:$0xff] }
 0x65d   :  { %v5903_v50 = vor.u32 %v8328_v45, %v5900_v48  ;;  %1252 = vmatpush.bf16.msrb.mxu3 %v8367_v62  ;;  %v8362_v45 = vld [vmem:[%s11137_s8 + $0x90] sm:$0xff]  ;;  %v8353_v48 = vld [vmem:[%s11137_s8 + $0x48] sm:$0xff] }
 0x65e   :  { %v751_v0 = vmul.f32 %v9113_v63, %v9113_v63 }
 0x65f   :  { %921 = vmatpush.bf16.msra.mxu2 %v5903_v50  ;;  %v6159_v50 = vld [vmem:[%s11135_s6 + $0xe0] sm:$0xf] }
 0x660   :  { %v755_v1 = vsel %vm98_vm0, %v751_v0, 0.0  ;;  %v8350_v0 = vld [vmem:[%s11137_s8 + $0x30] sm:$0xff]  ;;  %v6160_v53 = vor.u32 %v8390_v51, %v6159_v50 }
 0x661   :  { %756 = vadd.xlane.f32.xlu2 %v755_v1  ;;  %v8374_v1 = vld [vmem:[%s11137_s8 + $0xf0] sm:$0xff]  ;;  %1225 = vmatpush.bf16.msrb.mxu1 %v8350_v0  ;;  %v6153_v0 = vld [vmem:[%s11135_s6 + $0xd8] sm:$0xf0] }
 0x662   :  { %1267 = vmatpush.bf16.msra.mxu0 %v8374_v1  ;;  %1253 = vmatpush.bf16.msrb.mxu3 %v8366_v5 }
 0x663   :  { %1238 = vmatpush.bf16.msrb.mxu2 %v8359_v61  ;;  %v8385_v61 = vld [vmem:[%s11135_s6 + $0xcc] sm:$0xf] }
 0x664   :  { %v6156_v1 = vor.u32 %v8385_v61, %v6153_v0 }
 0x665   :  { %1226 = vmatpush.bf16.msrb.mxu1 %v8349_v8  ;;  %v6127_v8 = vld [vmem:[%s11135_s6 + $0xa0] sm:$0xf] }
 0x666   :  { %1268 = vmatpush.bf16.msra.mxu0 %v8373_v9  ;;  %1254 = vmatpush.bf16.msrb.mxu3 %v8365_v11  ;;  %v8382_v9 = vld [vmem:[%s11135_s6 + $0xac] sm:$0xf0] }
 0x667   :  { %1239 = vmatpush.bf16.msrb.mxu2 %v8358_v4  ;;  %v6167_v4 = vld [vmem:[%s11135_s6 + $0xe8] sm:$0xf]  ;;  %v6128_v11 = vor.u32 %v8382_v9, %v6127_v8 }
 0x669   :  { %1227 = vmatpush.bf16.msrb.mxu1 %v8348_v14  ;;  %v6145_v14 = vld [vmem:[%s11135_s6 + $0xd0] sm:$0xf0] }
 0x66a   :  { %1269 = vmatpush.bf16.msra.mxu0 %v8372_v15  ;;  %1255 = vmatpush.bf16.msrb.mxu3 %v8364_v24  ;;  %v8376_v24 = vld [vmem:[%s11135_s6 + $0x84] sm:$0xf] }
 0x66b   :  { %1240 = vmatpush.bf16.msrb.mxu2 %v8357_v10  ;;  %v8381_v10 = vld [vmem:[%s11135_s6 + $0xac] sm:$0xf] }
 0x66d   :  { %1228 = vmatpush.bf16.msrb.mxu1 %v8347_v38 }
 0x671   :  { %1229 = vmatpush.bf16.msrb.mxu1 %v8346_v37  ;;  %v6113_v37 = vld [vmem:[%s11135_s6 + $0x90] sm:$0xf0] }
 0x675   :  { %1230 = vmatpush.bf16.msrb.mxu1 %v8345_v42  ;;  %v8379_v42 = vld [vmem:[%s11135_s6 + $0x94] sm:$0xf0] }
 0x6cc   :  { %v754_v36 = vpop.xlane.xlu1 %753 }
 0x6cd   :  { %v758_v41 = vmul.f32 %v754_v36, %v9104_v22 }
 0x6cf   :  { %v760_v46 = vadd.f32 1e-05, %v758_v41  ;;  %v8363_v41 = vld [vmem:[%s11137_s8 + $0x98] sm:$0xff] }
 0x6d0   :  { %1256 = vmatpush.bf16.msrb.mxu3 %v8363_v41  ;;  %v6116_v41 = vor.u32 %v8376_v24, %v6113_v37  ;;  %v8392_v24 = vld [vmem:[%s11137_s8 + $0x100] sm:$0xff]  ;;  %v8403_v37 = vld [vmem:[%s11137_s8 + $0x158] sm:$0xff] }
 0x6d1   :  { %8780 = vrsqrt.f32 %v760_v46  ;;  %vm768_vm7 = vweird.f32 %v760_v46 }
 0x6d4   :  { %v757_v57 = vpop.xlane.xlu2 %756  ;;  %1257 = vmatpush.bf16.msrb.mxu3 %v8362_v45 }
 0x6d5   :  { %v759_v60 = vmul.f32 %v757_v57, %v9104_v22  ;;  %v8352_v57 = vld [vmem:[%s11137_s8 + $0x40] sm:$0xff] }
 0x6d7   :  { %v8781_v2 = vpop.eup %8780  ;;  %v761_v3 = vadd.f32 1e-05, %v759_v60  ;;  %v8386_v60 = vld [vmem:[%s11135_s6 + $0xcc] sm:$0xf0] }
 0x6d8   :  { %v763_v6 = vmul.f32 %v8781_v2, %v760_v46  ;;  %vm769_vm6 = vweird.f32 %v8781_v2  ;;  %v8344_v46 = vld [vmem:[%s11137_s8] sm:$0xff]  ;;  %1258 = vmatpush.bf16.msrb.mxu3 %v8361_v49  ;;  %v6144_v62 = vor.u32 %v8386_v60, %v6143_v23 }
 0x6d9   :  { %8782 = vrsqrt.f32 %v761_v3  ;;  %vm770_vm8 = vmor %vm768_vm7, %vm769_vm6  ;;  %vm778_vm10 = vweird.f32 %v761_v3  ;;  %1231 = vmatpush.bf16.msrb.mxu1 %v8344_v46 }
 0x6da   :  { %v764_v7 = vmul.f32 %v8781_v2, %v763_v6  ;;  %v8391_v6 = vld [vmem:[%s11135_s6 + $0xf4] sm:$0xf0] }
 0x6dc   :  { %v765_v12 = vmul.f32 0.5, %v764_v7  ;;  %1259 = vmatpush.bf16.msrb.mxu3 %v8360_v58  ;;  %v6168_v7 = vor.u32 %v8391_v6, %v6167_v4 }
 0x6de   :  { %v766_v13 = vsub.f32 1.5, %v765_v12  ;;  %v6137_v12 = vld [vmem:[%s11135_s6 + $0xb8] sm:$0xf0] }
 0x6df   :  { %v8783_v16 = vpop.eup %8782  ;;  %v6140_v15 = vor.u32 %v8381_v10, %v6137_v12  ;;  %v8399_v12 = vld [vmem:[%s11137_s8 + $0x138] sm:$0xff] }
 0x6e0   :  { %v767_v17 = vmul.f32 %v8781_v2, %v766_v13  ;;  %v773_v18 = vmul.f32 %v8783_v16, %v761_v3  ;;  %vm779_vm9 = vweird.f32 %v8783_v16  ;;  %v6161_v3 = vld [vmem:[%s11135_s6 + $0xf0] sm:$0xf0]  ;;  %v8384_v13 = vld [vmem:[%s11135_s6 + $0xc4] sm:$0xf] }
 0x6e1   :  { %vm780_vm11 = vmor %vm778_vm10, %vm779_vm9 }
 0x6e2   :  { %v774_v19 = vmul.f32 %v8783_v16, %v773_v18  ;;  %v771_v20 = vsel %vm770_vm8, %v8781_v2, %v767_v17  ;;  %v8388_v2 = vld [vmem:[%s11135_s6 + $0xe4] sm:$0xf]  ;;  %v6151_v17 = vld [vmem:[%s11135_s6 + $0xc8] sm:$0xf]  ;;  %v8387_v18 = vld [vmem:[%s11135_s6 + $0xd4] sm:$0xf0] }
 0x6e3   :  { %v782_v27 = vmul.f32 %v771_v20, %v9107_v59  ;;  %v8371_v59 = vld [vmem:[%s11137_s8 + $0xd8] sm:$0xff]  ;;  %v6164_v5 = vor.u32 %v8388_v2, %v6161_v3  ;;  %v6152_v20 = vor.u32 %v8387_v18, %v6151_v17  ;;  %v8421_v17 = vld [vmem:[%s11137_s8 + $0x1e8] sm:$0xff]  ;;  %v8396_v18 = vld [vmem:[%s11137_s8 + $0x120] sm:$0xff] }
 0x6e4   :  { %v775_v21 = vmul.f32 0.5, %v774_v19  ;;  %1270 = vmatpush.bf16.msra.mxu0 %v8371_v59  ;;  %v6111_v19 = vld [vmem:[%s11135_s6 + $0x80] sm:$0xf] }
 0x6e5   :  { %v785_v31 = vmul.f32 %v784_v26, %v782_v27  ;;  %v807_v59 = vld [vmem:[%s11136_s7] sm:$0xf] }
 0x6e6   :  { %v776_v25 = vsub.f32 1.5, %v775_v21  ;;  %v8378_v21 = vld [vmem:[%s11135_s6 + $0x8c] sm:$0xf0]  ;;  %v812_v45 = vperm.slane %v807_v59, 3  ;;  %v810_v51 = vperm.slane %v807_v59, 1  ;;  %v811_v54 = vperm.slane %v807_v59, 2 }
 0x6e7   :  { %v9262_v34 = vadd.f32 %v787_v30, %v785_v31  ;;  %v6112_v27 = vor.u32 %v8378_v21, %v6111_v19  ;;  %v6135_v31 = vld [vmem:[%s11135_s6 + $0xa8] sm:$0xf]  ;;  %v8407_v19 = vld [vmem:[%s11137_s8 + $0x178] sm:$0xff]  ;;  %v8420_v21 = vld [vmem:[%s11137_s8 + $0x1e0] sm:$0xff] }
 0x6e8   :  { %v777_v28 = vmul.f32 %v8783_v16, %v776_v25  ;;  %1271 = vmatpush.bf16.msra.mxu0 %v8370_v39  ;;  %v8377_v25 = vld [vmem:[%s11135_s6 + $0x8c] sm:$0xf]  ;;  %v6119_v39 = vld [vmem:[%s11135_s6 + $0x88] sm:$0xf] }
 0x6ea   :  { %v781_v29 = vsel %vm780_vm11, %v8783_v16, %v777_v28  ;;  %v6148_v16 = vor.u32 %v8384_v13, %v6145_v14  ;;  %v8423_v13 = vld [vmem:[%s11137_s8 + $0x1f8] sm:$0xff]  ;;  %v8398_v14 = vld [vmem:[%s11137_s8 + $0x130] sm:$0xff] }
 0x6eb   :  { %v783_v32 = vmul.f32 %v781_v29, %v9113_v63  ;;  %v8356_v63 = vld [vmem:[%s11137_s8 + $0x60] sm:$0xff] }
 0x6ec   :  { %1241 = vmatpush.bf16.msrb.mxu2 %v8356_v63  ;;  %1272 = vmatpush.bf16.msra.mxu0 %v8369_v43  ;;  %v8380_v29 = vld [vmem:[%s11135_s6 + $0xa4] sm:$0xf]  ;;  %v6120_v43 = vor.u32 %v8379_v42, %v6119_v39  ;;  %v8411_v39 = vld [vmem:[%s11137_s8 + $0x198] sm:$0xff]  ;;  %v8438_v42 = vld [vmem:[%s11135_s6 + $0x16c] sm:$0xf0] }
 0x6ed   :  { %v786_v33 = vmul.f32 %v784_v26, %v783_v32  ;;  %v6121_v26 = vld [vmem:[%s11135_s6 + $0x98] sm:$0xf0] }
 0x6ee   :  { %v6124_v28 = vor.u32 %v8377_v25, %v6121_v26  ;;  %v8395_v25 = vld [vmem:[%s11137_s8 + $0x118] sm:$0xff]  ;;  %v8406_v26 = vld [vmem:[%s11137_s8 + $0x170] sm:$0xff] }
 0x6ef   :  { %v9264_v35 = vadd.f32 %v787_v30, %v786_v33  ;;  %v6129_v30 = vld [vmem:[%s11135_s6 + $0xb0] sm:$0xf0]  ;;  %v8383_v33 = vld [vmem:[%s11135_s6 + $0xb4] sm:$0xf0] }
 0x6f0   :  { %1242 = vmatpush.bf16.msrb.mxu2 %v8355_v40  ;;  %1273 = vmatpush.bf16.msra.mxu0 %v8368_v47  ;;  %v6132_v32 = vor.u32 %v8380_v29, %v6129_v30  ;;  %v6136_v38 = vor.u32 %v8383_v33, %v6135_v31  ;;  %v8394_v29 = vld [vmem:[%s11137_s8 + $0x110] sm:$0xff]  ;;  %v8405_v30 = vld [vmem:[%s11137_s8 + $0x168] sm:$0xff] }
 0x6f1   :  { %v9268_v36 = vpack.c.bf16 %v9264_v35, %v9262_v34  ;;  %v8413_v31 = vld [vmem:[%s11137_s8 + $0x1a8] sm:$0xff] }
 0x6f2   :  { %v8393_v33 = vld [vmem:[%s11137_s8 + $0x108] sm:$0xff] }
 0x6f3   :  { %5960 = vmatmul.msk.bf16.vlgmr.msra.gmra.mxu1 %vm98_vm0, %v9268_v36  ;;  %5961 = vmatmul.msk.bf16.vlgmr.msra.gmra.mxu2 %vm98_vm0, %v9268_v36 }
 0x6f4   :  { %5962 = vmatmul.msk.bf16.vlgmr.msra.gmra.mxu3 %vm98_vm0, %v9268_v36  ;;  %5963 = vmatmul.msk.bf16.vlgmr.msrb.gmra.mxu0 %vm98_vm0, %v9268_v36 }
 0x6f5   :  { %1243 = vmatpush.bf16.msrb.mxu2 %v8354_v44  ;;  %1395 = vmatpush.bf16.msra.mxu1 %v6160_v53  ;;  %v809_v44 = vperm.slane %v807_v59, 0  ;;  %v8412_v59 = vld [vmem:[%s11137_s8 + $0x1a0] sm:$0xff] }
 0x6f6   :  { %1437 = vmatpush.bf16.msrb.mxu0 %v6172_v56  ;;  %1423 = vmatpush.bf16.msra.mxu3 %v6168_v7 }
 0x6f9   :  { %1244 = vmatpush.bf16.msrb.mxu2 %v8353_v48  ;;  %1396 = vmatpush.bf16.msra.mxu1 %v6144_v62 }
 0x6fa   :  { %1438 = vmatpush.bf16.msrb.mxu0 %v6156_v1  ;;  %1424 = vmatpush.bf16.msra.mxu3 %v6152_v20  ;;  %v8415_v20 = vld [vmem:[%s11137_s8 + $0x1b8] sm:$0xff] }
 0x6fd   :  { %1245 = vmatpush.bf16.msrb.mxu2 %v8352_v57  ;;  %1397 = vmatpush.bf16.msra.mxu1 %v6128_v11 }
 0x6fe   :  { %1439 = vmatpush.bf16.msrb.mxu0 %v6140_v15  ;;  %1425 = vmatpush.bf16.msra.mxu3 %v6136_v38  ;;  %v8422_v15 = vld [vmem:[%s11137_s8 + $0x1f0] sm:$0xff]  ;;  %v8404_v38 = vld [vmem:[%s11137_s8 + $0x160] sm:$0xff] }
 0x701   :  { %1409 = vmatpush.bf16.msra.mxu2 %v6164_v5  ;;  %1398 = vmatpush.bf16.msra.mxu1 %v6112_v27  ;;  %v8414_v27 = vld [vmem:[%s11137_s8 + $0x1b0] sm:$0xff] }
 0x702   :  { %1440 = vmatpush.bf16.msrb.mxu0 %v6124_v28  ;;  %1426 = vmatpush.bf16.msra.mxu3 %v6120_v43  ;;  %v8419_v28 = vld [vmem:[%s11137_s8 + $0x1d8] sm:$0xff]  ;;  %v8437_v43 = vld [vmem:[%s11135_s6 + $0x16c] sm:$0xf] }
 0x705   :  { %1410 = vmatpush.bf16.msra.mxu2 %v6148_v16  ;;  %v8397_v16 = vld [vmem:[%s11137_s8 + $0x128] sm:$0xff] }
 0x709   :  { %1411 = vmatpush.bf16.msra.mxu2 %v6132_v32  ;;  %v8418_v32 = vld [vmem:[%s11137_s8 + $0x1d0] sm:$0xff] }
 0x70d   :  { %1412 = vmatpush.bf16.msra.mxu2 %v6116_v41  ;;  %v6436_v41 = vld [vmem:[%s11135_s6 + $0x160] sm:$0xf] }
 0x770   :  { %v909_v63 = vpop.f32.mrf.mxu1 }
 0x771   :  { %v951_v40 = vpop.f32.mrf.mxu0  ;;  %v910_v47 = vadd.f32 %v909_v63, %v809_v44  ;;  %v8417_v63 = vld [vmem:[%s11137_s8 + $0x1c8] sm:$0xff] }
 0x772   :  { %v952_v49 = vadd.f32 %v951_v40, %v812_v45  ;;  %v8416_v40 = vld [vmem:[%s11137_s8 + $0x1c0] sm:$0xff] }
 0x773   :  { %v956_v57 = vmax.f32 %v910_v47, 0.0  ;;  %v6446_v47 = vld [vmem:[%s11135_s6 + $0x178] sm:$0xf0] }
 0x774   :  { %v959_v23 = vmax.f32 %v952_v49, 0.0  ;;  %v6449_v49 = vor.u32 %v8437_v43, %v6446_v47  ;;  %v8424_v43 = vld [vmem:[%s11135_s6 + $0x104] sm:$0xf] }
 0x776   :  { %v923_v46 = vpop.f32.mrf.mxu2 }
 0x777   :  { %v937_v48 = vpop.f32.mrf.mxu3  ;;  %v924_v61 = vadd.f32 %v923_v46, %v810_v51  ;;  %v6437_v46 = vor.u32 %v8438_v42, %v6436_v41 }
 0x778   :  { %v911_v50 = vpop.f32.mrf.mxu1  ;;  %v938_v0 = vadd.f32 %v937_v48, %v811_v54 }
 0x779   :  { %v912_v52 = vadd.f32 %v911_v50, %v809_v44  ;;  %v953_v53 = vpop.f32.mrf.mxu0  ;;  %v957_v6 = vmax.f32 %v924_v61, 0.0  ;;  %v8402_v44 = vld [vmem:[%s11137_s8 + $0x150] sm:$0xff] }
 0x77a   :  { %v954_v56 = vadd.f32 %v953_v53, %v812_v45  ;;  %v958_v8 = vmax.f32 %v938_v0, 0.0  ;;  %v8410_v45 = vld [vmem:[%s11137_s8 + $0x190] sm:$0xff]  ;;  %v8433_v53 = vld [vmem:[%s11135_s6 + $0x14c] sm:$0xf]  ;;  %v8400_v0 = vld [vmem:[%s11137_s8 + $0x140] sm:$0xff] }
 0x77b   :  { %v960_v58 = vmax.f32 %v912_v52, 0.0  ;;  %v8434_v52 = vld [vmem:[%s11135_s6 + $0x14c] sm:$0xf0] }
 0x77c   :  { %v963_v60 = vmax.f32 %v954_v56, 0.0  ;;  %v8409_v56 = vld [vmem:[%s11137_s8 + $0x188] sm:$0xff]  ;;  %v8430_v61 = vld [vmem:[%s11135_s6 + $0x12c] sm:$0xf0] }
 0x77d   :  { %v964_v62 = vpack.c.bf16 %v960_v58, %v956_v57  ;;  %v6430_v58 = vld [vmem:[%s11135_s6 + $0x158] sm:$0xf0] }
 0x77e   :  { %v967_v1 = vpack.c.bf16 %v963_v60, %v959_v23  ;;  %v925_v2 = vpop.f32.mrf.mxu2  ;;  %v6433_v23 = vor.u32 %v8433_v53, %v6430_v58  ;;  %v6404_v60 = vld [vmem:[%s11135_s6 + $0x120] sm:$0xf] }
 0x77f   :  { %v926_v3 = vadd.f32 %v925_v2, %v810_v51  ;;  %v939_v4 = vpop.f32.mrf.mxu3  ;;  %1232 = vmatmul.bf16.vlgmr.msrb.gmra.mxu1 %v964_v62  ;;  %v6420_v51 = vld [vmem:[%s11135_s6 + $0x140] sm:$0xf]  ;;  %v8429_v62 = vld [vmem:[%s11135_s6 + $0x12c] sm:$0xf]  ;;  %v6405_v2 = vor.u32 %v8430_v61, %v6404_v60 }
 0x780   :  { %v940_v5 = vadd.f32 %v939_v4, %v811_v54  ;;  %1274 = vmatmul.bf16.vlgmr.msra.gmra.mxu0 %v967_v1  ;;  %1716 = vmatpush.bf16.msrb.mxu1 %v8399_v12  ;;  %v8401_v54 = vld [vmem:[%s11137_s8 + $0x148] sm:$0xff]  ;;  %v6421_v57 = vor.u32 %v8434_v52, %v6420_v51  ;;  %v8408_v1 = vld [vmem:[%s11137_s8 + $0x180] sm:$0xff] }
 0x781   :  { %v961_v7 = vmax.f32 %v926_v3, 0.0  ;;  %1758 = vmatpush.bf16.msra.mxu0 %v8423_v13  ;;  %v6414_v3 = vld [vmem:[%s11135_s6 + $0x138] sm:$0xf0]  ;;  %v6444_v12 = vld [vmem:[%s11135_s6 + $0x168] sm:$0xf] }
 0x782   :  { %v962_v9 = vmax.f32 %v940_v5, 0.0  ;;  %v6417_v5 = vor.u32 %v8429_v62, %v6414_v3  ;;  %v8439_v13 = vld [vmem:[%s11135_s6 + $0x174] sm:$0xf0] }
 0x783   :  { %v965_v10 = vpack.c.bf16 %v961_v7, %v957_v6  ;;  %v6388_v7 = vld [vmem:[%s11135_s6 + $0x100] sm:$0xf] }
 0x784   :  { %v966_v11 = vpack.c.bf16 %v962_v9, %v958_v8  ;;  %1717 = vmatpush.bf16.msrb.mxu1 %v8398_v14  ;;  %v8426_v8 = vld [vmem:[%s11135_s6 + $0x10c] sm:$0xf0]  ;;  %v8436_v9 = vld [vmem:[%s11135_s6 + $0x164] sm:$0xf] }
 0x785   :  { %1246 = vmatmul.bf16.vlgmr.msrb.gmra.mxu2 %v965_v10  ;;  %1759 = vmatpush.bf16.msra.mxu0 %v8422_v15  ;;  %v6389_v10 = vor.u32 %v8426_v8, %v6388_v7 }
 0x786   :  { %1260 = vmatmul.bf16.vlgmr.msrb.gmra.mxu3 %v966_v11  ;;  %1730 = vmatpush.bf16.msrb.mxu2 %v8407_v19  ;;  %v6438_v11 = vld [vmem:[%s11135_s6 + $0x170] sm:$0xf0] }
 0x787   :  { %1744 = vmatpush.bf16.msrb.mxu3 %v8415_v20  ;;  %v6441_v15 = vor.u32 %v8436_v9, %v6438_v11 }
 0x788   :  { %1718 = vmatpush.bf16.msrb.mxu1 %v8397_v16  ;;  %v6445_v16 = vor.u32 %v8439_v13, %v6444_v12 }
 0x789   :  { %1760 = vmatpush.bf16.msra.mxu0 %v8421_v17  ;;  %v8425_v17 = vld [vmem:[%s11135_s6 + $0x10c] sm:$0xf] }
 0x78a   :  { %1731 = vmatpush.bf16.msrb.mxu2 %v8406_v26  ;;  %v6422_v26 = vld [vmem:[%s11135_s6 + $0x150] sm:$0xf0] }
 0x78b   :  { %1745 = vmatpush.bf16.msrb.mxu3 %v8414_v27  ;;  %v6428_v27 = vld [vmem:[%s11135_s6 + $0x148] sm:$0xf] }
 0x78c   :  { %1719 = vmatpush.bf16.msrb.mxu1 %v8396_v18  ;;  %v6398_v18 = vld [vmem:[%s11135_s6 + $0x118] sm:$0xf0] }
 0x78d   :  { %1761 = vmatpush.bf16.msra.mxu0 %v8420_v21  ;;  %v6401_v21 = vor.u32 %v8425_v17, %v6398_v18 }
 0x78e   :  { %1732 = vmatpush.bf16.msrb.mxu2 %v8405_v30 }
 0x78f   :  { %6173 = vmatmul.msk.bf16.vlgmr.msra.gmra.mxu1 %vm98_vm0, %v9268_v36  ;;  %1746 = vmatpush.bf16.msrb.mxu3 %v8413_v31  ;;  %v8435_v31 = vld [vmem:[%s11135_s6 + $0x154] sm:$0xf0] }
 0x790   :  { %6176 = vmatmul.msk.bf16.vlgmr.msrb.gmra.mxu0 %vm98_vm0, %v9268_v36  ;;  %1720 = vmatpush.bf16.msrb.mxu1 %v8395_v25  ;;  %v8432_v25 = vld [vmem:[%s11135_s6 + $0x144] sm:$0xf] }
 0x791   :  { %1762 = vmatpush.bf16.msra.mxu0 %v8419_v28  ;;  %v6425_v30 = vor.u32 %v8432_v25, %v6422_v26  ;;  %v8446_v25 = vld [vmem:[%s11137_s8 + $0x230] sm:$0xff] }
 0x792   :  { %1733 = vmatpush.bf16.msrb.mxu2 %v8404_v38  ;;  %v8428_v38 = vld [vmem:[%s11135_s6 + $0x124] sm:$0xf]  ;;  %v8470_v26 = vld [vmem:[%s11137_s8 + $0x2f0] sm:$0xff] }
 0x793   :  { %1747 = vmatpush.bf16.msrb.mxu3 %v8412_v59  ;;  %v6406_v59 = vld [vmem:[%s11135_s6 + $0x130] sm:$0xf0] }
 0x794   :  { %1721 = vmatpush.bf16.msrb.mxu1 %v8394_v29  ;;  %v6108_v29 = vld [vmem:[%s11136_s7 + $0x4] sm:$0xf]  ;;  %v6409_v41 = vor.u32 %v8428_v38, %v6406_v59  ;;  %v8463_v38 = vld [vmem:[%s11137_s8 + $0x2b8] sm:$0xff]  ;;  %v8442_v59 = vld [vmem:[%s11137_s8 + $0x210] sm:$0xff] }
 0x795   :  { %6174 = vmatmul.msk.bf16.vlgmr.msra.gmra.mxu2 %vm98_vm0, %v9268_v36  ;;  %1763 = vmatpush.bf16.msra.mxu0 %v8418_v32  ;;  %v1306_v47 = vperm.slane %v6108_v29, 3  ;;  %v1305_v7 = vperm.slane %v6108_v29, 2 }
 0x796   :  { %6175 = vmatmul.msk.bf16.vlgmr.msra.gmra.mxu3 %vm98_vm0, %v9268_v36  ;;  %1734 = vmatpush.bf16.msrb.mxu2 %v8403_v37 }
 0x797   :  { %1748 = vmatpush.bf16.msrb.mxu3 %v8411_v39  ;;  %v8431_v39 = vld [vmem:[%s11135_s6 + $0x134] sm:$0xf0] }
 0x798   :  { %1722 = vmatpush.bf16.msrb.mxu1 %v8393_v33  ;;  %v6429_v33 = vor.u32 %v8435_v31, %v6428_v27  ;;  %v8445_v27 = vld [vmem:[%s11137_s8 + $0x228] sm:$0xff]  ;;  %v8443_v31 = vld [vmem:[%s11137_s8 + $0x218] sm:$0xff] }
 0x799   :  { %1764 = vmatpush.bf16.msra.mxu0 %v8417_v63  ;;  %v6412_v63 = vld [vmem:[%s11135_s6 + $0x128] sm:$0xf] }
 0x79a   :  { %1735 = vmatpush.bf16.msrb.mxu2 %v8402_v44  ;;  %v6413_v42 = vor.u32 %v8431_v39, %v6412_v63  ;;  %v6390_v44 = vld [vmem:[%s11135_s6 + $0x110] sm:$0xf0] }
 0x79b   :  { %1749 = vmatpush.bf16.msrb.mxu3 %v8410_v45  ;;  %v6396_v45 = vld [vmem:[%s11135_s6 + $0x108] sm:$0xf]  ;;  %v8466_v63 = vld [vmem:[%s11137_s8 + $0x2d0] sm:$0xff] }
 0x79c   :  { %1723 = vmatpush.bf16.msrb.mxu1 %v8392_v24  ;;  %v8462_v39 = vld [vmem:[%s11137_s8 + $0x2b0] sm:$0xff] }
 0x79d   :  { %1765 = vmatpush.bf16.msra.mxu0 %v8416_v40  ;;  %v1303_v40 = vperm.slane %v6108_v29, 0 }
 0x79e   :  { %1736 = vmatpush.bf16.msrb.mxu2 %v8401_v54 }
 0x79f   :  { %1750 = vmatpush.bf16.msrb.mxu3 %v8409_v56 }
 0x7a0   :  { %1886 = vmatpush.bf16.msra.mxu1 %v6437_v46  ;;  %v8427_v46 = vld [vmem:[%s11135_s6 + $0x114] sm:$0xf0] }
 0x7a1   :  { %1928 = vmatpush.bf16.msrb.mxu0 %v6449_v49  ;;  %v6397_v51 = vor.u32 %v8427_v46, %v6396_v45  ;;  %v8464_v45 = vld [vmem:[%s11137_s8 + $0x2c0] sm:$0xff] }
 0x7a2   :  { %1737 = vmatpush.bf16.msrb.mxu2 %v8400_v0  ;;  %v8452_v46 = vld [vmem:[%s11137_s8 + $0x260] sm:$0xff] }
 0x7a3   :  { %1751 = vmatpush.bf16.msrb.mxu3 %v8408_v1 }
 0x7a4   :  { %1887 = vmatpush.bf16.msra.mxu1 %v6421_v57 }
 0x7a5   :  { %1929 = vmatpush.bf16.msrb.mxu0 %v6433_v23 }
 0x7a6   :  { %1900 = vmatpush.bf16.msra.mxu2 %v6441_v15 }
 0x7a7   :  { %1914 = vmatpush.bf16.msra.mxu3 %v6445_v16 }
 0x7a8   :  { %1888 = vmatpush.bf16.msra.mxu1 %v6405_v2 }
 0x7a9   :  { %1930 = vmatpush.bf16.msrb.mxu0 %v6417_v5  ;;  %v1304_v5 = vperm.slane %v6108_v29, 1  ;;  %v8444_v29 = vld [vmem:[%s11137_s8 + $0x220] sm:$0xff] }
 0x7aa   :  { %1901 = vmatpush.bf16.msra.mxu2 %v6425_v30  ;;  %v8468_v30 = vld [vmem:[%s11137_s8 + $0x2e0] sm:$0xff] }
 0x7ab   :  { %1915 = vmatpush.bf16.msra.mxu3 %v6429_v33  ;;  %v8455_v33 = vld [vmem:[%s11137_s8 + $0x278] sm:$0xff] }
 0x7ac   :  { %1889 = vmatpush.bf16.msra.mxu1 %v6389_v10 }
 0x7ad   :  { %1931 = vmatpush.bf16.msrb.mxu0 %v6401_v21  ;;  %v8471_v21 = vld [vmem:[%s11137_s8 + $0x2f8] sm:$0xff] }
 0x7ae   :  { %1902 = vmatpush.bf16.msra.mxu2 %v6409_v41  ;;  %v8465_v41 = vld [vmem:[%s11137_s8 + $0x2c8] sm:$0xff] }
 0x7af   :  { %1916 = vmatpush.bf16.msra.mxu3 %v6413_v42  ;;  %v8453_v42 = vld [vmem:[%s11137_s8 + $0x268] sm:$0xff] }
 0x7b3   :  { %1917 = vmatpush.bf16.msra.mxu3 %v6397_v51  ;;  %v8486_v51 = vld [vmem:[%s11135_s6 + $0x1ec] sm:$0xf0] }
 0x7fc   :  { %v1233_v48 = vpop.f32.mrf.mxu1 }
 0x7fd   :  { %v1275_v50 = vpop.f32.mrf.mxu0 }
 0x804   :  { %v9571_v4 = vpop.f32.mrf.mxu1 }
 0x805   :  { %v9573_v6 = vpop.f32.mrf.mxu0 }
 0x808   :  { %v1247_v14 = vpop.f32.mrf.mxu2 }
 0x809   :  { %v1248_v19 = vadd.f32 %v1247_v14, %v1233_v48  ;;  %v1261_v20 = vpop.f32.mrf.mxu3 }
 0x80b   :  { %v1262_v28 = vadd.f32 %v1261_v20, %v1248_v19  ;;  %v8447_v20 = vld [vmem:[%s11137_s8 + $0x238] sm:$0xff] }
 0x80c   :  { %v1400_v32 = vpop.f32.mrf.mxu1 }
 0x80d   :  { %v9623_v24 = vadd.f32 %v1275_v50, %v1262_v28  ;;  %v1442_v37 = vpop.f32.mrf.mxu0  ;;  %v6393_v50 = vor.u32 %v8424_v43, %v6390_v44  ;;  %v1401_v52 = vadd.f32 %v1400_v32, %v1303_v40  ;;  %v8469_v28 = vld [vmem:[%s11137_s8 + $0x2e8] sm:$0xff]  ;;  %v8467_v32 = vld [vmem:[%s11137_s8 + $0x2d8] sm:$0xff]  ;;  %v8440_v44 = vld [vmem:[%s11137_s8 + $0x200] sm:$0xff] }
 0x80e   :  { %v1443_v53 = vadd.f32 %v1442_v37, %v1306_v47  ;;  %v8454_v37 = vld [vmem:[%s11137_s8 + $0x270] sm:$0xff]  ;;  %v8461_v43 = vld [vmem:[%s11137_s8 + $0x2a8] sm:$0xff] }
 0x80f   :  { %1903 = vmatpush.bf16.msra.mxu2 %v6393_v50  ;;  %v1447_v23 = vmax.f32 %v1401_v52, 0.0  ;;  %v6713_v50 = vld [vmem:[%s11135_s6 + $0x1e0] sm:$0xf]  ;;  %v8485_v52 = vld [vmem:[%s11135_s6 + $0x1ec] sm:$0xf] }
 0x810   :  { %v9640_v48 = vpop.f32.mrf.mxu2  ;;  %v1450_v61 = vmax.f32 %v1443_v53, 0.0  ;;  %v6714_v53 = vor.u32 %v8486_v51, %v6713_v50  ;;  %v8483_v51 = vld [vmem:[%s11135_s6 + $0x1d4] sm:$0xf0] }
 0x811   :  { %v9642_v49 = vpop.f32.mrf.mxu3 }
 0x814   :  { %v1402_v54 = vpop.f32.mrf.mxu1 }
 0x815   :  { %v1403_v56 = vadd.f32 %v1402_v54, %v1303_v40  ;;  %v1444_v57 = vpop.f32.mrf.mxu0  ;;  %v8441_v40 = vld [vmem:[%s11137_s8 + $0x208] sm:$0xff]  ;;  %v6723_v54 = vld [vmem:[%s11135_s6 + $0x1f8] sm:$0xf0] }
 0x816   :  { %v1445_v58 = vadd.f32 %v1444_v57, %v1306_v47  ;;  %v8460_v47 = vld [vmem:[%s11137_s8 + $0x2a0] sm:$0xff]  ;;  %v6726_v57 = vor.u32 %v8485_v52, %v6723_v54 }
 0x817   :  { %v1451_v60 = vmax.f32 %v1403_v56, 0.0  ;;  %v8476_v54 = vld [vmem:[%s11135_s6 + $0x1a4] sm:$0xf] }
 0x818   :  { %v1454_v62 = vmax.f32 %v1445_v58, 0.0  ;;  %v1414_v0 = vpop.f32.mrf.mxu2 }
 0x819   :  { %v1455_v1 = vpack.c.bf16 %v1451_v60, %v1447_v23  ;;  %v1428_v2 = vpop.f32.mrf.mxu3  ;;  %v1415_v8 = vadd.f32 %v1414_v0, %v1304_v5  ;;  %v8451_v23 = vld [vmem:[%s11137_s8 + $0x258] sm:$0xff] }
 0x81a   :  { %v1458_v3 = vpack.c.bf16 %v1454_v62, %v1450_v61  ;;  %v1429_v9 = vadd.f32 %v1428_v2, %v1305_v7  ;;  %v8459_v60 = vld [vmem:[%s11137_s8 + $0x298] sm:$0xff]  ;;  %v6697_v61 = vld [vmem:[%s11135_s6 + $0x1c0] sm:$0xf]  ;;  %v8482_v62 = vld [vmem:[%s11135_s6 + $0x1cc] sm:$0xf0] }
 0x81b   :  { %1724 = vmatmul.bf16.vlgmr.msrb.gmra.mxu1 %v1455_v1  ;;  %v1448_v14 = vmax.f32 %v1415_v8, 0.0  ;;  %v6698_v0 = vor.u32 %v8482_v62, %v6697_v61  ;;  %v8481_v1 = vld [vmem:[%s11135_s6 + $0x1cc] sm:$0xf]  ;;  %v6707_v2 = vld [vmem:[%s11135_s6 + $0x1d8] sm:$0xf0] }
 0x81c   :  { %1766 = vmatmul.bf16.vlgmr.msra.gmra.mxu0 %v1458_v3  ;;  %v1449_v16 = vmax.f32 %v1429_v9, 0.0  ;;  %2207 = vmatpush.bf16.msrb.mxu1 %v8447_v20  ;;  %v6710_v3 = vor.u32 %v8481_v1, %v6707_v2  ;;  %v6681_v8 = vld [vmem:[%s11135_s6 + $0x1a0] sm:$0xf]  ;;  %v8478_v9 = vld [vmem:[%s11135_s6 + $0x1ac] sm:$0xf0] }
 0x81d   :  { %2249 = vmatpush.bf16.msra.mxu0 %v8471_v21  ;;  %v8473_v20 = vld [vmem:[%s11135_s6 + $0x18c] sm:$0xf] }
 0x820   :  { %v1416_v10 = vpop.f32.mrf.mxu2  ;;  %2208 = vmatpush.bf16.msrb.mxu1 %v8446_v25  ;;  %v6675_v25 = vld [vmem:[%s11135_s6 + $0x198] sm:$0xf0] }
 0x821   :  { %v1417_v11 = vadd.f32 %v1416_v10, %v1304_v5  ;;  %v1430_v12 = vpop.f32.mrf.mxu3  ;;  %2250 = vmatpush.bf16.msra.mxu0 %v8470_v26  ;;  %v8450_v5 = vld [vmem:[%s11137_s8 + $0x250] sm:$0xff]  ;;  %v8477_v10 = vld [vmem:[%s11135_s6 + $0x1ac] sm:$0xf]  ;;  %v6678_v26 = vor.u32 %v8473_v20, %v6675_v25 }
 0x822   :  { %v1431_v13 = vadd.f32 %v1430_v12, %v1305_v7  ;;  %v8458_v7 = vld [vmem:[%s11137_s8 + $0x290] sm:$0xff]  ;;  %v6691_v12 = vld [vmem:[%s11135_s6 + $0x1b8] sm:$0xf0] }
 0x823   :  { %v1452_v15 = vmax.f32 %v1417_v11, 0.0  ;;  %v6682_v11 = vor.u32 %v8478_v9, %v6681_v8  ;;  %v6667_v8 = vld [vmem:[%s11135_s6 + $0x190] sm:$0xf0] }
 0x824   :  { %v1453_v17 = vmax.f32 %v1431_v13, 0.0  ;;  %2209 = vmatpush.bf16.msrb.mxu1 %v8445_v27  ;;  %v8448_v27 = vld [vmem:[%s11137_s8 + $0x240] sm:$0xff] }
 0x825   :  { %v1456_v18 = vpack.c.bf16 %v1452_v15, %v1448_v14  ;;  %2251 = vmatpush.bf16.msra.mxu0 %v8469_v28  ;;  %v6694_v14 = vor.u32 %v8477_v10, %v6691_v12  ;;  %v8456_v28 = vld [vmem:[%s11137_s8 + $0x280] sm:$0xff] }
 0x826   :  { %v1457_v19 = vpack.c.bf16 %v1453_v17, %v1449_v16  ;;  %v8449_v16 = vld [vmem:[%s11137_s8 + $0x248] sm:$0xff] }
 0x827   :  { %1738 = vmatmul.bf16.vlgmr.msrb.gmra.mxu2 %v1456_v18  ;;  %v8457_v17 = vld [vmem:[%s11137_s8 + $0x288] sm:$0xff]  ;;  %v6665_v18 = vld [vmem:[%s11135_s6 + $0x180] sm:$0xf] }
 0x828   :  { %1752 = vmatmul.bf16.vlgmr.msrb.gmra.mxu3 %v1457_v19  ;;  %2210 = vmatpush.bf16.msrb.mxu1 %v8444_v29  ;;  %v8474_v19 = vld [vmem:[%s11135_s6 + $0x18c] sm:$0xf0]  ;;  %v9807_v29 = vld [vmem:[%s11136_s7 + $0x8] sm:$0xf] }
 0x829   :  { %2252 = vmatpush.bf16.msra.mxu0 %v8468_v30  ;;  %2221 = vmatpush.bf16.msrb.mxu2 %v8455_v33  ;;  %v6666_v21 = vor.u32 %v8474_v19, %v6665_v18  ;;  %v6721_v33 = vld [vmem:[%s11135_s6 + $0x1e8] sm:$0xf]  ;;  %v1797_v52 = vperm.slane %v9807_v29, 3 }
 0x82a   :  { %2235 = vmatpush.bf16.msrb.mxu3 %v8463_v38 }
 0x82b   :  { %6450 = vmatmul.msk.bf16.vlgmr.msra.gmra.mxu1 %vm98_vm0, %v9268_v36 }
 0x82c   :  { %6453 = vmatmul.msk.bf16.vlgmr.msrb.gmra.mxu0 %vm98_vm0, %v9268_v36  ;;  %2211 = vmatpush.bf16.msrb.mxu1 %v8443_v31  ;;  %v8484_v31 = vld [vmem:[%s11135_s6 + $0x1e4] sm:$0xf] }
 0x82d   :  { %2253 = vmatpush.bf16.msra.mxu0 %v8467_v32  ;;  %2222 = vmatpush.bf16.msrb.mxu2 %v8454_v37  ;;  %v6715_v32 = vld [vmem:[%s11135_s6 + $0x1f0] sm:$0xf0] }
 0x82e   :  { %2236 = vmatpush.bf16.msrb.mxu3 %v8462_v39 }
 0x830   :  { %2212 = vmatpush.bf16.msrb.mxu1 %v8442_v59  ;;  %v6718_v59 = vor.u32 %v8484_v31, %v6715_v32  ;;  %v1795_v31 = vperm.slane %v9807_v29, 1  ;;  %v1796_v32 = vperm.slane %v9807_v29, 2 }
 0x831   :  { %2254 = vmatpush.bf16.msra.mxu0 %v8466_v63  ;;  %2223 = vmatpush.bf16.msrb.mxu2 %v8453_v42  ;;  %v8487_v63 = vld [vmem:[%s11135_s6 + $0x1f4] sm:$0xf0]  ;;  %v6705_v42 = vld [vmem:[%s11135_s6 + $0x1c8] sm:$0xf] }
 0x832   :  { %2237 = vmatpush.bf16.msrb.mxu3 %v8461_v43  ;;  %v6722_v39 = vor.u32 %v8487_v63, %v6721_v33  ;;  %v9833_v43 = vld [vmem:[%s11134_s5] sm:$0x3f] }
 0x834   :  { %2213 = vmatpush.bf16.msrb.mxu1 %v8441_v40  ;;  %v8480_v40 = vld [vmem:[%s11135_s6 + $0x1c4] sm:$0xf] }
 0x835   :  { %2255 = vmatpush.bf16.msra.mxu0 %v8465_v41  ;;  %2224 = vmatpush.bf16.msrb.mxu2 %v8452_v46  ;;  %v6699_v41 = vld [vmem:[%s11135_s6 + $0x1d0] sm:$0xf0] }
 0x836   :  { %2238 = vmatpush.bf16.msrb.mxu3 %v8460_v47  ;;  %v6702_v50 = vor.u32 %v8480_v40, %v6699_v41 }
 0x837   :  { %6451 = vmatmul.msk.bf16.vlgmr.msra.gmra.mxu2 %vm98_vm0, %v9268_v36 }
 0x838   :  { %6452 = vmatmul.msk.bf16.vlgmr.msra.gmra.mxu3 %vm98_vm0, %v9268_v36  ;;  %2214 = vmatpush.bf16.msrb.mxu1 %v8440_v44  ;;  %v1280_v44 = vperm.slane %v9833_v43, 3 }
 0x839   :  { %2256 = vmatpush.bf16.msra.mxu0 %v8464_v45  ;;  %2225 = vmatpush.bf16.msrb.mxu2 %v8451_v23  ;;  %v1794_v45 = vperm.slane %v9807_v29, 0  ;;  %v6689_v23 = vld [vmem:[%s11135_s6 + $0x1a8] sm:$0xf]  ;;  %v8495_v29 = vld [vmem:[%s11137_s8 + $0x338] sm:$0xff] }
 0x83a   :  { %2239 = vmatpush.bf16.msrb.mxu3 %v8459_v60  ;;  %v8479_v60 = vld [vmem:[%s11135_s6 + $0x1b4] sm:$0xf0]  ;;  %v1281_v61 = vadd.f32 %v1280_v44, %v9623_v24 }
 0x83c   :  { %2377 = vmatpush.bf16.msra.mxu1 %v6714_v53  ;;  %v6706_v53 = vor.u32 %v8483_v51, %v6705_v42  ;;  %v8494_v51 = vld [vmem:[%s11137_s8 + $0x330] sm:$0xff] }
 0x83d   :  { %2419 = vmatpush.bf16.msrb.mxu0 %v6726_v57  ;;  %2226 = vmatpush.bf16.msrb.mxu2 %v8450_v5  ;;  %v6683_v57 = vld [vmem:[%s11135_s6 + $0x1b0] sm:$0xf0]  ;;  %v6690_v5 = vor.u32 %v8479_v60, %v6689_v23  ;;  %v8515_v23 = vld [vmem:[%s11137_s8 + $0x3d8] sm:$0xff] }
 0x83e   :  { %2240 = vmatpush.bf16.msrb.mxu3 %v8458_v7  ;;  %v6686_v1 = vor.u32 %v8476_v54, %v6683_v57  ;;  %v8472_v7 = vld [vmem:[%s11135_s6 + $0x184] sm:$0xf]  ;;  %v8490_v60 = vld [vmem:[%s11137_s8 + $0x310] sm:$0xff] }
 0x83f   :  { %v6670_v19 = vor.u32 %v8472_v7, %v6667_v8  ;;  %v8492_v54 = vld [vmem:[%s11137_s8 + $0x320] sm:$0xff]  ;;  %v8510_v7 = vld [vmem:[%s11137_s8 + $0x3b0] sm:$0xff] }
 0x840   :  { %2378 = vmatpush.bf16.msra.mxu1 %v6698_v0  ;;  %v8516_v57 = vld [vmem:[%s11137_s8 + $0x3e0] sm:$0xff] }
 0x841   :  { %2420 = vmatpush.bf16.msrb.mxu0 %v6710_v3  ;;  %2227 = vmatpush.bf16.msrb.mxu2 %v8449_v16  ;;  %v8512_v8 = vld [vmem:[%s11137_s8 + $0x3c0] sm:$0xff] }
 0x842   :  { %2241 = vmatpush.bf16.msrb.mxu3 %v8457_v17 }
 0x844   :  { %2379 = vmatpush.bf16.msra.mxu1 %v6682_v11  ;;  %v8475_v11 = vld [vmem:[%s11135_s6 + $0x194] sm:$0xf0] }
 0x845   :  { %2421 = vmatpush.bf16.msrb.mxu0 %v6694_v14  ;;  %2228 = vmatpush.bf16.msrb.mxu2 %v8448_v27 }
 0x846   :  { %2242 = vmatpush.bf16.msrb.mxu3 %v8456_v28 }
 0x848   :  { %2380 = vmatpush.bf16.msra.mxu1 %v6666_v21 }
 0x849   :  { %2422 = vmatpush.bf16.msrb.mxu0 %v6678_v26  ;;  %2391 = vmatpush.bf16.msra.mxu2 %v6718_v59 }
 0x84a   :  { %2405 = vmatpush.bf16.msra.mxu3 %v6722_v39 }
 0x84d   :  { %2392 = vmatpush.bf16.msra.mxu2 %v6702_v50  ;;  %v8519_v50 = vld [vmem:[%s11137_s8 + $0x3f8] sm:$0xff] }
 0x84e   :  { %2406 = vmatpush.bf16.msra.mxu3 %v6706_v53  ;;  %v8517_v53 = vld [vmem:[%s11137_s8 + $0x3e8] sm:$0xff] }
 0x851   :  { %2393 = vmatpush.bf16.msra.mxu2 %v6686_v1  ;;  %v8511_v1 = vld [vmem:[%s11137_s8 + $0x3b8] sm:$0xff] }
 0x852   :  { %2407 = vmatpush.bf16.msra.mxu3 %v6690_v5  ;;  %v8502_v5 = vld [vmem:[%s11137_s8 + $0x370] sm:$0xff] }
 0x855   :  { %2394 = vmatpush.bf16.msra.mxu2 %v6670_v19  ;;  %v8507_v19 = vld [vmem:[%s11137_s8 + $0x398] sm:$0xff] }
 0x898   :  { %v9736_v56 = vpop.f32.mrf.mxu1 }
 0x899   :  { %v9738_v58 = vpop.f32.mrf.mxu0 }
 0x8a0   :  { %v9776_v13 = vpop.f32.mrf.mxu1 }
 0x8a1   :  { %v9778_v15 = vpop.f32.mrf.mxu0 }
 0x8a8   :  { %v1891_v30 = vpop.f32.mrf.mxu1 }
 0x8a9   :  { %v1933_v38 = vpop.f32.mrf.mxu0  ;;  %v1892_v62 = vadd.f32 %v1891_v30, %v1794_v45 }
 0x8aa   :  { %v1739_v37 = vpop.f32.mrf.mxu2  ;;  %v1934_v2 = vadd.f32 %v1933_v38, %v1797_v52 }
 0x8ab   :  { %v1740_v46 = vadd.f32 %v1739_v37, %v9736_v56  ;;  %v1753_v47 = vpop.f32.mrf.mxu3  ;;  %v1938_v16 = vmax.f32 %v1892_v62, 0.0  ;;  %v8489_v62 = vld [vmem:[%s11137_s8 + $0x308] sm:$0xff] }
 0x8ac   :  { %v1941_v20 = vmax.f32 %v1934_v2, 0.0  ;;  %v8513_v2 = vld [vmem:[%s11137_s8 + $0x3c8] sm:$0xff] }
 0x8ad   :  { %v1754_v56 = vadd.f32 %v1753_v47, %v1740_v46 }
 0x8af   :  { %v1768_v0 = vadd.f32 %v9738_v58, %v1754_v56  ;;  %v6673_v58 = vld [vmem:[%s11135_s6 + $0x188] sm:$0xf]  ;;  %v8491_v56 = vld [vmem:[%s11137_s8 + $0x318] sm:$0xff] }
 0x8b0   :  { %v1893_v3 = vpop.f32.mrf.mxu1  ;;  %v6674_v25 = vor.u32 %v8475_v11, %v6673_v58 }
 0x8b1   :  { %v9864_v9 = vadd.f32 %v1768_v0, %v1281_v61  ;;  %v1894_v24 = vadd.f32 %v1893_v3, %v1794_v45  ;;  %v1935_v10 = vpop.f32.mrf.mxu0  ;;  %v8514_v61 = vld [vmem:[%s11137_s8 + $0x3d0] sm:$0xff]  ;;  %v8503_v0 = vld [vmem:[%s11137_s8 + $0x378] sm:$0xff]  ;;  %v8488_v3 = vld [vmem:[%s11137_s8 + $0x300] sm:$0xff] }
 0x8b2   :  { %v1936_v12 = vadd.f32 %v1935_v10, %v1797_v52  ;;  %v9872_v14 = vpop.f32.mrf.mxu2  ;;  %2408 = vmatpush.bf16.msra.mxu3 %v6674_v25  ;;  %v8518_v52 = vld [vmem:[%s11137_s8 + $0x3f0] sm:$0xff]  ;;  %v8509_v10 = vld [vmem:[%s11137_s8 + $0x3a8] sm:$0xff] }
 0x8b3   :  { %v1942_v17 = vmax.f32 %v1894_v24, 0.0  ;;  %v9874_v18 = vpop.f32.mrf.mxu3  ;;  %v8501_v24 = vld [vmem:[%s11137_s8 + $0x368] sm:$0xff]  ;;  %v8498_v25 = vld [vmem:[%s11137_s8 + $0x350] sm:$0xff] }
 0x8b4   :  { %v1945_v21 = vmax.f32 %v1936_v12, 0.0  ;;  %v8500_v12 = vld [vmem:[%s11137_s8 + $0x360] sm:$0xff] }
 0x8b5   :  { %v1946_v26 = vpack.c.bf16 %v1942_v17, %v1938_v16  ;;  %v8508_v16 = vld [vmem:[%s11137_s8 + $0x3a0] sm:$0xff]  ;;  %v8499_v17 = vld [vmem:[%s11137_s8 + $0x358] sm:$0xff] }
 0x8b6   :  { %v1949_v27 = vpack.c.bf16 %v1945_v21, %v1941_v20 }
 0x8b7   :  { %2215 = vmatmul.bf16.vlgmr.msrb.gmra.mxu1 %v1946_v26  ;;  %v8506_v26 = vld [vmem:[%s11137_s8 + $0x390] sm:$0xff] }
 0x8b8   :  { %2257 = vmatmul.bf16.vlgmr.msra.gmra.mxu0 %v1949_v27  ;;  %2698 = vmatpush.bf16.msrb.mxu1 %v8495_v29  ;;  %v8497_v27 = vld [vmem:[%s11137_s8 + $0x348] sm:$0xff] }
 0x8b9   :  { %2740 = vmatpush.bf16.msra.mxu0 %v8519_v50 }
 0x8ba   :  { %v1905_v28 = vpop.f32.mrf.mxu2 }
 0x8bb   :  { %v1919_v30 = vpop.f32.mrf.mxu3  ;;  %v1906_v33 = vadd.f32 %v1905_v28, %v1795_v31  ;;  %v8505_v28 = vld [vmem:[%s11137_s8 + $0x388] sm:$0xff] }
 0x8bc   :  { %v1920_v38 = vadd.f32 %v1919_v30, %v1796_v32  ;;  %2699 = vmatpush.bf16.msrb.mxu1 %v8494_v51  ;;  %v6662_v30 = vld [vmem:[%s11136_s7 + $0xc] sm:$0xf] }
 0x8bd   :  { %v1939_v40 = vmax.f32 %v1906_v33, 0.0  ;;  %2741 = vmatpush.bf16.msra.mxu0 %v8518_v52  ;;  %v2285_v33 = vperm.slane %v6662_v30, 0 }
 0x8be   :  { %v1940_v42 = vmax.f32 %v1920_v38, 0.0  ;;  %v8496_v38 = vld [vmem:[%s11137_s8 + $0x340] sm:$0xff] }
 0x8c1   :  { %2742 = vmatpush.bf16.msra.mxu0 %v8517_v53 }
 0x8c2   :  { %v1907_v59 = vpop.f32.mrf.mxu2 }
 0x8c3   :  { %v1908_v63 = vadd.f32 %v1907_v59, %v1795_v31  ;;  %v1921_v37 = vpop.f32.mrf.mxu3  ;;  %v8504_v59 = vld [vmem:[%s11137_s8 + $0x380] sm:$0xff] }
 0x8c4   :  { %v1922_v39 = vadd.f32 %v1921_v37, %v1796_v32 }
 0x8c5   :  { %v1943_v41 = vmax.f32 %v1908_v63, 0.0  ;;  %2743 = vmatpush.bf16.msra.mxu0 %v8516_v57  ;;  %v2288_v63 = vperm.slane %v6662_v30, 3 }
 0x8c6   :  { %v1944_v45 = vmax.f32 %v1922_v39, 0.0 }
 0x8c7   :  { %v1947_v46 = vpack.c.bf16 %v1943_v41, %v1939_v40  ;;  %6727 = vmatmul.msk.bf16.vlgmr.msra.gmra.mxu1 %vm98_vm0, %v9268_v36 }
 0x8c8   :  { %v1948_v47 = vpack.c.bf16 %v1944_v45, %v1940_v42  ;;  %6730 = vmatmul.msk.bf16.vlgmr.msrb.gmra.mxu0 %vm98_vm0, %v9268_v36 }
 0x8c9   :  { %2229 = vmatmul.bf16.vlgmr.msrb.gmra.mxu2 %v1947_v46  ;;  %2744 = vmatpush.bf16.msra.mxu0 %v8515_v23 }
 0x8ca   :  { %2243 = vmatmul.bf16.vlgmr.msrb.gmra.mxu3 %v1948_v47  ;;  %2712 = vmatpush.bf16.msrb.mxu2 %v8503_v0 }
 0x8cb   :  { %2726 = vmatpush.bf16.msrb.mxu3 %v8511_v1  ;;  %v2286_v1 = vperm.slane %v6662_v30, 1 }
 0x8cd   :  { %2745 = vmatpush.bf16.msra.mxu0 %v8514_v61 }
 0x8ce   :  { %2713 = vmatpush.bf16.msrb.mxu2 %v8502_v5 }
 0x8cf   :  { %2727 = vmatpush.bf16.msrb.mxu3 %v8510_v7 }
 0x8d1   :  { %2746 = vmatpush.bf16.msra.mxu0 %v8513_v2  ;;  %v2287_v2 = vperm.slane %v6662_v30, 2 }
 0x8d2   :  { %2714 = vmatpush.bf16.msrb.mxu2 %v8501_v24 }
 0x8d3   :  { %2728 = vmatpush.bf16.msrb.mxu3 %v8509_v10 }
 0x8d5   :  { %2747 = vmatpush.bf16.msra.mxu0 %v8512_v8 }
 0x8d6   :  { %2715 = vmatpush.bf16.msrb.mxu2 %v8500_v12 }
 0x8d7   :  { %2729 = vmatpush.bf16.msrb.mxu3 %v8508_v16 }
 0x8d9   :  { %6728 = vmatmul.msk.bf16.vlgmr.msra.gmra.mxu2 %vm98_vm0, %v9268_v36 }
 0x8da   :  { %6729 = vmatmul.msk.bf16.vlgmr.msra.gmra.mxu3 %vm98_vm0, %v9268_v36  ;;  %v8493_v36 = vld [vmem:[%s11137_s8 + $0x328] sm:$0xff]  ;;  %2716 = vmatpush.bf16.msrb.mxu2 %v8499_v17 }
 0x8db   :  { %2700 = vmatpush.bf16.msrb.mxu1 %v8493_v36  ;;  %2730 = vmatpush.bf16.msrb.mxu3 %v8507_v19  ;;  %v1250_v19 = vadd.f32 %v9640_v48, %v9571_v4 }
 0x8de   :  { %2717 = vmatpush.bf16.msrb.mxu2 %v8498_v25 }
 0x8df   :  { %2701 = vmatpush.bf16.msrb.mxu1 %v8492_v54  ;;  %2731 = vmatpush.bf16.msrb.mxu3 %v8506_v26  ;;  %v1742_v26 = vadd.f32 %v9872_v14, %v9776_v13 }
 0x8e2   :  { %2718 = vmatpush.bf16.msrb.mxu2 %v8497_v27 }
 0x8e3   :  { %2702 = vmatpush.bf16.msrb.mxu1 %v8491_v56  ;;  %2732 = vmatpush.bf16.msrb.mxu3 %v8505_v28  ;;  %v1264_v28 = vadd.f32 %v9642_v49, %v1250_v19 }
 0x8e6   :  { %2719 = vmatpush.bf16.msrb.mxu2 %v8496_v38  ;;  %v1756_v38 = vadd.f32 %v9874_v18, %v1742_v26 }
 0x8e7   :  { %2703 = vmatpush.bf16.msrb.mxu1 %v8490_v60  ;;  %2733 = vmatpush.bf16.msrb.mxu3 %v8504_v59 }
 0x8e8   :  { %v1770_v4 = vadd.f32 %v9778_v15, %v1756_v38 }
 0x8eb   :  { %2704 = vmatpush.bf16.msrb.mxu1 %v8489_v62 }
 0x8ef   :  { %2705 = vmatpush.bf16.msrb.mxu1 %v8488_v3 }
 0x934   :  { %v2216_v58 = vpop.f32.mrf.mxu1 }
 0x935   :  { %v2258_v11 = vpop.f32.mrf.mxu0 }
 0x93c   :  { %v9964_v20 = vpop.f32.mrf.mxu1 }
 0x93d   :  { %v9966_v21 = vpop.f32.mrf.mxu0 }
 0x944   :  { %v2382_v31 = vpop.f32.mrf.mxu1 }
 0x945   :  { %v2424_v32 = vpop.f32.mrf.mxu0  ;;  %v2383_v37 = vadd.f32 %v2382_v31, %v2285_v33 }
 0x946   :  { %v2425_v39 = vadd.f32 %v2424_v32, %v2288_v63 }
 0x947   :  { %v2429_v50 = vmax.f32 %v2383_v37, 0.0 }
 0x948   :  { %v2432_v36 = vmax.f32 %v2425_v39, 0.0 }
 0x94c   :  { %v2230_v40 = vpop.f32.mrf.mxu2  ;;  %v2384_v41 = vpop.f32.mrf.mxu1 }
 0x94d   :  { %v2231_v42 = vadd.f32 %v2230_v40, %v2216_v58  ;;  %v2244_v45 = vpop.f32.mrf.mxu3  ;;  %v2385_v46 = vadd.f32 %v2384_v41, %v2285_v33  ;;  %v2426_v47 = vpop.f32.mrf.mxu0 }
 0x94e   :  { %v2427_v29 = vadd.f32 %v2426_v47, %v2288_v63  ;;  %v1278_v63 = vadd.f32 %v9573_v6, %v1264_v28 }
 0x94f   :  { %v2245_v51 = vadd.f32 %v2244_v45, %v2231_v42  ;;  %v2433_v52 = vmax.f32 %v2385_v46, 0.0 }
 0x950   :  { %v2436_v53 = vmax.f32 %v2427_v29, 0.0  ;;  %v1282_v49 = vadd.f32 %v1280_v44, %v1278_v63  ;;  %v2802_v63 = vperm.slane %v9833_v43, 4 }
 0x951   :  { %v2259_v54 = vadd.f32 %v2258_v11, %v2245_v51  ;;  %v2437_v57 = vpack.c.bf16 %v2433_v52, %v2429_v50 }
 0x952   :  { %v2440_v56 = vpack.c.bf16 %v2436_v53, %v2432_v36  ;;  %v1773_v18 = vadd.f32 %v1770_v4, %v1282_v49 }
 0x953   :  { %v2263_v23 = vadd.f32 %v2259_v54, %v9864_v9  ;;  %2706 = vmatmul.bf16.vlgmr.msrb.gmra.mxu1 %v2437_v57 }
 0x954   :  { %2748 = vmatmul.bf16.vlgmr.msra.gmra.mxu0 %v2440_v56  ;;  %v2232_v60 = vpop.f32.mrf.mxu2 }
 0x955   :  { %v2246_v61 = vpop.f32.mrf.mxu3  ;;  %v2233_v30 = vadd.f32 %v2232_v60, %v9964_v20  ;;  %v8527_v60 = vld [vmem:[%s11131_s2 + $0xf8] sm:$0xff] }
 0x956   :  { %2908 = vmatpush.bf16.msra.mxu2 %v8527_v60 }
 0x957   :  { %v2247_v37 = vadd.f32 %v2246_v61, %v2233_v30  ;;  %v8531_v61 = vld [vmem:[%s11131_s2 + $0x118] sm:$0xff] }
 0x958   :  { %2960 = vmatpush.bf16.msra.mxu3 %v8531_v61 }
 0x959   :  { %v2261_v14 = vadd.f32 %v9966_v21, %v2247_v37 }
 0x95b   :  { %v2264_v47 = vadd.f32 %v2261_v14, %v1773_v18 }
 0x95c   :  { %v2396_v62 = vpop.f32.mrf.mxu2 }
 0x95d   :  { %v2410_v0 = vpop.f32.mrf.mxu3  ;;  %v2397_v3 = vadd.f32 %v2396_v62, %v2286_v1  ;;  %v8522_v62 = vld [vmem:[%s11131_s2 + $0xd0] sm:$0xff] }
 0x95e   :  { %v2411_v5 = vadd.f32 %v2410_v0, %v2287_v2  ;;  %v8526_v0 = vld [vmem:[%s11131_s2 + $0xf0] sm:$0xff] }
 0x95f   :  { %v2430_v58 = vmax.f32 %v2397_v3, 0.0  ;;  %2909 = vmatpush.bf16.msra.mxu2 %v8526_v0  ;;  %v8525_v3 = vld [vmem:[%s11131_s2 + $0xe8] sm:$0xff]  ;;  %v8536_v0 = vld [vmem:[%s11131_s2 + $0x130] sm:$0xff] }
 0x960   :  { %v2431_v12 = vmax.f32 %v2411_v5, 0.0  ;;  %v8529_v5 = vld [vmem:[%s11131_s2 + $0x108] sm:$0xff] }
 0x963   :  { %2910 = vmatpush.bf16.msra.mxu2 %v8525_v3  ;;  %v8534_v3 = vld [vmem:[%s11131_s2 + $0x120] sm:$0xff] }
 0x964   :  { %v2398_v7 = vpop.f32.mrf.mxu2 }
 0x965   :  { %v2399_v8 = vadd.f32 %v2398_v7, %v2286_v1  ;;  %v2412_v24 = vpop.f32.mrf.mxu3  ;;  %v8530_v1 = vld [vmem:[%s11131_s2 + $0x110] sm:$0xff] }
 0x966   :  { %v2413_v10 = vadd.f32 %v2412_v24, %v2287_v2  ;;  %2961 = vmatpush.bf16.msra.mxu3 %v8530_v1  ;;  %v8521_v2 = vld [vmem:[%s11131_s2 + $0xc8] sm:$0xff] }
 0x967   :  { %v2434_v11 = vmax.f32 %v2399_v8, 0.0 }
 0x968   :  { %v2435_v16 = vmax.f32 %v2413_v10, 0.0  ;;  %v8520_v10 = vld [vmem:[%s11131_s2 + $0xc0] sm:$0xff] }
 0x969   :  { %v2438_v17 = vpack.c.bf16 %v2434_v11, %v2430_v58  ;;  %v8524_v58 = vld [vmem:[%s11131_s2 + $0xe0] sm:$0xff] }
 0x96a   :  { %v2439_v9 = vpack.c.bf16 %v2435_v16, %v2431_v12  ;;  %2962 = vmatpush.bf16.msra.mxu3 %v8529_v5  ;;  %v8528_v11 = vld [vmem:[%s11131_s2 + $0x100] sm:$0xff]  ;;  %2911 = vmatpush.bf16.msra.mxu2 %v8524_v58 }
 0x96b   :  { %2720 = vmatmul.bf16.vlgmr.msrb.gmra.mxu2 %v2438_v17 }
 0x96c   :  { %2734 = vmatmul.bf16.vlgmr.msrb.gmra.mxu3 %v2439_v9 }
 0x96e   :  { %2963 = vmatpush.bf16.msra.mxu3 %v8528_v11 }
 0x9d0   :  { %v2707_v25 = vpop.f32.mrf.mxu1 }
 0x9d1   :  { %v2749_v33 = vpop.f32.mrf.mxu0 }
 0x9d8   :  { %v2709_v40 = vpop.f32.mrf.mxu1 }
 0x9d9   :  { %v2751_v46 = vpop.f32.mrf.mxu0 }
 0x9ee   :  { %v2721_v27 = vpop.f32.mrf.mxu2 }
 0x9ef   :  { %v2722_v31 = vadd.f32 %v2721_v27, %v2707_v25  ;;  %v2735_v32 = vpop.f32.mrf.mxu3 }
 0x9f1   :  { %v2736_v59 = vadd.f32 %v2735_v32, %v2722_v31 }
 0x9f3   :  { %v2750_v39 = vadd.f32 %v2749_v33, %v2736_v59 }
 0x9f5   :  { %v2754_v48 = vadd.f32 %v2750_v39, %v2263_v23 }
 0x9f6   :  { %v2723_v13 = vpop.f32.mrf.mxu2 }
 0x9f7   :  { %v2724_v20 = vadd.f32 %v2723_v13, %v2709_v40  ;;  %v2756_v41 = vadd.f32 %v2754_v48, %v9262_v34  ;;  %v2737_v42 = vpop.f32.mrf.mxu3  ;;  %v2805_v48 = vperm.slane %v9833_v43, 5  ;;  %v8757_v43 = vld [vmem:[%s11132_s3 + $0x7] ss:$0 sm:$0xff] }
 0x9f9   :  { %v2738_v45 = vadd.f32 %v2737_v42, %v2724_v20  ;;  %v2758_v6 = vsel %vm98_vm0, %v2756_v41, 0.0  ;;  %v8758_v42 = vld [vmem:[%s11132_s3 + $0x8] ss:$0 sm:$0xff] }
 0x9fa   :  { %2759 = vadd.xlane.f32.xlu0 %v2758_v6 }
 0x9fb   :  { %v2752_v15 = vadd.f32 %v2751_v46, %v2738_v45 }
 0x9fd   :  { %v2755_v29 = vadd.f32 %v2752_v15, %v2264_v47  ;;  %v8756_v15 = vld [vmem:[%s11132_s3 + $0x6] ss:$0 sm:$0xff] }
 0x9ff   :  { %v2757_v50 = vadd.f32 %v2755_v29, %v9264_v35  ;;  %v8523_v35 = vld [vmem:[%s11131_s2 + $0xd8] sm:$0xff] }
 0xa00   :  { %2856 = vmatpush.bf16.msra.mxu1 %v8523_v35 }
 0xa01   :  { %v2761_v51 = vsel %vm98_vm0, %v2757_v50, 0.0 }
 0xa02   :  { %2762 = vadd.xlane.f32.xlu1 %v2761_v51 }
 0xa04   :  { %2857 = vmatpush.bf16.msra.mxu1 %v8522_v62 }
 0xa08   :  { %2858 = vmatpush.bf16.msra.mxu1 %v8521_v2  ;;  %v8535_v2 = vld [vmem:[%s11131_s2 + $0x128] sm:$0xff] }
 0xa0c   :  { %2859 = vmatpush.bf16.msra.mxu1 %v8520_v10 }
 0xa6d   :  { %v2760_v44 = vpop.xlane.xlu0 %2759 }
 0xa6e   :  { %v2764_v21 = vmul.f32 %v2760_v44, %v9104_v22 }
 0xa70   :  { %v2766_v52 = vsub.f32 %v2756_v41, %v2764_v21 }
 0xa72   :  { %v2768_v34 = vmul.f32 %v2766_v52, %v2766_v52 }
 0xa74   :  { %v2770_v36 = vsel %vm98_vm0, %v2768_v34, 0.0 }
 0xa75   :  { %2771 = vadd.xlane.f32.xlu2 %v2770_v36  ;;  %v2763_v53 = vpop.xlane.xlu1 %2762 }
 0xa76   :  { %v2765_v54 = vmul.f32 %v2763_v53, %v9104_v22 }
 0xa78   :  { %v2767_v57 = vsub.f32 %v2757_v50, %v2765_v54 }
 0xa7a   :  { %v2769_v56 = vmul.f32 %v2767_v57, %v2767_v57 }
 0xa7c   :  { %v2773_v23 = vsel %vm98_vm0, %v2769_v56, 0.0  ;;  %v8537_v56 = vld [vmem:[%s11131_s2 + $0x138] sm:$0xff] }
 0xa7d   :  { %2774 = vadd.xlane.f32.xlu0 %v2773_v23 }
 0xae8   :  { %v2772_v7 = vpop.xlane.xlu2 %2771 }
 0xae9   :  { %v2776_v8 = vmul.f32 %v2772_v7, %v9104_v22 }
 0xaeb   :  { %v2778_v24 = vadd.f32 1e-05, %v2776_v8 }
 0xaed   :  { %8784 = vrsqrt.f32 %v2778_v24  ;;  %vm2786_vm13 = vweird.f32 %v2778_v24 }
 0xaf0   :  { %v2775_v12 = vpop.xlane.xlu0 %2774 }
 0xaf1   :  { %v2777_v16 = vmul.f32 %v2775_v12, %v9104_v22 }
 0xaf3   :  { %v8785_v17 = vpop.eup %8784  ;;  %v2779_v9 = vadd.f32 1e-05, %v2777_v16 }
 0xaf4   :  { %v2781_v19 = vmul.f32 %v8785_v17, %v2778_v24  ;;  %vm2787_vm12 = vweird.f32 %v8785_v17 }
 0xaf5   :  { %8786 = vrsqrt.f32 %v2779_v9  ;;  %vm2788_vm14 = vmor %vm2786_vm13, %vm2787_vm12  ;;  %vm2796_vm5 = vweird.f32 %v2779_v9 }
 0xaf6   :  { %v2782_v25 = vmul.f32 %v8785_v17, %v2781_v19 }
 0xaf8   :  { %v2783_v26 = vmul.f32 0.5, %v2782_v25 }
 0xafa   :  { %v2784_v27 = vsub.f32 1.5, %v2783_v26 }
 0xafb   :  { %v8787_v28 = vpop.eup %8786 }
 0xafc   :  { %v2785_v30 = vmul.f32 %v8785_v17, %v2784_v27  ;;  %v2791_v31 = vmul.f32 %v8787_v28, %v2779_v9  ;;  %vm2797_vm15 = vweird.f32 %v8787_v28 }
 0xafd   :  { %vm2798_vm6 = vmor %vm2796_vm5, %vm2797_vm15  ;;  %vm5502_vm15 = vcmask 1041409   ;;  %vm5669_vm5 = vcmask 1041408  }
 0xafe   :  { %v2792_v32 = vmul.f32 %v8787_v28, %v2791_v31  ;;  %v2789_v33 = vsel %vm2788_vm14, %v8785_v17, %v2785_v30 }
 0xaff   :  { %v2800_v37 = vmul.f32 %v2789_v33, %v2766_v52 }
 0xb00   :  { %v2793_v38 = vmul.f32 0.5, %v2792_v32 }
 0xb01   :  { %v2803_v40 = vmul.f32 %v2802_v63, %v2800_v37  ;;  %v8545_v37 = vld [vmem:[%s11131_s2 + $0x178] sm:$0xff] }
 0xb02   :  { %v2794_v59 = vsub.f32 1.5, %v2793_v38  ;;  %v8541_v38 = vld [vmem:[%s11131_s2 + $0x158] sm:$0xff] }
 0xb03   :  { %v10050_v14 = vadd.f32 %v2805_v48, %v2803_v40  ;;  %v8542_v40 = vld [vmem:[%s11131_s2 + $0x160] sm:$0xff] }
 0xb04   :  { %v2795_v39 = vmul.f32 %v8787_v28, %v2794_v59  ;;  %v8540_v59 = vld [vmem:[%s11131_s2 + $0x150] sm:$0xff] }
 0xb06   :  { %v2799_v4 = vsel %vm2798_vm6, %v8787_v28, %v2795_v39  ;;  %v8538_v39 = vld [vmem:[%s11131_s2 + $0x140] sm:$0xff] }
 0xb07   :  { %v2801_v13 = vmul.f32 %v2799_v4, %v2767_v57  ;;  %v8544_v4 = vld [vmem:[%s11131_s2 + $0x170] sm:$0xff] }
 0xb09   :  { %v2804_v49 = vmul.f32 %v2802_v63, %v2801_v13  ;;  %v8539_v63 = vld [vmem:[%s11131_s2 + $0x148] sm:$0xff] }
 0xb0b   :  { %v10052_v20 = vadd.f32 %v2805_v48, %v2804_v49  ;;  %v8543_v48 = vld [vmem:[%s11131_s2 + $0x168] sm:$0xff] }
 0xb0d   :  { %v10056_v41 = vpack.c.bf16 %v10052_v20, %v10050_v14 }
 0xb0f   :  { %6949 = vmatmul.msk.bf16.vlgmr.msra.gmra.mxu1 %vm98_vm0, %v10056_v41  ;;  %6975 = vmatmul.msk.bf16.vlgmr.msra.gmra.mxu2 %vm98_vm0, %v10056_v41 }
 0xb10   :  { %7001 = vmatmul.msk.bf16.vlgmr.msra.gmra.mxu3 %vm98_vm0, %v10056_v41 }
 0xb8c   :  { %v2861_v46 = vpop.f32.mrf.mxu1 }
 0xb8d   :  { %v2862_v21 = vadd.f32 %v8756_v15, %v2861_v46 }
 0xb8f   :  { %v2970_v54 = vpack.c.bf16 %v2862_v21, %v2862_v21 }
 0xb92   :  { %v2913_v18 = vpop.f32.mrf.mxu2 }
 0xb93   :  { %v2914_v45 = vadd.f32 %v8757_v43, %v2913_v18  ;;  %v2965_v6 = vpop.f32.mrf.mxu3 }
 0xb94   :  { %v2966_v47 = vadd.f32 %v8758_v42, %v2965_v6  ;;  %v2863_v23 = vpop.f32.mrf.mxu1 }
 0xb95   :  { %v2972_v29 = vpack.c.bf16 %v2914_v45, %v2914_v45  ;;  %v2864_v62 = vadd.f32 %v8756_v15, %v2863_v23  ;;  %v8532_v15 = vld [vmem:[%s11133_s4 + $0x20] sm:$0xff] }
 0xb96   :  { %v2974_v50 = vpack.c.bf16 %v2966_v47, %v2966_v47  ;;  %v8533_v47 = vld [vmem:[%s11133_s4 + $0x28] sm:$0xff] }
 0xb97   :  { %v2980_v51 = vsel %vm284_vm1, %v2972_v29, 0  ;;  %v2971_v1 = vpack.c.bf16 %v2864_v62, %v2864_v62 }
 0xb98   :  { %v3046_v44 = vsel %vm355_vm2, %v2974_v50, 0  ;;  %2989 = vmatpush.bf16.xpose.msrb.mxu0 %v2980_v51 }
 0xb99   :  { %3055 = vmatpush.bf16.msrb.mxu2 %v3046_v44 }
 0xb9a   :  { %v2915_v52 = vpop.f32.mrf.mxu2 }
 0xb9b   :  { %v2916_v34 = vadd.f32 %v8757_v43, %v2915_v52  ;;  %v2967_v36 = vpop.f32.mrf.mxu3 }
 0xb9c   :  { %v2968_v53 = vadd.f32 %v8758_v42, %v2967_v36 }
 0xb9d   :  { %v2973_v57 = vpack.c.bf16 %v2916_v34, %v2916_v34  ;;  %3212 = vmatpush.bf16.msra.mxu2 %v8541_v38 }
 0xb9e   :  { %v2975_v35 = vpack.c.bf16 %v2968_v53, %v2968_v53  ;;  %v8759_v53 = vld [vmem:[%s11132_s3 + $0x9] ss:$0 sm:$0xff] }
 0xb9f   :  { %7002 = vmatmul.msk.bf16.vlgmr.msrb.gmra.mxu0 %vm284_vm1, %v2970_v54  ;;  %v2999_v60 = vsel %vm284_vm1, %v2973_v57, 0 }
 0xba0   :  { %3008 = vmatpush.bf16.xpose.msrb.mxu1 %v2999_v60  ;;  %v3065_v61 = vsel %vm355_vm2, %v2975_v35, 0  ;;  %3107 = vmatpush.bf16.msra.mxu0 %v8533_v47 }
 0xba1   :  { %3074 = vmatpush.bf16.msrb.mxu3 %v3065_v61  ;;  %3213 = vmatpush.bf16.msra.mxu2 %v8540_v59 }
 0xba4   :  { %3108 = vmatpush.bf16.msra.mxu0 %v8532_v15 }
 0xba5   :  { %3214 = vmatpush.bf16.msra.mxu2 %v8539_v63  ;;  %3264 = vmatpush.bf16.msra.mxu3 %v8545_v37 }
 0xba7   :  { %7003 = vmatmul.msk.bf16.vlgmr.msrb.gmra.mxu1 %vm284_vm1, %v2971_v1 }
 0xba8   :  { %3160 = vmatpush.bf16.msra.mxu1 %v8537_v56  ;;  %v8761_v56 = vld [vmem:[%s11132_s3 + $0xb] ss:$0 sm:$0xff] }
 0xba9   :  { %3215 = vmatpush.bf16.msra.mxu2 %v8538_v39  ;;  %3265 = vmatpush.bf16.msra.mxu3 %v8544_v4 }
 0xbac   :  { %3161 = vmatpush.bf16.msra.mxu1 %v8536_v0 }
 0xbad   :  { %3266 = vmatpush.bf16.msra.mxu3 %v8543_v48 }
 0xbb0   :  { %3162 = vmatpush.bf16.msra.mxu1 %v8535_v2 }
 0xbb1   :  { %3267 = vmatpush.bf16.msra.mxu3 %v8542_v40 }
 0xbb4   :  { %3163 = vmatpush.bf16.msra.mxu1 %v8534_v3 }
 0xbb7   :  { %7044 = vmatmul.msk.bf16.vlgmr.msra.gmra.mxu1 %vm98_vm0, %v10056_v41 }
 0xc1c   :  { %v2991_v5 = vpop.f32.mrf.mxu0 }
 0xc1d   :  { %v3014_v7 = vmul.f32 0.17677669, %v2991_v5 }
 0xc1f   :  { %v3016_v8 = vsel %vm70_vm3, %v3014_v7, -1e+30 }
 0xc20   :  { %v3018_v24 = vsel %vm327_vm4, %v3016_v8, -inf }
 0xc21   :  { %3019 = vmax.xlane.f32.xlu1 %v3018_v24 }
 0xc24   :  { %v2993_v10 = vpop.f32.mrf.mxu0  ;;  %v3010_v58 = vpop.f32.mrf.mxu1 }
 0xc25   :  { %v3015_v11 = vmul.f32 0.17677669, %v3010_v58 }
 0xc27   :  { %v3017_v12 = vsel %vm70_vm3, %v3015_v11, -1e+30 }
 0xc28   :  { %v3021_v16 = vsel %vm327_vm4, %v3017_v12, -inf }
 0xc29   :  { %3022 = vmax.xlane.f32.xlu2 %v3021_v16 }
 0xc2c   :  { %v3012_v17 = vpop.f32.mrf.mxu1 }
 0xc34   :  { %v3165_v36 = vpop.f32.mrf.mxu1 }
 0xc35   :  { %v3166_v23 = vadd.f32 %v8759_v53, %v3165_v36 }
 0xc37   :  { %v3274_v0 = vpack.c.bf16 %v3166_v23, %v3166_v23 }
 0xc3c   :  { %v3167_v3 = vpop.f32.mrf.mxu1 }
 0xc94   :  { %v3020_v9 = vpop.xlane.xlu1 %3019 }
 0xc95   :  { %v3024_v19 = vsub.f32 %v3016_v8, %v3020_v9  ;;  %v3168_v8 = vadd.f32 %v8759_v53, %v3167_v3 }
 0xc97   :  { %v3026_v25 = vmul.f32 1.442695, %v3024_v19  ;;  %v3275_v58 = vpack.c.bf16 %v3168_v8, %v3168_v8 }
 0xc99   :  { %8788 = vpow2.f32 %v3026_v25 }
 0xc9c   :  { %v3023_v26 = vpop.xlane.xlu2 %3022 }
 0xc9d   :  { %v3025_v27 = vsub.f32 %v3017_v12, %v3023_v26 }
 0xc9f   :  { %v8789_v28 = vpop.eup %8788  ;;  %v3028_v30 = vmul.f32 1.442695, %v3025_v27 }
 0xca0   :  { %v3030_v31 = vsel %vm327_vm4, %v8789_v28, 0.0 }
 0xca1   :  { %8790 = vpow2.f32 %v3028_v30  ;;  %3031 = vadd.xlane.f32.xlu0 %v3030_v31 }
 0xca7   :  { %v8791_v32 = vpop.eup %8790 }
 0xca8   :  { %v3033_v33 = vsel %vm327_vm4, %v8791_v32, 0.0 }
 0xca9   :  { %3034 = vadd.xlane.f32.xlu1 %v3033_v33 }
 0xd14   :  { %v3032_v13 = vpop.xlane.xlu0 %3031 }
 0xd15   :  { %8792 = vrcp.f32 %v3032_v13 }
 0xd1b   :  { %v8793_v49 = vpop.eup %8792 }
 0xd1c   :  { %v3038_v43 = vmul.f32 %v8793_v49, %v8789_v28  ;;  %v3035_v42 = vpop.xlane.xlu1 %3034 }
 0xd1d   :  { %8794 = vrcp.f32 %v3035_v42 }
 0xd1e   :  { %v3040_v18 = vpack.c.bf16 %v3038_v43, %v3038_v43 }
 0xd20   :  { %7004 = vmatmul.msk.bf16.vlgmr.msrb.gmra.mxu2 %vm327_vm4, %v3040_v18 }
 0xd23   :  { %v8795_v45 = vpop.eup %8794 }
 0xd24   :  { %v3039_v6 = vmul.f32 %v8795_v45, %v8791_v32 }
 0xd26   :  { %v3041_v46 = vpack.c.bf16 %v3039_v6, %v3039_v6 }
 0xd28   :  { %7005 = vmatmul.msk.bf16.vlgmr.msrb.gmra.mxu3 %vm327_vm4, %v3041_v46 }
 0xd30   :  { %7070 = vmatmul.msk.bf16.vlgmr.msra.gmra.mxu2 %vm98_vm0, %v10056_v41 }
 0xd38   :  { %7096 = vmatmul.msk.bf16.vlgmr.msra.gmra.mxu3 %vm98_vm0, %v10056_v41  ;;  %v8760_v41 = vld [vmem:[%s11132_s3 + $0xa] ss:$0 sm:$0xff] }
 0xda3   :  { %v3057_v29 = vpop.f32.mrf.mxu2 }
 0xdab   :  { %v3059_v50 = vpop.f32.mrf.mxu2  ;;  %v3076_v51 = vpop.f32.mrf.mxu3 }
 0xdac   :  { %v3080_v44 = vpack.c.bf16 %v3076_v51, %v3057_v29  ;;  %v8547_v29 = vld [vmem:[%s11133_s4 + $0x38] sm:$0xff]  ;;  %v8546_v50 = vld [vmem:[%s11133_s4 + $0x30] sm:$0xff] }
 0xdae   :  { %7018 = vmatmul.msk.bf16.vlgmr.msra.gmra.mxu0 %vm284_vm1, %v3080_v44 }
 0xdb3   :  { %v3078_v21 = vpop.f32.mrf.mxu3  ;;  %v3217_v52 = vpop.f32.mrf.mxu2 }
 0xdb4   :  { %v3218_v34 = vadd.f32 %v8760_v41, %v3217_v52 }
 0xdb6   :  { %v3276_v54 = vpack.c.bf16 %v3218_v34, %v3218_v34  ;;  %v10173_v34 = vld [vmem:[%s11134_s5 + $0x8] sm:$0x3f] }
 0xdb7   :  { %v3115_v36 = vperm.slane %v10173_v34, 2 }
 0xdb8   :  { %v3284_v57 = vsel %vm284_vm1, %v3276_v54, 0 }
 0xdb9   :  { %3293 = vmatpush.bf16.xpose.msrb.mxu0 %v3284_v57 }
 0xdbb   :  { %v3219_v35 = vpop.f32.mrf.mxu2  ;;  %v3269_v60 = vpop.f32.mrf.mxu3 }
 0xdbc   :  { %v3220_v61 = vadd.f32 %v8760_v41, %v3219_v35  ;;  %v3270_v62 = vadd.f32 %v8761_v56, %v3269_v60 }
 0xdbe   :  { %v3277_v1 = vpack.c.bf16 %v3220_v61, %v3220_v61  ;;  %v3278_v2 = vpack.c.bf16 %v3270_v62, %v3270_v62 }
 0xdc0   :  { %v3303_v5 = vsel %vm284_vm1, %v3277_v1, 0  ;;  %v3350_v7 = vsel %vm355_vm2, %v3278_v2, 0  ;;  %7097 = vmatmul.msk.bf16.vlgmr.msrb.gmra.mxu0 %vm284_vm1, %v3274_v0 }
 0xdc1   :  { %3312 = vmatpush.bf16.xpose.msrb.mxu1 %v3303_v5  ;;  %3359 = vmatpush.bf16.msrb.mxu2 %v3350_v7 }
 0xdc2   :  { %3411 = vmatpush.bf16.msra.mxu0 %v8547_v29 }
 0xdc3   :  { %v3271_v24 = vpop.f32.mrf.mxu3 }
 0xdc4   :  { %v3272_v10 = vadd.f32 %v8761_v56, %v3271_v24 }
 0xdc6   :  { %v3279_v11 = vpack.c.bf16 %v3272_v10, %v3272_v10  ;;  %3412 = vmatpush.bf16.msra.mxu0 %v8546_v50  ;;  %v8553_v50 = vld [vmem:[%s11135_s6 + $0x22c] sm:$0xf] }
 0xdc8   :  { %v3369_v12 = vsel %vm355_vm2, %v3279_v11, 0  ;;  %7098 = vmatmul.msk.bf16.vlgmr.msrb.gmra.mxu1 %vm284_vm1, %v3275_v58  ;;  %v7181_v58 = vld [vmem:[%s11135_s6 + $0x260] sm:$0xf]  ;;  %v8562_v11 = vld [vmem:[%s11135_s6 + $0x26c] sm:$0xf0] }
 0xdc9   :  { %3378 = vmatpush.bf16.msrb.mxu3 %v3369_v12  ;;  %v8560_v12 = vld [vmem:[%s11135_s6 + $0x264] sm:$0xf] }
 0xe2b   :  { %v3110_v16 = vpop.f32.mrf.mxu0 }
 0xe2c   :  { %v3116_v53 = vadd.f32 %v3115_v36, %v3110_v16  ;;  %v7182_v16 = vor.u32 %v8562_v11, %v7181_v58 }
 0xe2e   :  { %3589 = vmatpush.bf16.msra.mxu1 %v7182_v16  ;;  %v8586_v16 = vld [vmem:[%s11137_s8 + $0x4b0] sm:$0xff] }
 0xe33   :  { %v3112_v17 = vpop.f32.mrf.mxu0 }
 0xe34   :  { %v3117_v35 = vadd.f32 %v3115_v36, %v3112_v17  ;;  %v7183_v17 = vld [vmem:[%s11135_s6 + $0x270] sm:$0xf0]  ;;  %v8548_v36 = vld [vmem:[%s11135_s6 + $0x204] sm:$0xf] }
 0xe3d   :  { %v3295_v9 = vpop.f32.mrf.mxu0 }
 0xe3e   :  { %v3318_v19 = vmul.f32 0.17677669, %v3295_v9  ;;  %v7189_v9 = vld [vmem:[%s11135_s6 + $0x268] sm:$0xf] }
 0xe40   :  { %v3320_v25 = vsel %vm70_vm3, %v3318_v19, -1e+30  ;;  %v8563_v19 = vld [vmem:[%s11135_s6 + $0x274] sm:$0xf0] }
 0xe41   :  { %v3322_v26 = vsel %vm327_vm4, %v3320_v25, -inf }
 0xe42   :  { %3323 = vmax.xlane.f32.xlu2 %v3322_v26  ;;  %v7190_v26 = vor.u32 %v8563_v19, %v7189_v9  ;;  %v8569_v19 = vld [vmem:[%s11137_s8 + $0x428] sm:$0xff] }
 0xe44   :  { %3617 = vmatpush.bf16.msra.mxu3 %v7190_v26  ;;  %v8577_v26 = vld [vmem:[%s11137_s8 + $0x468] sm:$0xff] }
 0xe45   :  { %v3297_v27 = vpop.f32.mrf.mxu0  ;;  %v3314_v28 = vpop.f32.mrf.mxu1 }
 0xe46   :  { %v3319_v30 = vmul.f32 0.17677669, %v3314_v28  ;;  %v8561_v27 = vld [vmem:[%s11135_s6 + $0x26c] sm:$0xf]  ;;  %v7191_v28 = vld [vmem:[%s11135_s6 + $0x278] sm:$0xf0] }
 0xe48   :  { %v3321_v31 = vsel %vm70_vm3, %v3319_v30, -1e+30  ;;  %v7194_v30 = vor.u32 %v8561_v27, %v7191_v28  ;;  %v8585_v27 = vld [vmem:[%s11137_s8 + $0x4a8] sm:$0xff] }
 0xe49   :  { %v3325_v32 = vsel %vm327_vm4, %v3321_v31, -inf }
 0xe4a   :  { %3326 = vmax.xlane.f32.xlu0 %v3325_v32  ;;  %v8558_v32 = vld [vmem:[%s11135_s6 + $0x24c] sm:$0xf0]  ;;  %3631 = vmatpush.bf16.msrb.mxu0 %v7194_v30 }
 0xe4d   :  { %v3316_v33 = vpop.f32.mrf.mxu1 }
 0xe4e   :  { %v8556_v33 = vld [vmem:[%s11135_s6 + $0x244] sm:$0xf] }
 0xeb5   :  { %v3324_v38 = vpop.xlane.xlu2 %3323 }
 0xeb6   :  { %v3328_v59 = vsub.f32 %v3320_v25, %v3324_v38  ;;  %v7186_v25 = vor.u32 %v8560_v12, %v7183_v17  ;;  %v8578_v12 = vld [vmem:[%s11137_s8 + $0x470] sm:$0xff] }
 0xeb8   :  { %v3330_v63 = vmul.f32 1.442695, %v3328_v59  ;;  %3603 = vmatpush.bf16.msra.mxu2 %v7186_v25  ;;  %v7167_v59 = vld [vmem:[%s11135_s6 + $0x250] sm:$0xf0]  ;;  %v8593_v25 = vld [vmem:[%s11137_s8 + $0x4e8] sm:$0xff] }
 0xeba   :  { %8796 = vpow2.f32 %v3330_v63  ;;  %v7173_v63 = vld [vmem:[%s11135_s6 + $0x248] sm:$0xf] }
 0xebd   :  { %v3327_v37 = vpop.xlane.xlu0 %3326 }
 0xebe   :  { %v3329_v39 = vsub.f32 %v3321_v31, %v3327_v37  ;;  %v7165_v31 = vld [vmem:[%s11135_s6 + $0x240] sm:$0xf]  ;;  %v8559_v37 = vld [vmem:[%s11135_s6 + $0x254] sm:$0xf0] }
 0xebf   :  { %v7166_v38 = vor.u32 %v8558_v32, %v7165_v31  ;;  %v8568_v31 = vld [vmem:[%s11137_s8 + $0x420] sm:$0xff] }
 0xec0   :  { %v8797_v4 = vpop.eup %8796  ;;  %v3332_v48 = vmul.f32 1.442695, %v3329_v39  ;;  %v7170_v39 = vor.u32 %v8556_v33, %v7167_v59  ;;  %v8592_v32 = vld [vmem:[%s11137_s8 + $0x4e0] sm:$0xff] }
 0xec1   :  { %v3334_v40 = vsel %vm327_vm4, %v8797_v4, 0.0  ;;  %3590 = vmatpush.bf16.msra.mxu1 %v7166_v38 }
 0xec2   :  { %8798 = vpow2.f32 %v3332_v48  ;;  %3335 = vadd.xlane.f32.xlu1 %v3334_v40  ;;  %v8557_v48 = vld [vmem:[%s11135_s6 + $0x24c] sm:$0xf]  ;;  %v7175_v40 = vld [vmem:[%s11135_s6 + $0x258] sm:$0xf0]  ;;  %3604 = vmatpush.bf16.msra.mxu2 %v7170_v39 }
 0xec8   :  { %v8799_v13 = vpop.eup %8798 }
 0xec9   :  { %v3337_v49 = vsel %vm327_vm4, %v8799_v13, 0.0 }
 0xeca   :  { %3338 = vadd.xlane.f32.xlu2 %v3337_v49  ;;  %v7149_v49 = vld [vmem:[%s11135_s6 + $0x220] sm:$0xf] }
 0xf35   :  { %v3336_v43 = vpop.xlane.xlu1 %3335 }
 0xf36   :  { %8800 = vrcp.f32 %v3336_v43  ;;  %v8554_v43 = vld [vmem:[%s11135_s6 + $0x22c] sm:$0xf0] }
 0xf3c   :  { %v8801_v42 = vpop.eup %8800 }
 0xf3d   :  { %v3342_v18 = vmul.f32 %v8801_v42, %v8797_v4  ;;  %v3339_v45 = vpop.xlane.xlu2 %3338  ;;  %v7174_v4 = vor.u32 %v8559_v37, %v7173_v63  ;;  %v8552_v42 = vld [vmem:[%s11135_s6 + $0x224] sm:$0xf] }
 0xf3e   :  { %8802 = vrcp.f32 %v3339_v45  ;;  %v7151_v45 = vld [vmem:[%s11135_s6 + $0x230] sm:$0xf0] }
 0xf3f   :  { %v3344_v6 = vpack.c.bf16 %v3342_v18, %v3342_v18  ;;  %3618 = vmatpush.bf16.msra.mxu3 %v7174_v4  ;;  %v7150_v18 = vor.u32 %v8554_v43, %v7149_v49  ;;  %v3470_v43 = vperm.slane %v10173_v34, 1 }
 0xf41   :  { %7099 = vmatmul.msk.bf16.vlgmr.msrb.gmra.mxu2 %vm327_vm4, %v3344_v6  ;;  %v7157_v6 = vld [vmem:[%s11135_s6 + $0x228] sm:$0xf]  ;;  %3591 = vmatpush.bf16.msra.mxu1 %v7150_v18 }
 0xf44   :  { %v8803_v46 = vpop.eup %8802 }
 0xf45   :  { %v3343_v47 = vmul.f32 %v8803_v46, %v8799_v13  ;;  %v7178_v13 = vor.u32 %v8557_v48, %v7175_v40  ;;  %v8555_v46 = vld [vmem:[%s11135_s6 + $0x234] sm:$0xf0]  ;;  %v3467_v48 = vperm.slane %v10173_v34, 0 }
 0xf46   :  { %v7158_v29 = vor.u32 %v8555_v46, %v7157_v6  ;;  %v8567_v34 = vld [vmem:[%s11137_s8 + $0x418] sm:$0xff] }
 0xf47   :  { %v3345_v15 = vpack.c.bf16 %v3343_v47, %v3343_v47  ;;  %3632 = vmatpush.bf16.msrb.mxu0 %v7178_v13 }
 0xf48   :  { %3619 = vmatpush.bf16.msra.mxu3 %v7158_v29  ;;  %v8566_v29 = vld [vmem:[%s11137_s8 + $0x410] sm:$0xff] }
 0xf49   :  { %7100 = vmatmul.msk.bf16.vlgmr.msrb.gmra.mxu3 %vm327_vm4, %v3345_v15  ;;  %v7154_v15 = vor.u32 %v8552_v42, %v7151_v45 }
 0xf4b   :  { %3605 = vmatpush.bf16.msra.mxu2 %v7154_v15  ;;  %v8584_v15 = vld [vmem:[%s11137_s8 + $0x4a0] sm:$0xff] }
 0xfc4   :  { %v3361_v51 = vpop.f32.mrf.mxu2 }
 0xfcc   :  { %v3363_v44 = vpop.f32.mrf.mxu2  ;;  %v3380_v41 = vpop.f32.mrf.mxu3 }
 0xfcd   :  { %v3384_v21 = vpack.c.bf16 %v3380_v41, %v3361_v51  ;;  %v7159_v51 = vld [vmem:[%s11135_s6 + $0x238] sm:$0xf0] }
 0xfce   :  { %v7162_v41 = vor.u32 %v8553_v50, %v7159_v51  ;;  %v8590_v50 = vld [vmem:[%s11137_s8 + $0x4d0] sm:$0xff]  ;;  %v8575_v51 = vld [vmem:[%s11137_s8 + $0x458] sm:$0xff] }
 0xfcf   :  { %7113 = vmatmul.msk.bf16.vlgmr.msra.gmra.mxu0 %vm284_vm1, %v3384_v21  ;;  %v7133_v21 = vld [vmem:[%s11135_s6 + $0x200] sm:$0xf] }
 0xfd0   :  { %3633 = vmatpush.bf16.msrb.mxu0 %v7162_v41  ;;  %v8565_v41 = vld [vmem:[%s11137_s8 + $0x408] sm:$0xff] }
 0xfd4   :  { %v3382_v52 = vpop.f32.mrf.mxu3 }
 0xfd5   :  { %v8550_v52 = vld [vmem:[%s11135_s6 + $0x20c] sm:$0xf0] }
0x104c   :  { %v3414_v54 = vpop.f32.mrf.mxu0 }
0x104d   :  { %v3419_v57 = vadd.f32 %v3414_v54, %v3116_v53  ;;  %v7134_v54 = vor.u32 %v8550_v52, %v7133_v21  ;;  %v8589_v21 = vld [vmem:[%s11137_s8 + $0x4c8] sm:$0xff]  ;;  %v8574_v52 = vld [vmem:[%s11137_s8 + $0x450] sm:$0xff] }
0x104f   :  { %v3421_v56 = vadd.f32 %v3419_v57, %v10050_v14  ;;  %v7135_v57 = vld [vmem:[%s11135_s6 + $0x210] sm:$0xf0]  ;;  %3592 = vmatpush.bf16.msra.mxu1 %v7134_v54  ;;  %v8588_v54 = vld [vmem:[%s11137_s8 + $0x4c0] sm:$0xff] }
0x1051   :  { %v3423_v23 = vsel %vm98_vm0, %v3421_v56, 0.0 }
0x1052   :  { %3424 = vadd.xlane.f32.xlu0 %v3423_v23  ;;  %v7138_v23 = vor.u32 %v8548_v36, %v7135_v57  ;;  %v8582_v36 = vld [vmem:[%s11137_s8 + $0x490] sm:$0xff]  ;;  %v8573_v57 = vld [vmem:[%s11137_s8 + $0x448] sm:$0xff] }
0x1054   :  { %v3416_v60 = vpop.f32.mrf.mxu0  ;;  %3606 = vmatpush.bf16.msra.mxu2 %v7138_v23  ;;  %v7458_v23 = vld [vmem:[%s11135_s6 + $0x2e0] sm:$0xf] }
0x1055   :  { %v3420_v61 = vadd.f32 %v3416_v60, %v3117_v35  ;;  %v8551_v35 = vld [vmem:[%s11135_s6 + $0x214] sm:$0xf0]  ;;  %v8549_v60 = vld [vmem:[%s11135_s6 + $0x20c] sm:$0xf] }
0x1057   :  { %v3422_v62 = vadd.f32 %v3420_v61, %v10052_v20  ;;  %v7143_v61 = vld [vmem:[%s11135_s6 + $0x218] sm:$0xf0] }
0x1059   :  { %v3426_v0 = vsel %vm98_vm0, %v3422_v62, 0.0 }
0x105a   :  { %3427 = vadd.xlane.f32.xlu1 %v3426_v0  ;;  %v7146_v0 = vor.u32 %v8549_v60, %v7143_v61  ;;  %v8609_v60 = vld [vmem:[%s11135_s6 + $0x2ec] sm:$0xf] }
0x105c   :  { %3634 = vmatpush.bf16.msrb.mxu0 %v7146_v0 }
0x10c5   :  { %v3425_v1 = vpop.xlane.xlu0 %3424 }
0x10c6   :  { %v3429_v2 = vmul.f32 %v3425_v1, %v9104_v22 }
0x10c8   :  { %v10181_v3 = vsub.f32 %v3421_v56, %v3429_v2  ;;  %v7141_v56 = vld [vmem:[%s11135_s6 + $0x208] sm:$0xf]  ;;  %v8571_v2 = vld [vmem:[%s11137_s8 + $0x438] sm:$0xff] }
0x10c9   :  { %3910 = vmatpush.bf16.msrb.mxu1 %v8571_v2  ;;  %v8580_v2 = vld [vmem:[%s11137_s8 + $0x480] sm:$0xff] }
0x10ca   :  { %v3433_v5 = vmul.f32 %v10181_v3, %v10181_v3 }
0x10cc   :  { %v3435_v14 = vsel %vm98_vm0, %v3433_v5, 0.0  ;;  %v8595_v5 = vld [vmem:[%s11137_s8 + $0x4f8] sm:$0xff] }
0x10cd   :  { %3436 = vadd.xlane.f32.xlu2 %v3435_v14  ;;  %v3428_v7 = vpop.xlane.xlu1 %3427  ;;  %3952 = vmatpush.bf16.msra.mxu0 %v8595_v5  ;;  %v7442_v5 = vld [vmem:[%s11135_s6 + $0x2c0] sm:$0xf] }
0x10ce   :  { %v3430_v8 = vmul.f32 %v3428_v7, %v9104_v22  ;;  %v8579_v7 = vld [vmem:[%s11137_s8 + $0x478] sm:$0xff] }
0x10cf   :  { %3924 = vmatpush.bf16.msrb.mxu2 %v8579_v7  ;;  %v8605_v7 = vld [vmem:[%s11135_s6 + $0x2cc] sm:$0xf] }
0x10d0   :  { %v10187_v24 = vsub.f32 %v3422_v62, %v3430_v8  ;;  %v7142_v62 = vor.u32 %v8551_v35, %v7141_v56  ;;  %v8587_v8 = vld [vmem:[%s11137_s8 + $0x4b8] sm:$0xff]  ;;  %v8581_v56 = vld [vmem:[%s11137_s8 + $0x488] sm:$0xff]  ;;  %v8610_v35 = vld [vmem:[%s11135_s6 + $0x2ec] sm:$0xf0] }
0x10d1   :  { %v7459_v61 = vor.u32 %v8610_v35, %v7458_v23 }
0x10d2   :  { %v3434_v20 = vmul.f32 %v10187_v24, %v10187_v24  ;;  %3620 = vmatpush.bf16.msra.mxu3 %v7142_v62  ;;  %v7468_v62 = vld [vmem:[%s11135_s6 + $0x2f8] sm:$0xf0] }
0x10d3   :  { %3925 = vmatpush.bf16.msrb.mxu2 %v8578_v12  ;;  %v7471_v0 = vor.u32 %v8609_v60, %v7468_v62  ;;  %v7466_v12 = vld [vmem:[%s11135_s6 + $0x2e8] sm:$0xf] }
0x10d4   :  { %v3438_v10 = vsel %vm98_vm0, %v3434_v20, 0.0  ;;  %v8570_v20 = vld [vmem:[%s11137_s8 + $0x430] sm:$0xff] }
0x10d5   :  { %3439 = vadd.xlane.f32.xlu0 %v3438_v10  ;;  %v8594_v10 = vld [vmem:[%s11137_s8 + $0x4f0] sm:$0xff]  ;;  %3911 = vmatpush.bf16.msrb.mxu1 %v8570_v20  ;;  %v7452_v20 = vld [vmem:[%s11135_s6 + $0x2d8] sm:$0xf0] }
0x10d6   :  { %3938 = vmatpush.bf16.msrb.mxu3 %v8587_v8  ;;  %3953 = vmatpush.bf16.msra.mxu0 %v8594_v10  ;;  %v7455_v10 = vor.u32 %v8605_v7, %v7452_v20 }
0x10d7   :  { %3926 = vmatpush.bf16.msrb.mxu2 %v8577_v26  ;;  %v8601_v26 = vld [vmem:[%s11135_s6 + $0x2ac] sm:$0xf] }
0x10d9   :  { %3912 = vmatpush.bf16.msrb.mxu1 %v8569_v19  ;;  %v7426_v19 = vld [vmem:[%s11135_s6 + $0x2a0] sm:$0xf] }
0x10da   :  { %3939 = vmatpush.bf16.msrb.mxu3 %v8586_v16  ;;  %3954 = vmatpush.bf16.msra.mxu0 %v8593_v25  ;;  %v8602_v25 = vld [vmem:[%s11135_s6 + $0x2ac] sm:$0xf0] }
0x10dd   :  { %3913 = vmatpush.bf16.msrb.mxu1 %v8568_v31  ;;  %v7444_v31 = vld [vmem:[%s11135_s6 + $0x2d0] sm:$0xf0] }
0x10de   :  { %3940 = vmatpush.bf16.msrb.mxu3 %v8585_v27  ;;  %3955 = vmatpush.bf16.msra.mxu0 %v8592_v32  ;;  %v7427_v27 = vor.u32 %v8602_v25, %v7426_v19 }
0x10e1   :  { %3914 = vmatpush.bf16.msrb.mxu1 %v8567_v34 }
0x10e2   :  { %3941 = vmatpush.bf16.msrb.mxu3 %v8584_v15  ;;  %v8596_v15 = vld [vmem:[%s11135_s6 + $0x284] sm:$0xf] }
0x10e5   :  { %3915 = vmatpush.bf16.msrb.mxu1 %v8566_v29  ;;  %v7412_v29 = vld [vmem:[%s11135_s6 + $0x290] sm:$0xf0] }
0x10e9   :  { %3916 = vmatpush.bf16.msrb.mxu1 %v8565_v41  ;;  %v8599_v41 = vld [vmem:[%s11135_s6 + $0x294] sm:$0xf0] }
0x1140   :  { %v3437_v47 = vpop.xlane.xlu2 %3436 }
0x1141   :  { %v3441_v44 = vmul.f32 %v3437_v47, %v9104_v22 }
0x1143   :  { %v3443_v53 = vadd.f32 1e-05, %v3441_v44  ;;  %v8583_v44 = vld [vmem:[%s11137_s8 + $0x498] sm:$0xff] }
0x1144   :  { %3942 = vmatpush.bf16.msrb.mxu3 %v8583_v44  ;;  %v7415_v44 = vor.u32 %v8596_v15, %v7412_v29  ;;  %v8612_v15 = vld [vmem:[%s11137_s8 + $0x500] sm:$0xff]  ;;  %v8623_v29 = vld [vmem:[%s11137_s8 + $0x558] sm:$0xff] }
0x1145   :  { %8804 = vrsqrt.f32 %v3443_v53  ;;  %vm3451_vm2 = vweird.f32 %v3443_v53 }
0x1148   :  { %v3440_v1 = vpop.xlane.xlu0 %3439  ;;  %3943 = vmatpush.bf16.msrb.mxu3 %v8582_v36 }
0x1149   :  { %v3442_v14 = vmul.f32 %v3440_v1, %v9104_v22  ;;  %v8572_v1 = vld [vmem:[%s11137_s8 + $0x440] sm:$0xff] }
0x114b   :  { %v8805_v58 = vpop.eup %8804  ;;  %v3444_v11 = vadd.f32 1e-05, %v3442_v14  ;;  %v8606_v14 = vld [vmem:[%s11135_s6 + $0x2cc] sm:$0xf0] }
0x114c   :  { %v3446_v17 = vmul.f32 %v8805_v58, %v3443_v53  ;;  %vm3452_vm1 = vweird.f32 %v8805_v58  ;;  %v8564_v53 = vld [vmem:[%s11137_s8 + $0x400] sm:$0xff]  ;;  %3944 = vmatpush.bf16.msrb.mxu3 %v8581_v56  ;;  %v7443_v8 = vor.u32 %v8606_v14, %v7442_v5 }
0x114d   :  { %8806 = vrsqrt.f32 %v3444_v11  ;;  %vm3453_vm3 = vmor %vm3451_vm2, %vm3452_vm1  ;;  %vm3461_vm7 = vweird.f32 %v3444_v11  ;;  %3917 = vmatpush.bf16.msrb.mxu1 %v8564_v53 }
0x114e   :  { %v3447_v9 = vmul.f32 %v8805_v58, %v3446_v17  ;;  %v8611_v17 = vld [vmem:[%s11135_s6 + $0x2f4] sm:$0xf0] }
0x1150   :  { %v3448_v28 = vmul.f32 0.5, %v3447_v9  ;;  %3945 = vmatpush.bf16.msrb.mxu3 %v8580_v2  ;;  %v7467_v9 = vor.u32 %v8611_v17, %v7466_v12 }
0x1152   :  { %v3449_v30 = vsub.f32 1.5, %v3448_v28  ;;  %v7436_v28 = vld [vmem:[%s11135_s6 + $0x2b8] sm:$0xf0] }
0x1153   :  { %v8807_v33 = vpop.eup %8806  ;;  %v7439_v32 = vor.u32 %v8601_v26, %v7436_v28  ;;  %v8619_v28 = vld [vmem:[%s11137_s8 + $0x538] sm:$0xff] }
0x1154   :  { %v3450_v38 = vmul.f32 %v8805_v58, %v3449_v30  ;;  %v3456_v59 = vmul.f32 %v8807_v33, %v3444_v11  ;;  %vm3462_vm4 = vweird.f32 %v8807_v33  ;;  %v7460_v11 = vld [vmem:[%s11135_s6 + $0x2f0] sm:$0xf0]  ;;  %v8604_v30 = vld [vmem:[%s11135_s6 + $0x2c4] sm:$0xf] }
0x1155   :  { %vm3463_vm8 = vmor %vm3461_vm7, %vm3462_vm4 }
0x1156   :  { %v3457_v63 = vmul.f32 %v8807_v33, %v3456_v59  ;;  %v3454_v37 = vsel %vm3453_vm3, %v8805_v58, %v3450_v38  ;;  %v8608_v58 = vld [vmem:[%s11135_s6 + $0x2e4] sm:$0xf]  ;;  %v7450_v38 = vld [vmem:[%s11135_s6 + $0x2c8] sm:$0xf]  ;;  %v8607_v59 = vld [vmem:[%s11135_s6 + $0x2d4] sm:$0xf0] }
0x1157   :  { %v3465_v40 = vmul.f32 %v3454_v37, %v10181_v3  ;;  %v8591_v3 = vld [vmem:[%s11137_s8 + $0x4d8] sm:$0xff]  ;;  %v7463_v16 = vor.u32 %v8608_v58, %v7460_v11  ;;  %v7451_v37 = vor.u32 %v8607_v59, %v7450_v38  ;;  %v8641_v38 = vld [vmem:[%s11137_s8 + $0x5e8] sm:$0xff]  ;;  %v8616_v59 = vld [vmem:[%s11137_s8 + $0x520] sm:$0xff] }
0x1158   :  { %v3458_v39 = vmul.f32 0.5, %v3457_v63  ;;  %3956 = vmatpush.bf16.msra.mxu0 %v8591_v3  ;;  %v7410_v63 = vld [vmem:[%s11135_s6 + $0x280] sm:$0xf]  ;;  %v7130_v3 = vld [vmem:[%s11136_s7 + $0x10] sm:$0xf] }
0x1159   :  { %v3468_v42 = vmul.f32 %v3467_v48, %v3465_v40  ;;  %v3497_v36 = vperm.slane %v7130_v3, 3  ;;  %v3495_v35 = vperm.slane %v7130_v3, 1  ;;  %v3496_v62 = vperm.slane %v7130_v3, 2 }
0x115a   :  { %v3459_v4 = vsub.f32 1.5, %v3458_v39  ;;  %v8598_v39 = vld [vmem:[%s11135_s6 + $0x28c] sm:$0xf0] }
0x115b   :  { %v10336_v6 = vadd.f32 %v3470_v43, %v3468_v42  ;;  %v7411_v40 = vor.u32 %v8598_v39, %v7410_v63  ;;  %v7434_v42 = vld [vmem:[%s11135_s6 + $0x2a8] sm:$0xf]  ;;  %v8627_v63 = vld [vmem:[%s11137_s8 + $0x578] sm:$0xff]  ;;  %v8640_v39 = vld [vmem:[%s11137_s8 + $0x5e0] sm:$0xff] }
0x115c   :  { %v3460_v13 = vmul.f32 %v8807_v33, %v3459_v4  ;;  %3957 = vmatpush.bf16.msra.mxu0 %v8590_v50  ;;  %v8597_v4 = vld [vmem:[%s11135_s6 + $0x28c] sm:$0xf]  ;;  %v7418_v50 = vld [vmem:[%s11135_s6 + $0x288] sm:$0xf] }
0x115e   :  { %v3464_v49 = vsel %vm3463_vm8, %v8807_v33, %v3460_v13  ;;  %v7447_v33 = vor.u32 %v8604_v30, %v7444_v31  ;;  %v8643_v30 = vld [vmem:[%s11137_s8 + $0x5f8] sm:$0xff]  ;;  %v8618_v31 = vld [vmem:[%s11137_s8 + $0x530] sm:$0xff] }
0x115f   :  { %v3466_v18 = vmul.f32 %v3464_v49, %v10187_v24  ;;  %v8576_v24 = vld [vmem:[%s11137_s8 + $0x460] sm:$0xff] }
0x1160   :  { %3927 = vmatpush.bf16.msrb.mxu2 %v8576_v24  ;;  %3958 = vmatpush.bf16.msra.mxu0 %v8589_v21  ;;  %v8600_v49 = vld [vmem:[%s11135_s6 + $0x2a4] sm:$0xf]  ;;  %v7419_v21 = vor.u32 %v8599_v41, %v7418_v50  ;;  %v8631_v50 = vld [vmem:[%s11137_s8 + $0x598] sm:$0xff]  ;;  %v8658_v41 = vld [vmem:[%s11135_s6 + $0x36c] sm:$0xf0] }
0x1161   :  { %v3469_v45 = vmul.f32 %v3467_v48, %v3466_v18  ;;  %v7420_v48 = vld [vmem:[%s11135_s6 + $0x298] sm:$0xf0] }
0x1162   :  { %v7423_v13 = vor.u32 %v8597_v4, %v7420_v48  ;;  %v8615_v4 = vld [vmem:[%s11137_s8 + $0x518] sm:$0xff]  ;;  %v8626_v48 = vld [vmem:[%s11137_s8 + $0x570] sm:$0xff] }
0x1163   :  { %v10338_v46 = vadd.f32 %v3470_v43, %v3469_v45  ;;  %v7428_v43 = vld [vmem:[%s11135_s6 + $0x2b0] sm:$0xf0]  ;;  %v8603_v45 = vld [vmem:[%s11135_s6 + $0x2b4] sm:$0xf0] }
0x1164   :  { %3928 = vmatpush.bf16.msrb.mxu2 %v8575_v51  ;;  %3959 = vmatpush.bf16.msra.mxu0 %v8588_v54  ;;  %v7431_v18 = vor.u32 %v8600_v49, %v7428_v43  ;;  %v7435_v34 = vor.u32 %v8603_v45, %v7434_v42  ;;  %v8614_v49 = vld [vmem:[%s11137_s8 + $0x510] sm:$0xff]  ;;  %v8625_v43 = vld [vmem:[%s11137_s8 + $0x568] sm:$0xff] }
0x1165   :  { %v10342_v47 = vpack.c.bf16 %v10338_v46, %v10336_v6  ;;  %v8633_v42 = vld [vmem:[%s11137_s8 + $0x5a8] sm:$0xff] }
0x1166   :  { %v8613_v45 = vld [vmem:[%s11137_s8 + $0x508] sm:$0xff] }
0x1167   :  { %7195 = vmatmul.msk.bf16.vlgmr.msra.gmra.mxu1 %vm98_vm0, %v10342_v47  ;;  %7196 = vmatmul.msk.bf16.vlgmr.msra.gmra.mxu2 %vm98_vm0, %v10342_v47 }
0x1168   :  { %7197 = vmatmul.msk.bf16.vlgmr.msra.gmra.mxu3 %vm98_vm0, %v10342_v47  ;;  %7198 = vmatmul.msk.bf16.vlgmr.msrb.gmra.mxu0 %vm98_vm0, %v10342_v47 }
0x1169   :  { %3929 = vmatpush.bf16.msrb.mxu2 %v8574_v52  ;;  %4081 = vmatpush.bf16.msra.mxu1 %v7459_v61  ;;  %v3494_v52 = vperm.slane %v7130_v3, 0  ;;  %v8632_v3 = vld [vmem:[%s11137_s8 + $0x5a0] sm:$0xff] }
0x116a   :  { %4123 = vmatpush.bf16.msrb.mxu0 %v7471_v0  ;;  %4109 = vmatpush.bf16.msra.mxu3 %v7467_v9 }
0x116d   :  { %3930 = vmatpush.bf16.msrb.mxu2 %v8573_v57  ;;  %4082 = vmatpush.bf16.msra.mxu1 %v7443_v8 }
0x116e   :  { %4124 = vmatpush.bf16.msrb.mxu0 %v7455_v10  ;;  %4110 = vmatpush.bf16.msra.mxu3 %v7451_v37  ;;  %v8635_v37 = vld [vmem:[%s11137_s8 + $0x5b8] sm:$0xff] }
0x1171   :  { %3931 = vmatpush.bf16.msrb.mxu2 %v8572_v1  ;;  %4083 = vmatpush.bf16.msra.mxu1 %v7427_v27 }
0x1172   :  { %4125 = vmatpush.bf16.msrb.mxu0 %v7439_v32  ;;  %4111 = vmatpush.bf16.msra.mxu3 %v7435_v34  ;;  %v8642_v32 = vld [vmem:[%s11137_s8 + $0x5f0] sm:$0xff]  ;;  %v8624_v34 = vld [vmem:[%s11137_s8 + $0x560] sm:$0xff] }
0x1175   :  { %4095 = vmatpush.bf16.msra.mxu2 %v7463_v16  ;;  %4084 = vmatpush.bf16.msra.mxu1 %v7411_v40  ;;  %v8634_v40 = vld [vmem:[%s11137_s8 + $0x5b0] sm:$0xff] }
0x1176   :  { %4126 = vmatpush.bf16.msrb.mxu0 %v7423_v13  ;;  %4112 = vmatpush.bf16.msra.mxu3 %v7419_v21  ;;  %v8639_v13 = vld [vmem:[%s11137_s8 + $0x5d8] sm:$0xff]  ;;  %v8657_v21 = vld [vmem:[%s11135_s6 + $0x36c] sm:$0xf] }
0x1179   :  { %4096 = vmatpush.bf16.msra.mxu2 %v7447_v33  ;;  %v8617_v33 = vld [vmem:[%s11137_s8 + $0x528] sm:$0xff] }
0x117d   :  { %4097 = vmatpush.bf16.msra.mxu2 %v7431_v18  ;;  %v8638_v18 = vld [vmem:[%s11137_s8 + $0x5d0] sm:$0xff] }
0x1181   :  { %4098 = vmatpush.bf16.msra.mxu2 %v7415_v44  ;;  %v7735_v44 = vld [vmem:[%s11135_s6 + $0x360] sm:$0xf] }
0x11e4   :  { %v3594_v24 = vpop.f32.mrf.mxu1 }
0x11e5   :  { %v3636_v51 = vpop.f32.mrf.mxu0  ;;  %v3595_v54 = vadd.f32 %v3594_v24, %v3494_v52  ;;  %v8637_v24 = vld [vmem:[%s11137_s8 + $0x5c8] sm:$0xff] }
0x11e6   :  { %v3637_v56 = vadd.f32 %v3636_v51, %v3497_v36  ;;  %v8636_v51 = vld [vmem:[%s11137_s8 + $0x5c0] sm:$0xff] }
0x11e7   :  { %v3641_v1 = vmax.f32 %v3595_v54, 0.0  ;;  %v7745_v54 = vld [vmem:[%s11135_s6 + $0x378] sm:$0xf0] }
0x11e8   :  { %v3644_v5 = vmax.f32 %v3637_v56, 0.0  ;;  %v7748_v56 = vor.u32 %v8657_v21, %v7745_v54  ;;  %v8644_v21 = vld [vmem:[%s11135_s6 + $0x304] sm:$0xf] }
0x11ea   :  { %v3608_v53 = vpop.f32.mrf.mxu2 }
0x11eb   :  { %v3622_v57 = vpop.f32.mrf.mxu3  ;;  %v3609_v7 = vadd.f32 %v3608_v53, %v3495_v35  ;;  %v7736_v53 = vor.u32 %v8658_v41, %v7735_v44 }
0x11ec   :  { %v3596_v23 = vpop.f32.mrf.mxu1  ;;  %v3623_v20 = vadd.f32 %v3622_v57, %v3496_v62 }
0x11ed   :  { %v3597_v60 = vadd.f32 %v3596_v23, %v3494_v52  ;;  %v3638_v61 = vpop.f32.mrf.mxu0  ;;  %v3642_v17 = vmax.f32 %v3609_v7, 0.0  ;;  %v8622_v52 = vld [vmem:[%s11137_s8 + $0x550] sm:$0xff] }
0x11ee   :  { %v3639_v0 = vadd.f32 %v3638_v61, %v3497_v36  ;;  %v3643_v19 = vmax.f32 %v3623_v20, 0.0  ;;  %v8630_v36 = vld [vmem:[%s11137_s8 + $0x590] sm:$0xff]  ;;  %v8653_v61 = vld [vmem:[%s11135_s6 + $0x34c] sm:$0xf]  ;;  %v8620_v20 = vld [vmem:[%s11137_s8 + $0x540] sm:$0xff] }
0x11ef   :  { %v3645_v2 = vmax.f32 %v3597_v60, 0.0  ;;  %v8654_v60 = vld [vmem:[%s11135_s6 + $0x34c] sm:$0xf0] }
0x11f0   :  { %v3648_v14 = vmax.f32 %v3639_v0, 0.0  ;;  %v8629_v0 = vld [vmem:[%s11137_s8 + $0x588] sm:$0xff]  ;;  %v8650_v7 = vld [vmem:[%s11135_s6 + $0x32c] sm:$0xf0] }
0x11f1   :  { %v3649_v8 = vpack.c.bf16 %v3645_v2, %v3641_v1  ;;  %v7729_v2 = vld [vmem:[%s11135_s6 + $0x358] sm:$0xf0] }
0x11f2   :  { %v3652_v10 = vpack.c.bf16 %v3648_v14, %v3644_v5  ;;  %v3610_v58 = vpop.f32.mrf.mxu2  ;;  %v7732_v5 = vor.u32 %v8653_v61, %v7729_v2  ;;  %v7703_v14 = vld [vmem:[%s11135_s6 + $0x320] sm:$0xf] }
0x11f3   :  { %v3611_v11 = vadd.f32 %v3610_v58, %v3495_v35  ;;  %v3624_v12 = vpop.f32.mrf.mxu3  ;;  %3918 = vmatmul.bf16.vlgmr.msrb.gmra.mxu1 %v3649_v8  ;;  %v7719_v35 = vld [vmem:[%s11135_s6 + $0x340] sm:$0xf]  ;;  %v8649_v8 = vld [vmem:[%s11135_s6 + $0x32c] sm:$0xf]  ;;  %v7704_v58 = vor.u32 %v8650_v7, %v7703_v14 }
0x11f4   :  { %v3625_v16 = vadd.f32 %v3624_v12, %v3496_v62  ;;  %3960 = vmatmul.bf16.vlgmr.msra.gmra.mxu0 %v3652_v10  ;;  %4402 = vmatpush.bf16.msrb.mxu1 %v8619_v28  ;;  %v8621_v62 = vld [vmem:[%s11137_s8 + $0x548] sm:$0xff]  ;;  %v7720_v1 = vor.u32 %v8654_v60, %v7719_v35  ;;  %v8628_v10 = vld [vmem:[%s11137_s8 + $0x580] sm:$0xff] }
0x11f5   :  { %v3646_v9 = vmax.f32 %v3611_v11, 0.0  ;;  %4444 = vmatpush.bf16.msra.mxu0 %v8643_v30  ;;  %v7713_v11 = vld [vmem:[%s11135_s6 + $0x338] sm:$0xf0]  ;;  %v7743_v28 = vld [vmem:[%s11135_s6 + $0x368] sm:$0xf] }
0x11f6   :  { %v3647_v25 = vmax.f32 %v3625_v16, 0.0  ;;  %v7716_v16 = vor.u32 %v8649_v8, %v7713_v11  ;;  %v8659_v30 = vld [vmem:[%s11135_s6 + $0x374] sm:$0xf0] }
0x11f7   :  { %v3650_v26 = vpack.c.bf16 %v3646_v9, %v3642_v17  ;;  %v7687_v9 = vld [vmem:[%s11135_s6 + $0x300] sm:$0xf] }
0x11f8   :  { %v3651_v27 = vpack.c.bf16 %v3647_v25, %v3643_v19  ;;  %4403 = vmatpush.bf16.msrb.mxu1 %v8618_v31  ;;  %v8646_v19 = vld [vmem:[%s11135_s6 + $0x30c] sm:$0xf0]  ;;  %v8656_v25 = vld [vmem:[%s11135_s6 + $0x364] sm:$0xf] }
0x11f9   :  { %3932 = vmatmul.bf16.vlgmr.msrb.gmra.mxu2 %v3650_v26  ;;  %4445 = vmatpush.bf16.msra.mxu0 %v8642_v32  ;;  %v7688_v26 = vor.u32 %v8646_v19, %v7687_v9 }
0x11fa   :  { %3946 = vmatmul.bf16.vlgmr.msrb.gmra.mxu3 %v3651_v27  ;;  %4416 = vmatpush.bf16.msrb.mxu2 %v8627_v63  ;;  %v7737_v27 = vld [vmem:[%s11135_s6 + $0x370] sm:$0xf0] }
0x11fb   :  { %4430 = vmatpush.bf16.msrb.mxu3 %v8635_v37  ;;  %v7740_v32 = vor.u32 %v8656_v25, %v7737_v27 }
0x11fc   :  { %4404 = vmatpush.bf16.msrb.mxu1 %v8617_v33  ;;  %v7744_v33 = vor.u32 %v8659_v30, %v7743_v28 }
0x11fd   :  { %4446 = vmatpush.bf16.msra.mxu0 %v8641_v38  ;;  %v8645_v38 = vld [vmem:[%s11135_s6 + $0x30c] sm:$0xf] }
0x11fe   :  { %4417 = vmatpush.bf16.msrb.mxu2 %v8626_v48  ;;  %v7721_v48 = vld [vmem:[%s11135_s6 + $0x350] sm:$0xf0] }
0x11ff   :  { %4431 = vmatpush.bf16.msrb.mxu3 %v8634_v40  ;;  %v7727_v40 = vld [vmem:[%s11135_s6 + $0x348] sm:$0xf] }
0x1200   :  { %4405 = vmatpush.bf16.msrb.mxu1 %v8616_v59  ;;  %v7697_v59 = vld [vmem:[%s11135_s6 + $0x318] sm:$0xf0] }
0x1201   :  { %4447 = vmatpush.bf16.msra.mxu0 %v8640_v39  ;;  %v7700_v39 = vor.u32 %v8645_v38, %v7697_v59 }
0x1202   :  { %4418 = vmatpush.bf16.msrb.mxu2 %v8625_v43 }
0x1203   :  { %7472 = vmatmul.msk.bf16.vlgmr.msra.gmra.mxu1 %vm98_vm0, %v10342_v47  ;;  %4432 = vmatpush.bf16.msrb.mxu3 %v8633_v42  ;;  %v8655_v42 = vld [vmem:[%s11135_s6 + $0x354] sm:$0xf0] }
0x1204   :  { %7475 = vmatmul.msk.bf16.vlgmr.msrb.gmra.mxu0 %vm98_vm0, %v10342_v47  ;;  %4406 = vmatpush.bf16.msrb.mxu1 %v8615_v4  ;;  %v8652_v4 = vld [vmem:[%s11135_s6 + $0x344] sm:$0xf] }
0x1205   :  { %4448 = vmatpush.bf16.msra.mxu0 %v8639_v13  ;;  %v7724_v43 = vor.u32 %v8652_v4, %v7721_v48  ;;  %v8691_v4 = vld [vmem:[%s11137_s8 + $0x6f8] sm:$0xff]  ;;  %v8666_v48 = vld [vmem:[%s11137_s8 + $0x630] sm:$0xff] }
0x1206   :  { %4419 = vmatpush.bf16.msrb.mxu2 %v8624_v34  ;;  %v8648_v34 = vld [vmem:[%s11135_s6 + $0x324] sm:$0xf] }
0x1207   :  { %4433 = vmatpush.bf16.msrb.mxu3 %v8632_v3  ;;  %v7705_v3 = vld [vmem:[%s11135_s6 + $0x330] sm:$0xf0] }
0x1208   :  { %4407 = vmatpush.bf16.msrb.mxu1 %v8614_v49  ;;  %v7407_v49 = vld [vmem:[%s11136_s7 + $0x14] sm:$0xf]  ;;  %v7708_v44 = vor.u32 %v8648_v34, %v7705_v3  ;;  %v8675_v34 = vld [vmem:[%s11137_s8 + $0x678] sm:$0xff] }
0x1209   :  { %7473 = vmatmul.msk.bf16.vlgmr.msra.gmra.mxu2 %vm98_vm0, %v10342_v47  ;;  %4449 = vmatpush.bf16.msra.mxu0 %v8638_v18  ;;  %v3992_v54 = vperm.slane %v7407_v49, 3  ;;  %v3990_v19 = vperm.slane %v7407_v49, 1  ;;  %v3991_v25 = vperm.slane %v7407_v49, 2  ;;  %v8683_v3 = vld [vmem:[%s11137_s8 + $0x6b8] sm:$0xff] }
0x120a   :  { %7474 = vmatmul.msk.bf16.vlgmr.msra.gmra.mxu3 %vm98_vm0, %v10342_v47  ;;  %4420 = vmatpush.bf16.msrb.mxu2 %v8623_v29 }
0x120b   :  { %4434 = vmatpush.bf16.msrb.mxu3 %v8631_v50  ;;  %v8651_v50 = vld [vmem:[%s11135_s6 + $0x334] sm:$0xf0] }
0x120c   :  { %4408 = vmatpush.bf16.msrb.mxu1 %v8613_v45  ;;  %v7728_v45 = vor.u32 %v8655_v42, %v7727_v40  ;;  %v8690_v40 = vld [vmem:[%s11137_s8 + $0x6f0] sm:$0xff]  ;;  %v8688_v42 = vld [vmem:[%s11137_s8 + $0x6e0] sm:$0xff] }
0x120d   :  { %4450 = vmatpush.bf16.msra.mxu0 %v8637_v24  ;;  %v7711_v24 = vld [vmem:[%s11135_s6 + $0x328] sm:$0xf] }
0x120e   :  { %4421 = vmatpush.bf16.msrb.mxu2 %v8622_v52  ;;  %v7712_v41 = vor.u32 %v8651_v50, %v7711_v24  ;;  %v7689_v52 = vld [vmem:[%s11135_s6 + $0x310] sm:$0xf0] }
0x120f   :  { %4435 = vmatpush.bf16.msrb.mxu3 %v8630_v36  ;;  %v7695_v36 = vld [vmem:[%s11135_s6 + $0x308] sm:$0xf]  ;;  %v7692_v35 = vor.u32 %v8644_v21, %v7689_v52  ;;  %v8662_v24 = vld [vmem:[%s11137_s8 + $0x610] sm:$0xff] }
0x1210   :  { %4409 = vmatpush.bf16.msrb.mxu1 %v8612_v15  ;;  %v8674_v50 = vld [vmem:[%s11137_s8 + $0x670] sm:$0xff]  ;;  %v8673_v21 = vld [vmem:[%s11137_s8 + $0x668] sm:$0xff] }
0x1211   :  { %4451 = vmatpush.bf16.msra.mxu0 %v8636_v51  ;;  %v3989_v51 = vperm.slane %v7407_v49, 0  ;;  %v8689_v49 = vld [vmem:[%s11137_s8 + $0x6e8] sm:$0xff] }
0x1212   :  { %4422 = vmatpush.bf16.msrb.mxu2 %v8621_v62  ;;  %v8681_v52 = vld [vmem:[%s11137_s8 + $0x6a8] sm:$0xff] }
0x1213   :  { %4436 = vmatpush.bf16.msrb.mxu3 %v8629_v0 }
0x1214   :  { %4572 = vmatpush.bf16.msra.mxu1 %v7736_v53  ;;  %v8647_v53 = vld [vmem:[%s11135_s6 + $0x314] sm:$0xf0] }
0x1215   :  { %4614 = vmatpush.bf16.msrb.mxu0 %v7748_v56  ;;  %v7696_v60 = vor.u32 %v8647_v53, %v7695_v36  ;;  %v8660_v36 = vld [vmem:[%s11137_s8 + $0x600] sm:$0xff] }
0x1216   :  { %4423 = vmatpush.bf16.msrb.mxu2 %v8620_v20  ;;  %v8684_v53 = vld [vmem:[%s11137_s8 + $0x6c0] sm:$0xff] }
0x1217   :  { %4437 = vmatpush.bf16.msrb.mxu3 %v8628_v10 }
0x1218   :  { %4573 = vmatpush.bf16.msra.mxu1 %v7720_v1 }
0x1219   :  { %4615 = vmatpush.bf16.msrb.mxu0 %v7732_v5 }
0x121a   :  { %4586 = vmatpush.bf16.msra.mxu2 %v7740_v32 }
0x121b   :  { %4600 = vmatpush.bf16.msra.mxu3 %v7744_v33 }
0x121c   :  { %4574 = vmatpush.bf16.msra.mxu1 %v7704_v58 }
0x121d   :  { %4616 = vmatpush.bf16.msrb.mxu0 %v7716_v16 }
0x121e   :  { %4587 = vmatpush.bf16.msra.mxu2 %v7724_v43  ;;  %v8664_v43 = vld [vmem:[%s11137_s8 + $0x620] sm:$0xff] }
0x121f   :  { %4601 = vmatpush.bf16.msra.mxu3 %v7728_v45  ;;  %v8687_v45 = vld [vmem:[%s11137_s8 + $0x6d8] sm:$0xff] }
0x1220   :  { %4575 = vmatpush.bf16.msra.mxu1 %v7688_v26 }
0x1221   :  { %4617 = vmatpush.bf16.msrb.mxu0 %v7700_v39  ;;  %v8667_v39 = vld [vmem:[%s11137_s8 + $0x638] sm:$0xff] }
0x1222   :  { %4588 = vmatpush.bf16.msra.mxu2 %v7708_v44  ;;  %v8661_v44 = vld [vmem:[%s11137_s8 + $0x608] sm:$0xff] }
0x1223   :  { %4602 = vmatpush.bf16.msra.mxu3 %v7712_v41  ;;  %v8685_v41 = vld [vmem:[%s11137_s8 + $0x6c8] sm:$0xff] }
0x1226   :  { %4589 = vmatpush.bf16.msra.mxu2 %v7692_v35  ;;  %v8705_v35 = vld [vmem:[%s11135_s6 + $0x3ec] sm:$0xf] }
0x1227   :  { %4603 = vmatpush.bf16.msra.mxu3 %v7696_v60 }
0x1270   :  { %v3919_v57 = vpop.f32.mrf.mxu1 }
0x1271   :  { %v3961_v23 = vpop.f32.mrf.mxu0 }
0x1278   :  { %v3921_v12 = vpop.f32.mrf.mxu1 }
0x1279   :  { %v3963_v17 = vpop.f32.mrf.mxu0 }
0x127c   :  { %v3933_v31 = vpop.f32.mrf.mxu2 }
0x127d   :  { %v3934_v63 = vadd.f32 %v3933_v31, %v3919_v57  ;;  %v3947_v37 = vpop.f32.mrf.mxu3 }
0x127f   :  { %v3948_v13 = vadd.f32 %v3947_v37, %v3934_v63 }
0x1280   :  { %v4086_v18 = vpop.f32.mrf.mxu1 }
0x1281   :  { %v10693_v15 = vadd.f32 %v3961_v23, %v3948_v13  ;;  %v4128_v29 = vpop.f32.mrf.mxu0  ;;  %v4087_v61 = vadd.f32 %v4086_v18, %v3989_v51  ;;  %v8665_v13 = vld [vmem:[%s11137_s8 + $0x628] sm:$0xff]  ;;  %v8663_v18 = vld [vmem:[%s11137_s8 + $0x618] sm:$0xff] }
0x1282   :  { %v4129_v0 = vadd.f32 %v4128_v29, %v3992_v54  ;;  %v8686_v29 = vld [vmem:[%s11137_s8 + $0x6d0] sm:$0xff] }
0x1283   :  { %v4133_v8 = vmax.f32 %v4087_v61, 0.0  ;;  %v8022_v61 = vld [vmem:[%s11135_s6 + $0x3f8] sm:$0xf0] }
0x1284   :  { %v3935_v57 = vpop.f32.mrf.mxu2  ;;  %v4136_v10 = vmax.f32 %v4129_v0, 0.0  ;;  %v8025_v0 = vor.u32 %v8705_v35, %v8022_v61  ;;  %v7982_v35 = vld [vmem:[%s11135_s6 + $0x3b0] sm:$0xf0]  ;;  %v7988_v61 = vld [vmem:[%s11135_s6 + $0x3a8] sm:$0xf] }
0x1285   :  { %v3936_v56 = vadd.f32 %v3935_v57, %v3921_v12  ;;  %v3949_v23 = vpop.f32.mrf.mxu3  ;;  %v8680_v57 = vld [vmem:[%s11137_s8 + $0x6a0] sm:$0xff] }
0x1287   :  { %v3950_v62 = vadd.f32 %v3949_v23, %v3936_v56  ;;  %v8012_v56 = vld [vmem:[%s11135_s6 + $0x3e0] sm:$0xf]  ;;  %v8706_v23 = vld [vmem:[%s11135_s6 + $0x3ec] sm:$0xf0] }
0x1288   :  { %v4088_v1 = vpop.f32.mrf.mxu1  ;;  %v8013_v60 = vor.u32 %v8706_v23, %v8012_v56  ;;  %v8696_v23 = vld [vmem:[%s11135_s6 + $0x3a4] sm:$0xf] }
0x1289   :  { %v10710_v2 = vadd.f32 %v3963_v17, %v3950_v62  ;;  %v4089_v5 = vadd.f32 %v4088_v1, %v3989_v51  ;;  %v4130_v14 = vpop.f32.mrf.mxu0  ;;  %v8682_v51 = vld [vmem:[%s11137_s8 + $0x6b0] sm:$0xff] }
0x128a   :  { %v4131_v7 = vadd.f32 %v4130_v14, %v3992_v54  ;;  %v8672_v54 = vld [vmem:[%s11137_s8 + $0x660] sm:$0xff]  ;;  %v8679_v14 = vld [vmem:[%s11137_s8 + $0x698] sm:$0xff] }
0x128b   :  { %v4137_v20 = vmax.f32 %v4089_v5, 0.0  ;;  %v8671_v5 = vld [vmem:[%s11137_s8 + $0x658] sm:$0xff] }
0x128c   :  { %v4140_v58 = vmax.f32 %v4131_v7, 0.0  ;;  %v4100_v11 = vpop.f32.mrf.mxu2  ;;  %v7996_v7 = vld [vmem:[%s11135_s6 + $0x3c0] sm:$0xf] }
0x128d   :  { %v4141_v12 = vpack.c.bf16 %v4137_v20, %v4133_v8  ;;  %v4114_v16 = vpop.f32.mrf.mxu3  ;;  %v4101_v26 = vadd.f32 %v4100_v11, %v3990_v19  ;;  %v8702_v8 = vld [vmem:[%s11135_s6 + $0x3cc] sm:$0xf0] }
0x128e   :  { %v4144_v9 = vpack.c.bf16 %v4140_v58, %v4136_v10  ;;  %v4115_v17 = vadd.f32 %v4114_v16, %v3991_v25  ;;  %v7997_v20 = vor.u32 %v8702_v8, %v7996_v7  ;;  %v8701_v10 = vld [vmem:[%s11135_s6 + $0x3cc] sm:$0xf]  ;;  %v8006_v58 = vld [vmem:[%s11135_s6 + $0x3d8] sm:$0xf0]  ;;  %v8678_v16 = vld [vmem:[%s11137_s8 + $0x690] sm:$0xff]  ;;  %v7985_v7 = vor.u32 %v8696_v23, %v7982_v35 }
0x128f   :  { %4410 = vmatmul.bf16.vlgmr.msrb.gmra.mxu1 %v4141_v12  ;;  %v4134_v32 = vmax.f32 %v4101_v26, 0.0  ;;  %v8009_v11 = vor.u32 %v8701_v10, %v8006_v58  ;;  %v8670_v12 = vld [vmem:[%s11137_s8 + $0x650] sm:$0xff]  ;;  %v8692_v58 = vld [vmem:[%s11135_s6 + $0x384] sm:$0xf]  ;;  %v8711_v23 = vld [vmem:[%s11137_s8 + $0x718] sm:$0xff] }
0x1290   :  { %4452 = vmatmul.bf16.vlgmr.msra.gmra.mxu0 %v4144_v9  ;;  %v4135_v38 = vmax.f32 %v4115_v17, 0.0  ;;  %4893 = vmatpush.bf16.msrb.mxu1 %v8667_v39  ;;  %v7980_v9 = vld [vmem:[%s11135_s6 + $0x3a0] sm:$0xf]  ;;  %v7990_v17 = vld [vmem:[%s11135_s6 + $0x3b8] sm:$0xf0] }
0x1291   :  { %4935 = vmatpush.bf16.msra.mxu0 %v8691_v4  ;;  %v8668_v4 = vld [vmem:[%s11137_s8 + $0x640] sm:$0xff]  ;;  %v8735_v35 = vld [vmem:[%s11137_s8 + $0x7d8] sm:$0xff] }
0x1294   :  { %v4102_v27 = vpop.f32.mrf.mxu2  ;;  %4894 = vmatpush.bf16.msrb.mxu1 %v8666_v48  ;;  %v8676_v48 = vld [vmem:[%s11137_s8 + $0x680] sm:$0xff] }
0x1295   :  { %v4103_v28 = vadd.f32 %v4102_v27, %v3990_v19  ;;  %v4116_v30 = vpop.f32.mrf.mxu3  ;;  %4936 = vmatpush.bf16.msra.mxu0 %v8690_v40  ;;  %v8698_v19 = vld [vmem:[%s11135_s6 + $0x3ac] sm:$0xf0]  ;;  %v10875_v40 = vld [vmem:[%s11136_s7 + $0x18] sm:$0xf] }
0x1296   :  { %v4117_v31 = vadd.f32 %v4116_v30, %v3991_v25  ;;  %v8697_v25 = vld [vmem:[%s11135_s6 + $0x3ac] sm:$0xf]  ;;  %v7981_v26 = vor.u32 %v8698_v19, %v7980_v9  ;;  %v8695_v9 = vld [vmem:[%s11135_s6 + $0x394] sm:$0xf0] }
0x1297   :  { %v4138_v33 = vmax.f32 %v4103_v28, 0.0  ;;  %v7993_v28 = vor.u32 %v8697_v25, %v7990_v17 }
0x1298   :  { %v4139_v59 = vmax.f32 %v4117_v31, 0.0  ;;  %4895 = vmatpush.bf16.msrb.mxu1 %v8665_v13  ;;  %v8669_v31 = vld [vmem:[%s11137_s8 + $0x648] sm:$0xff] }
0x1299   :  { %v4142_v63 = vpack.c.bf16 %v4138_v33, %v4134_v32  ;;  %4937 = vmatpush.bf16.msra.mxu0 %v8689_v49  ;;  %v8677_v32 = vld [vmem:[%s11137_s8 + $0x688] sm:$0xff]  ;;  %v7964_v33 = vld [vmem:[%s11135_s6 + $0x380] sm:$0xf]  ;;  %v8704_v49 = vld [vmem:[%s11135_s6 + $0x3e4] sm:$0xf] }
0x129a   :  { %v4143_v37 = vpack.c.bf16 %v4139_v59, %v4135_v38  ;;  %v8694_v38 = vld [vmem:[%s11135_s6 + $0x38c] sm:$0xf0]  ;;  %v8693_v59 = vld [vmem:[%s11135_s6 + $0x38c] sm:$0xf] }
0x129b   :  { %4424 = vmatmul.bf16.vlgmr.msrb.gmra.mxu2 %v4142_v63  ;;  %v7965_v63 = vor.u32 %v8694_v38, %v7964_v33 }
0x129c   :  { %4438 = vmatmul.bf16.vlgmr.msrb.gmra.mxu3 %v4143_v37  ;;  %4896 = vmatpush.bf16.msrb.mxu1 %v8664_v43  ;;  %v7974_v37 = vld [vmem:[%s11135_s6 + $0x398] sm:$0xf0]  ;;  %v8014_v43 = vld [vmem:[%s11135_s6 + $0x3f0] sm:$0xf0] }
0x129d   :  { %4938 = vmatpush.bf16.msra.mxu0 %v8688_v42  ;;  %4907 = vmatpush.bf16.msrb.mxu2 %v8675_v34  ;;  %v7977_v39 = vor.u32 %v8693_v59, %v7974_v37  ;;  %v8020_v42 = vld [vmem:[%s11135_s6 + $0x3e8] sm:$0xf]  ;;  %v8707_v34 = vld [vmem:[%s11135_s6 + $0x3f4] sm:$0xf0] }
0x129e   :  { %4921 = vmatpush.bf16.msrb.mxu3 %v8683_v3 }
0x129f   :  { %7749 = vmatmul.msk.bf16.vlgmr.msra.gmra.mxu1 %vm98_vm0, %v10342_v47 }
0x12a0   :  { %7752 = vmatmul.msk.bf16.vlgmr.msrb.gmra.mxu0 %vm98_vm0, %v10342_v47  ;;  %4897 = vmatpush.bf16.msrb.mxu1 %v8663_v18 }
0x12a1   :  { %4939 = vmatpush.bf16.msra.mxu0 %v8687_v45  ;;  %4908 = vmatpush.bf16.msrb.mxu2 %v8674_v50  ;;  %v8017_v45 = vor.u32 %v8704_v49, %v8014_v43  ;;  %v7998_v50 = vld [vmem:[%s11135_s6 + $0x3d0] sm:$0xf0]  ;;  %v4481_v43 = vperm.slane %v10875_v40, 1 }
0x12a2   :  { %4922 = vmatpush.bf16.msrb.mxu3 %v8682_v51  ;;  %v8004_v51 = vld [vmem:[%s11135_s6 + $0x3c8] sm:$0xf] }
0x12a4   :  { %4898 = vmatpush.bf16.msrb.mxu1 %v8662_v24  ;;  %v8021_v24 = vor.u32 %v8707_v34, %v8020_v42  ;;  %v4482_v42 = vperm.slane %v10875_v40, 2 }
0x12a5   :  { %4940 = vmatpush.bf16.msra.mxu0 %v8686_v29  ;;  %4909 = vmatpush.bf16.msrb.mxu2 %v8673_v21  ;;  %v8700_v29 = vld [vmem:[%s11135_s6 + $0x3c4] sm:$0xf]  ;;  %v4480_v21 = vperm.slane %v10875_v40, 0 }
0x12a6   :  { %4923 = vmatpush.bf16.msrb.mxu3 %v8681_v52 }
0x12a8   :  { %4899 = vmatpush.bf16.msrb.mxu1 %v8661_v44  ;;  %v10901_v44 = vld [vmem:[%s11134_s5 + $0x8] sm:$0x3f] }
0x12a9   :  { %4941 = vmatpush.bf16.msra.mxu0 %v8685_v41  ;;  %4910 = vmatpush.bf16.msrb.mxu2 %v8672_v54  ;;  %v3966_v41 = vperm.slane %v10901_v44, 3  ;;  %v8703_v54 = vld [vmem:[%s11135_s6 + $0x3d4] sm:$0xf0] }
0x12aa   :  { %4924 = vmatpush.bf16.msrb.mxu3 %v8680_v57  ;;  %v4483_v57 = vperm.slane %v10875_v40, 3  ;;  %v8005_v56 = vor.u32 %v8703_v54, %v8004_v51  ;;  %v8715_v40 = vld [vmem:[%s11137_s8 + $0x738] sm:$0xff]  ;;  %v8737_v54 = vld [vmem:[%s11137_s8 + $0x7e8] sm:$0xff] }
0x12ab   :  { %7750 = vmatmul.msk.bf16.vlgmr.msra.gmra.mxu2 %vm98_vm0, %v10342_v47 }
0x12ac   :  { %7751 = vmatmul.msk.bf16.vlgmr.msra.gmra.mxu3 %vm98_vm0, %v10342_v47  ;;  %4900 = vmatpush.bf16.msrb.mxu1 %v8660_v36 }
0x12ad   :  { %4942 = vmatpush.bf16.msra.mxu0 %v8684_v53  ;;  %4911 = vmatpush.bf16.msrb.mxu2 %v8671_v5  ;;  %v8001_v53 = vor.u32 %v8700_v29, %v7998_v50 }
0x12ae   :  { %4925 = vmatpush.bf16.msrb.mxu3 %v8679_v14 }
0x12b0   :  { %5063 = vmatpush.bf16.msra.mxu1 %v8013_v60 }
0x12b1   :  { %5105 = vmatpush.bf16.msrb.mxu0 %v8025_v0  ;;  %4912 = vmatpush.bf16.msrb.mxu2 %v8670_v12  ;;  %v3967_v0 = vadd.f32 %v3966_v41, %v10693_v15 }
0x12b2   :  { %4926 = vmatpush.bf16.msrb.mxu3 %v8678_v16 }
0x12b4   :  { %5064 = vmatpush.bf16.msra.mxu1 %v7997_v20 }
0x12b5   :  { %5106 = vmatpush.bf16.msrb.mxu0 %v8009_v11  ;;  %4913 = vmatpush.bf16.msrb.mxu2 %v8669_v31  ;;  %v7966_v11 = vld [vmem:[%s11135_s6 + $0x390] sm:$0xf0] }
0x12b6   :  { %4927 = vmatpush.bf16.msrb.mxu3 %v8677_v32  ;;  %v7969_v32 = vor.u32 %v8692_v58, %v7966_v11  ;;  %v8721_v58 = vld [vmem:[%s11137_s8 + $0x768] sm:$0xff] }
0x12b7   :  { %v8729_v11 = vld [vmem:[%s11137_s8 + $0x7a8] sm:$0xff] }
0x12b8   :  { %5065 = vmatpush.bf16.msra.mxu1 %v7981_v26 }
0x12b9   :  { %5107 = vmatpush.bf16.msrb.mxu0 %v7993_v28  ;;  %4914 = vmatpush.bf16.msrb.mxu2 %v8668_v4  ;;  %v3968_v4 = vadd.f32 %v3966_v41, %v10710_v2 }
0x12ba   :  { %4928 = vmatpush.bf16.msrb.mxu3 %v8676_v48 }
0x12bc   :  { %5066 = vmatpush.bf16.msra.mxu1 %v7965_v63 }
0x12bd   :  { %5108 = vmatpush.bf16.msrb.mxu0 %v7977_v39  ;;  %5077 = vmatpush.bf16.msra.mxu2 %v8017_v45 }
0x12be   :  { %5091 = vmatpush.bf16.msra.mxu3 %v8021_v24 }
0x12c1   :  { %5078 = vmatpush.bf16.msra.mxu2 %v8001_v53  ;;  %v8738_v53 = vld [vmem:[%s11137_s8 + $0x7f0] sm:$0xff] }
0x12c2   :  { %5092 = vmatpush.bf16.msra.mxu3 %v8005_v56  ;;  %v8736_v56 = vld [vmem:[%s11137_s8 + $0x7e0] sm:$0xff] }
0x12c5   :  { %5079 = vmatpush.bf16.msra.mxu2 %v7985_v7  ;;  %v8708_v7 = vld [vmem:[%s11137_s8 + $0x700] sm:$0xff] }
0x12c9   :  { %5080 = vmatpush.bf16.msra.mxu2 %v7969_v32  ;;  %v8717_v32 = vld [vmem:[%s11137_s8 + $0x748] sm:$0xff] }
0x130c   :  { %v10804_v62 = vpop.f32.mrf.mxu1 }
0x130d   :  { %v10806_v1 = vpop.f32.mrf.mxu0 }
0x1314   :  { %v10844_v27 = vpop.f32.mrf.mxu1 }
0x1315   :  { %v10846_v30 = vpop.f32.mrf.mxu0 }
0x131c   :  { %v4577_v13 = vpop.f32.mrf.mxu1 }
0x131d   :  { %v4619_v18 = vpop.f32.mrf.mxu0  ;;  %v4578_v5 = vadd.f32 %v4577_v13, %v4480_v21 }
0x131e   :  { %v4425_v3 = vpop.f32.mrf.mxu2  ;;  %v4620_v8 = vadd.f32 %v4619_v18, %v4483_v57 }
0x131f   :  { %v4426_v52 = vadd.f32 %v4425_v3, %v10804_v62  ;;  %v4439_v36 = vpop.f32.mrf.mxu3  ;;  %v8699_v62 = vld [vmem:[%s11135_s6 + $0x3b4] sm:$0xf0]  ;;  %v4624_v26 = vmax.f32 %v4578_v5, 0.0 }
0x1320   :  { %v7989_v10 = vor.u32 %v8699_v62, %v7988_v61  ;;  %v4627_v33 = vmax.f32 %v4620_v8, 0.0  ;;  %v8734_v61 = vld [vmem:[%s11137_s8 + $0x7d0] sm:$0xff]  ;;  %v8709_v62 = vld [vmem:[%s11137_s8 + $0x708] sm:$0xff]  ;;  %v8731_v5 = vld [vmem:[%s11137_s8 + $0x7b8] sm:$0xff] }
0x1321   :  { %v4440_v60 = vadd.f32 %v4439_v36, %v4426_v52  ;;  %v8739_v52 = vld [vmem:[%s11137_s8 + $0x7f8] sm:$0xff]  ;;  %v8714_v36 = vld [vmem:[%s11137_s8 + $0x730] sm:$0xff] }
0x1322   :  { %5093 = vmatpush.bf16.msra.mxu3 %v7989_v10  ;;  %v8722_v8 = vld [vmem:[%s11137_s8 + $0x770] sm:$0xff]  ;;  %v8732_v10 = vld [vmem:[%s11137_s8 + $0x7c0] sm:$0xff] }
0x1323   :  { %v4454_v14 = vadd.f32 %v10806_v1, %v4440_v60  ;;  %v7972_v1 = vld [vmem:[%s11135_s6 + $0x388] sm:$0xf]  ;;  %v8710_v60 = vld [vmem:[%s11137_s8 + $0x710] sm:$0xff] }
0x1324   :  { %v4579_v20 = vpop.f32.mrf.mxu1  ;;  %v7973_v59 = vor.u32 %v8695_v9, %v7972_v1  ;;  %v8720_v1 = vld [vmem:[%s11137_s8 + $0x760] sm:$0xff] }
0x1325   :  { %v10930_v12 = vadd.f32 %v4454_v14, %v3967_v0  ;;  %v4580_v15 = vadd.f32 %v4579_v20, %v4480_v21  ;;  %v4621_v16 = vpop.f32.mrf.mxu0  ;;  %v8723_v0 = vld [vmem:[%s11137_s8 + $0x778] sm:$0xff]  ;;  %v8733_v14 = vld [vmem:[%s11137_s8 + $0x7c8] sm:$0xff]  ;;  %v8730_v20 = vld [vmem:[%s11137_s8 + $0x7b0] sm:$0xff] }
0x1326   :  { %v4622_v19 = vadd.f32 %v4621_v16, %v4483_v57  ;;  %v4427_v25 = vpop.f32.mrf.mxu2  ;;  %5094 = vmatpush.bf16.msra.mxu3 %v7973_v59  ;;  %v8712_v57 = vld [vmem:[%s11137_s8 + $0x720] sm:$0xff] }
0x1327   :  { %v4628_v17 = vmax.f32 %v4580_v15, 0.0  ;;  %v4428_v28 = vadd.f32 %v4427_v25, %v10844_v27  ;;  %v4441_v31 = vpop.f32.mrf.mxu3  ;;  %v8728_v9 = vld [vmem:[%s11137_s8 + $0x7a0] sm:$0xff]  ;;  %v8727_v25 = vld [vmem:[%s11137_s8 + $0x798] sm:$0xff] }
0x1328   :  { %v4631_v38 = vmax.f32 %v4622_v19, 0.0  ;;  %v8719_v19 = vld [vmem:[%s11137_s8 + $0x758] sm:$0xff] }
0x1329   :  { %v4632_v63 = vpack.c.bf16 %v4628_v17, %v4624_v26  ;;  %v4442_v37 = vadd.f32 %v4441_v31, %v4428_v28  ;;  %v8718_v28 = vld [vmem:[%s11137_s8 + $0x750] sm:$0xff] }
0x132a   :  { %v4635_v39 = vpack.c.bf16 %v4631_v38, %v4627_v33  ;;  %v8726_v31 = vld [vmem:[%s11137_s8 + $0x790] sm:$0xff]  ;;  %v8725_v33 = vld [vmem:[%s11137_s8 + $0x788] sm:$0xff]  ;;  %v7961_v38 = vld [vmem:[%s11136_s7 + $0x1c] sm:$0xf] }
0x132b   :  { %v4456_v48 = vadd.f32 %v10846_v30, %v4442_v37  ;;  %4901 = vmatmul.bf16.vlgmr.msrb.gmra.mxu1 %v4632_v63  ;;  %v4971_v37 = vperm.slane %v7961_v38, 0 }
0x132c   :  { %4943 = vmatmul.bf16.vlgmr.msra.gmra.mxu0 %v4635_v39  ;;  %5384 = vmatpush.bf16.msrb.mxu1 %v8715_v40  ;;  %v8716_v39 = vld [vmem:[%s11137_s8 + $0x740] sm:$0xff] }
0x132d   :  { %v10941_v13 = vadd.f32 %v4456_v48, %v3968_v4  ;;  %5426 = vmatpush.bf16.msra.mxu0 %v8739_v52  ;;  %v8724_v4 = vld [vmem:[%s11137_s8 + $0x780] sm:$0xff]  ;;  %v4974_v48 = vperm.slane %v7961_v38, 3 }
0x132e   :  { %v4591_v27 = vpop.f32.mrf.mxu2 }
0x132f   :  { %v4605_v49 = vpop.f32.mrf.mxu3  ;;  %v4592_v18 = vadd.f32 %v4591_v27, %v4481_v43 }
0x1330   :  { %v4606_v45 = vadd.f32 %v4605_v49, %v4482_v42  ;;  %5385 = vmatpush.bf16.msrb.mxu1 %v8714_v36 }
0x1331   :  { %v4625_v29 = vmax.f32 %v4592_v18, 0.0  ;;  %5427 = vmatpush.bf16.msra.mxu0 %v8738_v53 }
0x1332   :  { %v4626_v50 = vmax.f32 %v4606_v45, 0.0 }
0x1335   :  { %5428 = vmatpush.bf16.msra.mxu0 %v8737_v54 }
0x1336   :  { %v4593_v34 = vpop.f32.mrf.mxu2 }
0x1337   :  { %v4594_v3 = vadd.f32 %v4593_v34, %v4481_v43  ;;  %v4607_v24 = vpop.f32.mrf.mxu3 }
0x1338   :  { %v4608_v2 = vadd.f32 %v4607_v24, %v4482_v42 }
0x1339   :  { %v4629_v30 = vmax.f32 %v4594_v3, 0.0  ;;  %5429 = vmatpush.bf16.msra.mxu0 %v8736_v56 }
0x133a   :  { %v4630_v51 = vmax.f32 %v4608_v2, 0.0 }
0x133b   :  { %v4633_v41 = vpack.c.bf16 %v4629_v30, %v4625_v29  ;;  %8026 = vmatmul.msk.bf16.vlgmr.msra.gmra.mxu1 %vm98_vm0, %v10342_v47 }
0x133c   :  { %v4634_v21 = vpack.c.bf16 %v4630_v51, %v4626_v50  ;;  %8029 = vmatmul.msk.bf16.vlgmr.msrb.gmra.mxu0 %vm98_vm0, %v10342_v47 }
0x133d   :  { %4915 = vmatmul.bf16.vlgmr.msrb.gmra.mxu2 %v4633_v41  ;;  %5430 = vmatpush.bf16.msra.mxu0 %v8735_v35 }
0x133e   :  { %4929 = vmatmul.bf16.vlgmr.msrb.gmra.mxu3 %v4634_v21  ;;  %5398 = vmatpush.bf16.msrb.mxu2 %v8723_v0 }
0x133f   :  { %5412 = vmatpush.bf16.msrb.mxu3 %v8731_v5 }
0x1341   :  { %5431 = vmatpush.bf16.msra.mxu0 %v8734_v61  ;;  %v4973_v61 = vperm.slane %v7961_v38, 2 }
0x1342   :  { %5399 = vmatpush.bf16.msrb.mxu2 %v8722_v8 }
0x1343   :  { %5413 = vmatpush.bf16.msrb.mxu3 %v8730_v20 }
0x1345   :  { %5432 = vmatpush.bf16.msra.mxu0 %v8733_v14 }
0x1346   :  { %5400 = vmatpush.bf16.msrb.mxu2 %v8721_v58 }
0x1347   :  { %5414 = vmatpush.bf16.msrb.mxu3 %v8729_v11 }
0x1349   :  { %5433 = vmatpush.bf16.msra.mxu0 %v8732_v10 }
0x134a   :  { %5401 = vmatpush.bf16.msrb.mxu2 %v8720_v1 }
0x134b   :  { %5415 = vmatpush.bf16.msrb.mxu3 %v8728_v9 }
0x134d   :  { %8027 = vmatmul.msk.bf16.vlgmr.msra.gmra.mxu2 %vm98_vm0, %v10342_v47 }
0x134e   :  { %8028 = vmatmul.msk.bf16.vlgmr.msra.gmra.mxu3 %vm98_vm0, %v10342_v47  ;;  %v8713_v47 = vld [vmem:[%s11137_s8 + $0x728] sm:$0xff]  ;;  %5402 = vmatpush.bf16.msrb.mxu2 %v8719_v19 }
0x134f   :  { %5386 = vmatpush.bf16.msrb.mxu1 %v8713_v47  ;;  %5416 = vmatpush.bf16.msrb.mxu3 %v8727_v25 }
0x1352   :  { %5403 = vmatpush.bf16.msrb.mxu2 %v8718_v28 }
0x1353   :  { %5387 = vmatpush.bf16.msrb.mxu1 %v8712_v57  ;;  %5417 = vmatpush.bf16.msrb.mxu3 %v8726_v31 }
0x1356   :  { %5404 = vmatpush.bf16.msrb.mxu2 %v8717_v32 }
0x1357   :  { %5388 = vmatpush.bf16.msrb.mxu1 %v8711_v23  ;;  %5418 = vmatpush.bf16.msrb.mxu3 %v8725_v33 }
0x135a   :  { %5405 = vmatpush.bf16.msrb.mxu2 %v8716_v39 }
0x135b   :  { %5389 = vmatpush.bf16.msrb.mxu1 %v8710_v60  ;;  %5419 = vmatpush.bf16.msrb.mxu3 %v8724_v4  ;;  %v4972_v60 = vperm.slane %v7961_v38, 1 }
0x135f   :  { %5390 = vmatpush.bf16.msrb.mxu1 %v8709_v62 }
0x1363   :  { %5391 = vmatpush.bf16.msrb.mxu1 %v8708_v7 }
0x13a8   :  { %v4902_v15 = vpop.f32.mrf.mxu1 }
0x13a9   :  { %v4944_v16 = vpop.f32.mrf.mxu0 }
0x13b0   :  { %v4904_v26 = vpop.f32.mrf.mxu1 }
0x13b1   :  { %v4946_v17 = vpop.f32.mrf.mxu0 }
0x13b8   :  { %v5068_v59 = vpop.f32.mrf.mxu1 }
0x13b9   :  { %v5110_v63 = vpop.f32.mrf.mxu0  ;;  %v5069_v27 = vadd.f32 %v5068_v59, %v4971_v37 }
0x13ba   :  { %v5111_v49 = vadd.f32 %v5110_v63, %v4974_v48 }
0x13bb   :  { %v5115_v2 = vmax.f32 %v5069_v27, 0.0 }
0x13bc   :  { %v5118_v50 = vmax.f32 %v5111_v49, 0.0 }
0x13c0   :  { %v4916_v43 = vpop.f32.mrf.mxu2  ;;  %v5070_v42 = vpop.f32.mrf.mxu1 }
0x13c1   :  { %v4917_v18 = vadd.f32 %v4916_v43, %v4902_v15  ;;  %v4930_v45 = vpop.f32.mrf.mxu3  ;;  %v5071_v34 = vadd.f32 %v5070_v42, %v4971_v37  ;;  %v5112_v3 = vpop.f32.mrf.mxu0 }
0x13c2   :  { %v5113_v24 = vadd.f32 %v5112_v3, %v4974_v48 }
0x13c3   :  { %v4931_v29 = vadd.f32 %v4930_v45, %v4917_v18  ;;  %v5119_v30 = vmax.f32 %v5071_v34, 0.0 }
0x13c4   :  { %v5122_v51 = vmax.f32 %v5113_v24, 0.0 }
0x13c5   :  { %v4945_v41 = vadd.f32 %v4944_v16, %v4931_v29  ;;  %v5123_v21 = vpack.c.bf16 %v5119_v30, %v5115_v2 }
0x13c6   :  { %v5126_v40 = vpack.c.bf16 %v5122_v51, %v5118_v50  ;;  %v8294_v50 = vld [vmem:[%s11138_s9 + $0x30] sm:$0xff] }
0x13c7   :  { %v4949_v52 = vadd.f32 %v4945_v41, %v10930_v12  ;;  %5392 = vmatmul.bf16.vlgmr.msrb.gmra.mxu1 %v5123_v21  ;;  %v8293_v41 = vld [vmem:[%s11138_s9 + $0x28] sm:$0xff] }
0x13c8   :  { %5434 = vmatmul.bf16.vlgmr.msra.gmra.mxu0 %v5126_v40  ;;  %v4918_v36 = vpop.f32.mrf.mxu2 }
0x13c9   :  { %v4919_v53 = vadd.f32 %v4918_v36, %v4904_v26  ;;  %v4932_v47 = vpop.f32.mrf.mxu3 }
0x13cb   :  { %v4933_v54 = vadd.f32 %v4932_v47, %v4919_v53 }
0x13cd   :  { %v4947_v57 = vadd.f32 %v4946_v17, %v4933_v54 }
0x13cf   :  { %v4950_v56 = vadd.f32 %v4947_v57, %v10941_v13  ;;  %v8299_v57 = vld [vmem:[%s11138_s9 + $0x58] sm:$0xff] }
0x13d0   :  { %v5082_v23 = vpop.f32.mrf.mxu2  ;;  %5578 = vmatpush.bf16.msra.mxu2 %v8299_v57 }
0x13d1   :  { %v5096_v35 = vpop.f32.mrf.mxu3  ;;  %v5083_v62 = vadd.f32 %v5082_v23, %v4972_v60 }
0x13d2   :  { %v5097_v0 = vadd.f32 %v5096_v35, %v4973_v61 }
0x13d3   :  { %v5116_v12 = vmax.f32 %v5083_v62, 0.0  ;;  %v8297_v62 = vld [vmem:[%s11138_s9 + $0x48] sm:$0xff] }
0x13d4   :  { %v5117_v10 = vmax.f32 %v5097_v0, 0.0 }
0x13d8   :  { %v5084_v5 = vpop.f32.mrf.mxu2 }
0x13d9   :  { %v5085_v14 = vadd.f32 %v5084_v5, %v4972_v60  ;;  %v5098_v7 = vpop.f32.mrf.mxu3 }
0x13da   :  { %v5099_v8 = vadd.f32 %v5098_v7, %v4973_v61  ;;  %v5488_v7 = vperm.slane %v10901_v44, 4 }
0x13db   :  { %v5120_v20 = vmax.f32 %v5085_v14, 0.0 }
0x13dc   :  { %v5121_v58 = vmax.f32 %v5099_v8, 0.0 }
0x13dd   :  { %v5124_v11 = vpack.c.bf16 %v5120_v20, %v5116_v12 }
0x13de   :  { %v5125_v15 = vpack.c.bf16 %v5121_v58, %v5117_v10  ;;  %v5491_v10 = vperm.slane %v10901_v44, 5  ;;  %v8296_v44 = vld [vmem:[%s11138_s9 + $0x40] sm:$0xff] }
0x13df   :  { %5406 = vmatmul.bf16.vlgmr.msrb.gmra.mxu2 %v5124_v11 }
0x13e0   :  { %5420 = vmatmul.bf16.vlgmr.msrb.gmra.mxu3 %v5125_v15 }
0x1444   :  { %v5393_v16 = vpop.f32.mrf.mxu1 }
0x1445   :  { %v5435_v19 = vpop.f32.mrf.mxu0 }
0x144c   :  { %v5395_v28 = vpop.f32.mrf.mxu1 }
0x144d   :  { %v5437_v37 = vpop.f32.mrf.mxu0 }
0x1462   :  { %v5407_v13 = vpop.f32.mrf.mxu2 }
0x1463   :  { %v5408_v1 = vadd.f32 %v5407_v13, %v5393_v16  ;;  %v5421_v9 = vpop.f32.mrf.mxu3 }
0x1465   :  { %v5422_v25 = vadd.f32 %v5421_v9, %v5408_v1 }
0x1467   :  { %v5436_v26 = vadd.f32 %v5435_v19, %v5422_v25 }
0x1469   :  { %v5440_v17 = vadd.f32 %v5436_v26, %v4949_v52  ;;  %v8292_v52 = vld [vmem:[%s11138_s9 + $0x20] sm:$0xff] }
0x146a   :  { %v5409_v31 = vpop.f32.mrf.mxu2 }
0x146b   :  { %v5410_v32 = vadd.f32 %v5409_v31, %v5395_v28  ;;  %v5442_v33 = vadd.f32 %v5440_v17, %v10336_v6  ;;  %v5423_v38 = vpop.f32.mrf.mxu3 }
0x146d   :  { %v5424_v59 = vadd.f32 %v5423_v38, %v5410_v32  ;;  %v5444_v63 = vsel %vm98_vm0, %v5442_v33, 0.0  ;;  %v8747_v32 = vld [vmem:[%s11139_s10 + $0x38] sm:$0xff]  ;;  %v8745_v38 = vld [vmem:[%s11139_s10 + $0x28] sm:$0xff] }
0x146e   :  { %5445 = vadd.xlane.f32.xlu2 %v5444_v63  ;;  %5654 = vmatpush.bf16.msra.mxu3 %v8747_v32  ;;  %v8743_v63 = vld [vmem:[%s11139_s10 + $0x18] sm:$0xff] }
0x146f   :  { %v5438_v39 = vadd.f32 %v5437_v37, %v5424_v59  ;;  %v8744_v59 = vld [vmem:[%s11139_s10 + $0x20] sm:$0xff] }
0x1470   :  { %v67_v37 = vld [vmem:[%s11140_s11] sm:$0x7] }
0x1471   :  { %v5441_v4 = vadd.f32 %v5438_v39, %v4950_v56  ;;  %v5496_v39 = vperm.slane %v67_v37, 0 }
0x1473   :  { %v5443_v48 = vadd.f32 %v5441_v4, %v10338_v46  ;;  %v8295_v46 = vld [vmem:[%s11138_s9 + $0x38] sm:$0xff] }
0x1474   :  { %5536 = vmatpush.bf16.msra.mxu1 %v8295_v46  ;;  %v5605_v46 = vperm.slane %v67_v37, 2 }
0x1475   :  { %v5447_v27 = vsel %vm98_vm0, %v5443_v48, 0.0 }
0x1476   :  { %5448 = vadd.xlane.f32.xlu1 %v5447_v27 }
0x1478   :  { %5537 = vmatpush.bf16.msra.mxu1 %v8294_v50 }
0x147c   :  { %5538 = vmatpush.bf16.msra.mxu1 %v8293_v41 }
0x1480   :  { %5539 = vmatpush.bf16.msra.mxu1 %v8292_v52 }
0x14e1   :  { %v5446_v49 = vpop.xlane.xlu2 %5445 }
0x14e2   :  { %v5450_v43 = vmul.f32 %v5446_v49, %v9104_v22 }
0x14e4   :  { %v5452_v42 = vsub.f32 %v5442_v33, %v5450_v43  ;;  %v8746_v33 = vld [vmem:[%s11139_s10 + $0x30] sm:$0xff] }
0x14e5   :  { %5655 = vmatpush.bf16.msra.mxu3 %v8746_v33  ;;  %v8742_v43 = vld [vmem:[%s11139_s10 + $0x10] sm:$0xff] }
0x14e6   :  { %v5454_v18 = vmul.f32 %v5452_v42, %v5452_v42 }
0x14e8   :  { %v5456_v6 = vsel %vm98_vm0, %v5454_v18, 0.0  ;;  %v8740_v18 = vld [vmem:[%s11139_s10] sm:$0xff] }
0x14e9   :  { %5457 = vadd.xlane.f32.xlu1 %v5456_v6  ;;  %v5449_v45 = vpop.xlane.xlu1 %5448  ;;  %5656 = vmatpush.bf16.msra.mxu3 %v8745_v38  ;;  %v5546_v6 = vperm.slane %v67_v37, 1 }
0x14ea   :  { %v5451_v34 = vmul.f32 %v5449_v45, %v9104_v22 }
0x14ec   :  { %v5453_v3 = vsub.f32 %v5443_v48, %v5451_v34 }
0x14ed   :  { %5657 = vmatpush.bf16.msra.mxu3 %v8744_v59 }
0x14ee   :  { %v5455_v24 = vmul.f32 %v5453_v3, %v5453_v3 }
0x14f0   :  { %v5459_v2 = vsel %vm98_vm0, %v5455_v24, 0.0 }
0x14f1   :  { %5460 = vadd.xlane.f32.xlu0 %v5459_v2  ;;  %5658 = vmatpush.bf16.msra.mxu3 %v8743_v63 }
0x14f5   :  { %5659 = vmatpush.bf16.msra.mxu3 %v8742_v43 }
0x155c   :  { %v5458_v29 = vpop.xlane.xlu1 %5457 }
0x155d   :  { %v5462_v30 = vmul.f32 %v5458_v29, %v9104_v22 }
0x155f   :  { %v5464_v51 = vadd.f32 1e-05, %v5462_v30 }
0x1561   :  { %8808 = vrsqrt.f32 %v5464_v51  ;;  %vm5472_vm10 = vweird.f32 %v5464_v51 }
0x1564   :  { %v5461_v21 = vpop.xlane.xlu0 %5460 }
0x1565   :  { %v5463_v40 = vmul.f32 %v5461_v21, %v9104_v22  ;;  %v8298_v22 = vld [vmem:[%s11138_s9 + $0x50] sm:$0xff] }
0x1566   :  { %5579 = vmatpush.bf16.msra.mxu2 %v8298_v22 }
0x1567   :  { %v8809_v36 = vpop.eup %8808  ;;  %v5465_v53 = vadd.f32 1e-05, %v5463_v40 }
0x1568   :  { %v5467_v47 = vmul.f32 %v8809_v36, %v5464_v51  ;;  %vm5473_vm9 = vweird.f32 %v8809_v36 }
0x1569   :  { %8810 = vrsqrt.f32 %v5465_v53  ;;  %vm5474_vm11 = vmor %vm5472_vm10, %vm5473_vm9  ;;  %vm5482_vm13 = vweird.f32 %v5465_v53 }
0x156a   :  { %v5468_v54 = vmul.f32 %v8809_v36, %v5467_v47  ;;  %5580 = vmatpush.bf16.msra.mxu2 %v8297_v62 }
0x156c   :  { %v5469_v56 = vmul.f32 0.5, %v5468_v54 }
0x156e   :  { %v5470_v23 = vsub.f32 1.5, %v5469_v56  ;;  %5581 = vmatpush.bf16.msra.mxu2 %v8296_v44 }
0x156f   :  { %v8811_v35 = vpop.eup %8810 }
0x1570   :  { %v5471_v60 = vmul.f32 %v8809_v36, %v5470_v23  ;;  %v5477_v61 = vmul.f32 %v8811_v35, %v5465_v53  ;;  %vm5483_vm12 = vweird.f32 %v8811_v35 }
0x1571   :  { %vm5484_vm14 = vmor %vm5482_vm13, %vm5483_vm12 }
0x1572   :  { %v5475_v0 = vsel %vm5474_vm11, %v8809_v36, %v5471_v60  ;;  %v5478_v5 = vmul.f32 %v8811_v35, %v5477_v61 }
0x1573   :  { %v5486_v8 = vmul.f32 %v5475_v0, %v5452_v42  ;;  %v8741_v42 = vld [vmem:[%s11139_s10 + $0x8] sm:$0xff]  ;;  %s8847_s10 = smov [#allocation2]  }
0x1574   :  { %v5479_v14 = vmul.f32 0.5, %v5478_v5  ;;  %5660 = vmatpush.bf16.msra.mxu3 %v8741_v42  ;;  %s5691_s0 = sshll.u32 %s8847_s10, 4  ;;  %s5692_s0 = int_to_ptr.vmem [resolvable:$true] %s5691_s0 }
0x1575   :  { %v5489_v58 = vmul.f32 %v5488_v7, %v5486_v8 }
0x1576   :  { %v5480_v12 = vsub.f32 1.5, %v5479_v14 }
0x1577   :  { %v5492_v16 = vadd.f32 %v5491_v10, %v5489_v58 }
0x1578   :  { %v5481_v20 = vmul.f32 %v8811_v35, %v5480_v12  ;;  %5661 = vmatpush.bf16.msra.mxu3 %v8740_v18 }
0x1579   :  { %v5494_v9 = vpack.c.bf16 %v5492_v16, %v5492_v16 }
0x157a   :  { %v5485_v11 = vsel %vm5484_vm14, %v8811_v35, %v5481_v20 }
0x157b   :  { %v5487_v15 = vmul.f32 %v5485_v11, %v5453_v3  ;;  %v5499_v26 = vunpack.c.l.b16 %v5494_v9 }
0x157d   :  { %v5490_v13 = vmul.f32 %v5488_v7, %v5487_v15 }
0x157f   :  { %v5493_v1 = vadd.f32 %v5491_v10, %v5490_v13 }
0x1581   :  { %v5495_v19 = vpack.c.bf16 %v5493_v1, %v5493_v1 }
0x1583   :  { %v5500_v25 = vunpack.c.l.b16 %v5495_v19 }
0x1585   :  { %v5501_v17 = vrot.slane %v5500_v25, 7 }
0x1587   :  { %v5503_v28 = vsel %vm5502_vm15, %v5501_v17, %v5499_v26 }
0x1588   :  { %v5504_v31 = vpack.c.b16 %v5503_v28, %v5503_v28 }
0x158a   :  { %8238 = vmatmul.msk.bf16.vlgmr.msra.gmra.mxu1 %vm98_vm0, %v5504_v31 }
0x1607   :  { %v5541_v4 = vpop.f32.mrf.mxu1 }
0x1608   :  { %v5542_v48 = vadd.f32 %v5541_v4, %v5496_v39 }
0x160a   :  { %v5545_v27 = vpack.c.bf16 %v5542_v48, %v5542_v48 }
0x160c   :  { %8255 = vmatmul.msk.bf16.vlgmr.msra.gmra.mxu2 %vm98_vm0, %v5545_v27  ;;  %vm5667_vm0 = vcmp.lt.s32.totalorder %v9014_v55, 7 }
0x160f   :  { %v5543_v49 = vpop.f32.mrf.mxu1 }
0x168f   :  { %v5583_v45 = vpop.f32.mrf.mxu2 }
0x1690   :  { %v5584_v34 = vadd.f32 %v5583_v45, %v5546_v6 }
0x1692   :  { %8812 = vtanh.f32 %v5584_v34 }
0x1697   :  { %v5585_v3 = vpop.f32.mrf.mxu2 }
0x1698   :  { %v8813_v24 = vpop.eup %8812 }
0x1699   :  { %v5588_v2 = vpack.c.bf16 %v8813_v24, %v8813_v24 }
0x169b   :  { %5662 = vmatmul.bf16.vlgmr.msra.gmra.mxu3 %v5588_v2 }
0x171e   :  { %v5663_v29 = vpop.f32.mrf.mxu3 }
0x171f   :  { %v5664_v30 = vadd.f32 %v5663_v29, %v5605_v46 }
0x1721   :  { %v5668_v50 = vsel %vm5667_vm0, %v5664_v30, -1e+30 }
0x1722   :  { %v5670_v51 = vsel %vm5669_vm5, %v5668_v50, -inf }
0x1723   :  { %5671 = vmax.xlane.f32.xlu2 %v5670_v51 }
0x1726   :  { %v5665_v41 = vpop.f32.mrf.mxu3 }
0x1796   :  { %v5672_v21 = vpop.xlane.xlu2 %5671 }
0x1797   :  { %v5673_v40 = vsub.f32 %v5664_v30, %v5672_v21 }
0x1799   :  { %v5674_v52 = vmul.f32 1.442695, %v5673_v40 }
0x179b   :  { %8814 = vpow2.f32 %v5674_v52 }
0x17a1   :  { %v8815_v36 = vpop.eup %8814 }
0x17a2   :  { %v5676_v53 = vsel %vm5667_vm0, %v8815_v36, 0.0 }
0x17a3   :  { %v5677_v47 = vsel %vm5669_vm5, %v5676_v53, 0.0 }
0x17a4   :  { %5678 = vadd.xlane.f32.xlu0 %v5677_v47 }
0x1817   :  { %v5679_v54 = vpop.xlane.xlu0 %5678 }
0x1818   :  { %8816 = vlog2.f32 %v5679_v54 }
0x181e   :  { %v8817_v57 = vpop.eup %8816 }
0x181f   :  { %v5681_v56 = vmul.f32 0.6931472, %v8817_v57 }
0x1821   :  { %v5682_v22 = vadd.f32 %v5681_v56, %v5672_v21 }
0x1823   :  { %v5683_v23 = vsub.f32 %v5664_v30, %v5682_v22 }
0x1825   :  { %v5684_v35 = vsel %vm5667_vm0, %v5683_v23, %v5664_v30 }
0x1826   :  { %5685 = vst [vmem:[#allocation2] sm:$0x3] %v5684_v35 }
0x1827   :  { %5696 = dma.vmem_to_hbm [thread:$0]  %s5692_s0, 32, %s5694_s29, [#allocation3]  }
0x1828   :  { %8844 = dma.done.wait [#allocation3], 32  }
0x1829   :  { %8845 = vsyncadd [#allocation3], 4294967264 }
0x182a   :  { %5701 = vsyncpa [#allocation3], 1 }

</bundles_post_ra>
